<compile_context>
chip_gen: v5e
topology: v5e:2x2
jax: 0.10.0
libtpu: 0.0.40
codegen_flags: <defaults>
</compile_context>

<pallas_src>
import functools

import jax
import jax.numpy as jnp
from jax.experimental import pallas as pl
from jax.experimental.pallas import tpu as pltpu


def _pick_row_tile(h, target=32):
    """Largest divisor of h that is <= target (amortizes per-grid-step overhead)."""
    for th in range(min(h, target), 0, -1):
        if h % th == 0:
            return th
    return h


def _conv3x3_kernel(x_ref, w_ref, o_ref, *, th, w, k, k_pad):
    # x_ref: (1, Cin, H+2, W+2)   full zero-padded image for batch b (VMEM resident)
    # w_ref: (Cout, K_pad)        fused 3x3 weight, [kh, kw, ci] fused-K order, K zero-padded
    # o_ref: (1, Cout, 1, TH, W)  NCHW, W-dense output row tile
    r = pl.program_id(1)
    row0 = r * th

    # Halo'd row strip for this tile: padded rows row0 .. row0+TH+1.
    # Dynamic start lives on the sublane axis only; lane axis stays static.
    strip = x_ref[0, :, pl.ds(row0, th + 2), :]            # (Cin, TH+2, Wp)

    w_mat = w_ref[...]                                     # hoisted, reused for all rows
    pad_rows = None
    if k_pad > k:                                          # K padding -> aligned sublanes
        pad_rows = jnp.zeros((k_pad - k, w), dtype=strip.dtype)

    # Per output row: build the (K_pad, W) im2col patch from 9 static slices and
    # run one fused MXU matmul (K = 9*Cin).  TH is small & static -> fully unrolled.
    for t in range(th):
        taps = []
        for kh in range(3):
            for kw in range(3):
                taps.append(strip[:, t + kh, kw:kw + w])   # (Cin, W), static offsets
        if pad_rows is not None:
            taps.append(pad_rows)
        patch = jnp.concatenate(taps, axis=0)              # (K_pad, W)
        acc = jnp.dot(w_mat, patch,
                      preferred_element_type=jnp.float32)  # (Cout, W), f32 accumulate
        o_ref[0, :, 0, t, :] = acc.astype(o_ref.dtype)     # W-dense NCHW store


def overlap_patch_embed(x_nchw, weight_oihw, *, row_tile=None, compute_dtype=None):
    """3x3 / stride-1 / pad-1 conv, no bias.  NCHW in, NCHW out (nn.Conv2d semantics).

    x_nchw:        (B, Cin, H, W)
    weight_oihw:   (Cout, Cin, 3, 3)   -- nn.Conv2d.weight layout
    row_tile:      output rows per grid step (must divide H); default = largest
                   divisor of H <= 32.  Size so 2x the (Cout, TH, W) output tile
                   plus 2x the padded image fit the per-generation VMEM budget.
    compute_dtype: optional matmul operand dtype (jnp.bfloat16 recommended on
                   v6e/v7x); accumulation is always f32, output keeps x's dtype.
    """
    B, Cin, H, W = x_nchw.shape
    Cout = weight_oihw.shape[0]
    out_dtype = x_nchw.dtype
    cdt = jnp.dtype(compute_dtype) if compute_dtype is not None else jnp.dtype(x_nchw.dtype)
    itemsize = cdt.itemsize

    TH = row_tile if row_tile is not None else _pick_row_tile(H)
    assert H % TH == 0, "row_tile must divide H"
    R = H // TH
    Hp, Wp = H + 2, W + 2

    # Fused K = 9*Cin, zero-padded to the sublane packing granularity.
    K = 9 * Cin
    pack = 8 if itemsize >= 4 else 8 * (4 // itemsize)     # 8 (f32) / 16 (bf16)
    K_pad = -(-K // pack) * pack

    # Single pad pass; channels-first layout is kept (no NCHW<->NHWC transpose).
    # TODO(synk): fold the pad+cast into the kernel (memset halos in VMEM) for
    # later stages where Cin ~ Cout and input traffic matters.
    x_pad = jnp.pad(x_nchw.astype(cdt), ((0, 0), (0, 0), (1, 1), (1, 1)))

    # (Cout, Cin, 3, 3) -> (Cout, 9*Cin) in [kh, kw, ci] fused-K order, zero-pad K.
    w_fused = jnp.transpose(weight_oihw, (0, 2, 3, 1)).reshape(Cout, K).astype(cdt)
    w_fused = jnp.pad(w_fused, ((0, 0), (0, K_pad - K)))

    kernel = functools.partial(_conv3x3_kernel, th=TH, w=W, k=K, k_pad=K_pad)

    # VMEM budget estimate (2x-buffered blocks + working values), capped for v7x.
    in_blk = Cin * Hp * Wp * itemsize
    w_blk = Cout * K_pad * itemsize
    out_blk = Cout * TH * W * jnp.dtype(out_dtype).itemsize
    work = Cin * (TH + 2) * Wp * itemsize + K_pad * W * itemsize + Cout * W * 4
    vmem_est = 2 * (in_blk + w_blk + out_blk) + 4 * work
    vmem_limit = int(min(max(2 * vmem_est, 16 * 2**20), 64 * 2**20))

    cost = pl.CostEstimate(
        flops=2 * B * H * W * Cout * K,
        transcendentals=0,
        bytes_accessed=int(x_pad.size * itemsize + w_fused.size * itemsize
                           + B * Cout * H * W * jnp.dtype(out_dtype).itemsize))

    out = pl.pallas_call(
        kernel,
        out_shape=jax.ShapeDtypeStruct((B, Cout, R, TH, W), out_dtype),
        grid_spec=pltpu.PrefetchScalarGridSpec(
            num_scalar_prefetch=0,
            grid=(B, R),
            in_specs=[
                # Full padded image per batch element: resident across all row
                # tiles of that image, auto double-buffered across b.
                pl.BlockSpec((1, Cin, Hp, Wp), lambda b, r: (b, 0, 0, 0)),
                # Fused weight: resident for the whole call.
                pl.BlockSpec((Cout, K_pad), lambda b, r: (0, 0)),
            ],
            out_specs=pl.BlockSpec((1, Cout, 1, TH, W), lambda b, r: (b, 0, r, 0, 0)),
        ),
        compiler_params=pltpu.CompilerParams(
            dimension_semantics=("parallel", "parallel"),
            vmem_limit_bytes=vmem_limit),
        cost_estimate=cost,
    )(x_pad, w_fused)

    # (B, Cout, R, TH, W) -> (B, Cout, H, W): contiguous merge of R and TH (free).
    return out.reshape(B, Cout, H, W)


if __name__ == "__main__":
    key = jax.random.PRNGKey(0)
    kx, kw = jax.random.split(key)

    B, Cin, H, W = 2, 4, 16, 16
    embed_dim = 32  # small analogue of embed_dim=48

    x = jax.random.normal(kx, (B, Cin, H, W), dtype=jnp.float32)
    # nn.Conv2d weight shape: (out_c, in_c, kh, kw); deterministic init.
    weight = jax.random.normal(kw, (embed_dim, Cin, 3, 3), dtype=jnp.float32) * 0.1

    # Reference: XLA conv with identical NCHW / OIHW / pad-1 semantics.
    ref = jax.lax.conv_general_dilated(
        x, weight, window_strides=(1, 1), padding=((1, 1), (1, 1)),
        dimension_numbers=("NCHW", "OIHW", "NCHW"))

    # 1) Default tiling (TH = H here, single row tile per image).
    out = jax.block_until_ready(overlap_patch_embed(x, weight))
    assert out.shape == (B, embed_dim, H, W)
    assert jnp.allclose(out, ref, atol=1e-4, rtol=1e-4), "f32 mismatch (default tile)"

    # 2) Smaller row tile: exercises the dynamic halo-strip offset (R > 1).
    out_t = jax.block_until_ready(overlap_patch_embed(x, weight, row_tile=8))
    assert jnp.allclose(out_t, ref, atol=1e-4, rtol=1e-4), "f32 mismatch (row_tile=8)"

    # 3) bf16 compute path (recommended on v6e/v7x); loosened tolerance.
    out_bf = jax.block_until_ready(
        overlap_patch_embed(x, weight, compute_dtype=jnp.bfloat16))
    assert out_bf.dtype == x.dtype
    assert jnp.allclose(out_bf, ref, atol=5e-2, rtol=5e-2), "bf16 mismatch"

    print("KERNEL_OK")
</pallas_src>

<mosaic_0001>
module attributes {stable_mosaic.version = 11 : i64} {
  func.func @_conv3x3_kernel(%arg0: i32, %arg1: i32, %arg2: memref<1x4x18x18xf32, #tpu.memory_space<vmem>>, %arg3: memref<32x40xf32, #tpu.memory_space<vmem>>, %arg4: memref<1x32x1x16x16xf32, #tpu.memory_space<vmem>>) attributes {dimension_semantics = [#tpu.dimension_semantics<parallel>, #tpu.dimension_semantics<parallel>], iteration_bounds = array<i64: 2, 1>, scalar_prefetch = 0 : i64, scratch_operands = 0 : i64, tpu.core_type = #tpu.core_type<tc>, window_params = [{transform_indices = @transform_0, window_bounds = array<i64: 1, 4, 18, 18>}, {pipeline_mode = #tpu.pipeline_mode<synchronous>, transform_indices = @transform_1, window_bounds = array<i64: 32, 40>}, {transform_indices = @transform_2, window_bounds = array<i64: 1, 32, 1, 16, 16>}]} {
    %c16_i32 = arith.constant 16 : i32
    %0 = arith.muli %arg1, %c16_i32 : i32
    %c0 = arith.constant 0 : index
    %c0_0 = arith.constant 0 : index
    %1 = arith.index_cast %0 : i32 to index
    %c0_1 = arith.constant 0 : index
    %2 = vector.load %arg2[%c0, %c0_0, %1, %c0_1] : memref<1x4x18x18xf32, #tpu.memory_space<vmem>>, vector<1x4x18x18xf32>
    %3 = vector.shape_cast %2 : vector<1x4x18x18xf32> to vector<4x18x18xf32>
    %c0_2 = arith.constant 0 : index
    %c0_3 = arith.constant 0 : index
    %4 = vector.load %arg3[%c0_2, %c0_3] : memref<32x40xf32, #tpu.memory_space<vmem>>, vector<32x40xf32>
    %cst = arith.constant 0.000000e+00 : f32
    %5 = vector.broadcast %cst : f32 to vector<4x16xf32>
    %6 = vector.extract_strided_slice %3 {offsets = [0, 0, 0], sizes = [4, 1, 16], strides = [1, 1, 1]} : vector<4x18x18xf32> to vector<4x1x16xf32>
    %7 = vector.shape_cast %6 : vector<4x1x16xf32> to vector<4x16xf32>
    %8 = vector.extract_strided_slice %3 {offsets = [0, 0, 1], sizes = [4, 1, 16], strides = [1, 1, 1]} : vector<4x18x18xf32> to vector<4x1x16xf32>
    %9 = vector.shape_cast %8 : vector<4x1x16xf32> to vector<4x16xf32>
    %10 = vector.extract_strided_slice %3 {offsets = [0, 0, 2], sizes = [4, 1, 16], strides = [1, 1, 1]} : vector<4x18x18xf32> to vector<4x1x16xf32>
    %11 = vector.shape_cast %10 : vector<4x1x16xf32> to vector<4x16xf32>
    %12 = vector.extract_strided_slice %3 {offsets = [0, 1, 0], sizes = [4, 1, 16], strides = [1, 1, 1]} : vector<4x18x18xf32> to vector<4x1x16xf32>
    %13 = vector.shape_cast %12 : vector<4x1x16xf32> to vector<4x16xf32>
    %14 = vector.extract_strided_slice %3 {offsets = [0, 1, 1], sizes = [4, 1, 16], strides = [1, 1, 1]} : vector<4x18x18xf32> to vector<4x1x16xf32>
    %15 = vector.shape_cast %14 : vector<4x1x16xf32> to vector<4x16xf32>
    %16 = vector.extract_strided_slice %3 {offsets = [0, 1, 2], sizes = [4, 1, 16], strides = [1, 1, 1]} : vector<4x18x18xf32> to vector<4x1x16xf32>
    %17 = vector.shape_cast %16 : vector<4x1x16xf32> to vector<4x16xf32>
    %18 = vector.extract_strided_slice %3 {offsets = [0, 2, 0], sizes = [4, 1, 16], strides = [1, 1, 1]} : vector<4x18x18xf32> to vector<4x1x16xf32>
    %19 = vector.shape_cast %18 : vector<4x1x16xf32> to vector<4x16xf32>
    %20 = vector.extract_strided_slice %3 {offsets = [0, 2, 1], sizes = [4, 1, 16], strides = [1, 1, 1]} : vector<4x18x18xf32> to vector<4x1x16xf32>
    %21 = vector.shape_cast %20 : vector<4x1x16xf32> to vector<4x16xf32>
    %22 = vector.extract_strided_slice %3 {offsets = [0, 2, 2], sizes = [4, 1, 16], strides = [1, 1, 1]} : vector<4x18x18xf32> to vector<4x1x16xf32>
    %23 = vector.shape_cast %22 : vector<4x1x16xf32> to vector<4x16xf32>
    %24 = tpu.concatenate %7, %9, %11, %13, %15, %17, %19, %21, %23, %5 in 0 : vector<4x16xf32>, vector<4x16xf32>, vector<4x16xf32>, vector<4x16xf32>, vector<4x16xf32>, vector<4x16xf32>, vector<4x16xf32>, vector<4x16xf32>, vector<4x16xf32>, vector<4x16xf32> -> vector<40x16xf32>
    %cst_4 = arith.constant dense<0.000000e+00> : vector<32x16xf32>
    %25 = tpu.matmul %4, %24, %cst_4 {dimension_numbers = #tpu.dot_dimension_numbers<[1], [0], [0], [1], [0, 0, 1, 1], [], []>} : vector<32x40xf32>, vector<40x16xf32>, vector<32x16xf32> -> vector<32x16xf32>
    %c0_5 = arith.constant 0 : index
    %c0_6 = arith.constant 0 : index
    %c0_7 = arith.constant 0 : index
    %c0_8 = arith.constant 0 : index
    %c0_9 = arith.constant 0 : index
    %26 = vector.load %arg4[%c0_5, %c0_6, %c0_7, %c0_8, %c0_9] : memref<1x32x1x16x16xf32, #tpu.memory_space<vmem>>, vector<1x32x1x1x16xf32>
    %27 = vector.shape_cast %26 : vector<1x32x1x1x16xf32> to vector<32x16xf32>
    %28 = vector.shape_cast %25 : vector<32x16xf32> to vector<1x32x1x1x16xf32>
    tpu.vector_store %arg4[%c0_5, %c0_6, %c0_7, %c0_8, %c0_9], %28 {strides = array<i32>} : memref<1x32x1x16x16xf32, #tpu.memory_space<vmem>>, vector<1x32x1x1x16xf32>,
    %29 = vector.extract_strided_slice %3 {offsets = [0, 1, 0], sizes = [4, 1, 16], strides = [1, 1, 1]} : vector<4x18x18xf32> to vector<4x1x16xf32>
    %30 = vector.shape_cast %29 : vector<4x1x16xf32> to vector<4x16xf32>
    %31 = vector.extract_strided_slice %3 {offsets = [0, 1, 1], sizes = [4, 1, 16], strides = [1, 1, 1]} : vector<4x18x18xf32> to vector<4x1x16xf32>
    %32 = vector.shape_cast %31 : vector<4x1x16xf32> to vector<4x16xf32>
    %33 = vector.extract_strided_slice %3 {offsets = [0, 1, 2], sizes = [4, 1, 16], strides = [1, 1, 1]} : vector<4x18x18xf32> to vector<4x1x16xf32>
    %34 = vector.shape_cast %33 : vector<4x1x16xf32> to vector<4x16xf32>
    %35 = vector.extract_strided_slice %3 {offsets = [0, 2, 0], sizes = [4, 1, 16], strides = [1, 1, 1]} : vector<4x18x18xf32> to vector<4x1x16xf32>
    %36 = vector.shape_cast %35 : vector<4x1x16xf32> to vector<4x16xf32>
    %37 = vector.extract_strided_slice %3 {offsets = [0, 2, 1], sizes = [4, 1, 16], strides = [1, 1, 1]} : vector<4x18x18xf32> to vector<4x1x16xf32>
    %38 = vector.shape_cast %37 : vector<4x1x16xf32> to vector<4x16xf32>
    %39 = vector.extract_strided_slice %3 {offsets = [0, 2, 2], sizes = [4, 1, 16], strides = [1, 1, 1]} : vector<4x18x18xf32> to vector<4x1x16xf32>
    %40 = vector.shape_cast %39 : vector<4x1x16xf32> to vector<4x16xf32>
    %41 = vector.extract_strided_slice %3 {offsets = [0, 3, 0], sizes = [4, 1, 16], strides = [1, 1, 1]} : vector<4x18x18xf32> to vector<4x1x16xf32>
    %42 = vector.shape_cast %41 : vector<4x1x16xf32> to vector<4x16xf32>
    %43 = vector.extract_strided_slice %3 {offsets = [0, 3, 1], sizes = [4, 1, 16], strides = [1, 1, 1]} : vector<4x18x18xf32> to vector<4x1x16xf32>
    %44 = vector.shape_cast %43 : vector<4x1x16xf32> to vector<4x16xf32>
    %45 = vector.extract_strided_slice %3 {offsets = [0, 3, 2], sizes = [4, 1, 16], strides = [1, 1, 1]} : vector<4x18x18xf32> to vector<4x1x16xf32>
    %46 = vector.shape_cast %45 : vector<4x1x16xf32> to vector<4x16xf32>
    %47 = tpu.concatenate %30, %32, %34, %36, %38, %40, %42, %44, %46, %5 in 0 : vector<4x16xf32>, vector<4x16xf32>, vector<4x16xf32>, vector<4x16xf32>, vector<4x16xf32>, vector<4x16xf32>, vector<4x16xf32>, vector<4x16xf32>, vector<4x16xf32>, vector<4x16xf32> -> vector<40x16xf32>
    %cst_10 = arith.constant dense<0.000000e+00> : vector<32x16xf32>
    %48 = tpu.matmul %4, %47, %cst_10 {dimension_numbers = #tpu.dot_dimension_numbers<[1], [0], [0], [1], [0, 0, 1, 1], [], []>} : vector<32x40xf32>, vector<40x16xf32>, vector<32x16xf32> -> vector<32x16xf32>
    %c0_11 = arith.constant 0 : index
    %c0_12 = arith.constant 0 : index
    %c0_13 = arith.constant 0 : index
    %c1 = arith.constant 1 : index
    %c0_14 = arith.constant 0 : index
    %49 = vector.load %arg4[%c0_11, %c0_12, %c0_13, %c1, %c0_14] : memref<1x32x1x16x16xf32, #tpu.memory_space<vmem>>, vector<1x32x1x1x16xf32>
    %50 = vector.shape_cast %49 : vector<1x32x1x1x16xf32> to vector<32x16xf32>
    %51 = vector.shape_cast %48 : vector<32x16xf32> to vector<1x32x1x1x16xf32>
    tpu.vector_store %arg4[%c0_11, %c0_12, %c0_13, %c1, %c0_14], %51 {strides = array<i32>} : memref<1x32x1x16x16xf32, #tpu.memory_space<vmem>>, vector<1x32x1x1x16xf32>,
    %52 = vector.extract_strided_slice %3 {offsets = [0, 2, 0], sizes = [4, 1, 16], strides = [1, 1, 1]} : vector<4x18x18xf32> to vector<4x1x16xf32>
    %53 = vector.shape_cast %52 : vector<4x1x16xf32> to vector<4x16xf32>
    %54 = vector.extract_strided_slice %3 {offsets = [0, 2, 1], sizes = [4, 1, 16], strides = [1, 1, 1]} : vector<4x18x18xf32> to vector<4x1x16xf32>
    %55 = vector.shape_cast %54 : vector<4x1x16xf32> to vector<4x16xf32>
    %56 = vector.extract_strided_slice %3 {offsets = [0, 2, 2], sizes = [4, 1, 16], strides = [1, 1, 1]} : vector<4x18x18xf32> to vector<4x1x16xf32>
    %57 = vector.shape_cast %56 : vector<4x1x16xf32> to vector<4x16xf32>
    %58 = vector.extract_strided_slice %3 {offsets = [0, 3, 0], sizes = [4, 1, 16], strides = [1, 1, 1]} : vector<4x18x18xf32> to vector<4x1x16xf32>
    %59 = vector.shape_cast %58 : vector<4x1x16xf32> to vector<4x16xf32>
    %60 = vector.extract_strided_slice %3 {offsets = [0, 3, 1], sizes = [4, 1, 16], strides = [1, 1, 1]} : vector<4x18x18xf32> to vector<4x1x16xf32>
    %61 = vector.shape_cast %60 : vector<4x1x16xf32> to vector<4x16xf32>
    %62 = vector.extract_strided_slice %3 {offsets = [0, 3, 2], sizes = [4, 1, 16], strides = [1, 1, 1]} : vector<4x18x18xf32> to vector<4x1x16xf32>
    %63 = vector.shape_cast %62 : vector<4x1x16xf32> to vector<4x16xf32>
    %64 = vector.extract_strided_slice %3 {offsets = [0, 4, 0], sizes = [4, 1, 16], strides = [1, 1, 1]} : vector<4x18x18xf32> to vector<4x1x16xf32>
    %65 = vector.shape_cast %64 : vector<4x1x16xf32> to vector<4x16xf32>
    %66 = vector.extract_strided_slice %3 {offsets = [0, 4, 1], sizes = [4, 1, 16], strides = [1, 1, 1]} : vector<4x18x18xf32> to vector<4x1x16xf32>
    %67 = vector.shape_cast %66 : vector<4x1x16xf32> to vector<4x16xf32>
    %68 = vector.extract_strided_slice %3 {offsets = [0, 4, 2], sizes = [4, 1, 16], strides = [1, 1, 1]} : vector<4x18x18xf32> to vector<4x1x16xf32>
    %69 = vector.shape_cast %68 : vector<4x1x16xf32> to vector<4x16xf32>
    %70 = tpu.concatenate %53, %55, %57, %59, %61, %63, %65, %67, %69, %5 in 0 : vector<4x16xf32>, vector<4x16xf32>, vector<4x16xf32>, vector<4x16xf32>, vector<4x16xf32>, vector<4x16xf32>, vector<4x16xf32>, vector<4x16xf32>, vector<4x16xf32>, vector<4x16xf32> -> vector<40x16xf32>
    %cst_15 = arith.constant dense<0.000000e+00> : vector<32x16xf32>
    %71 = tpu.matmul %4, %70, %cst_15 {dimension_numbers = #tpu.dot_dimension_numbers<[1], [0], [0], [1], [0, 0, 1, 1], [], []>} : vector<32x40xf32>, vector<40x16xf32>, vector<32x16xf32> -> vector<32x16xf32>
    %c0_16 = arith.constant 0 : index
    %c0_17 = arith.constant 0 : index
    %c0_18 = arith.constant 0 : index
    %c2 = arith.constant 2 : index
    %c0_19 = arith.constant 0 : index
    %72 = vector.load %arg4[%c0_16, %c0_17, %c0_18, %c2, %c0_19] : memref<1x32x1x16x16xf32, #tpu.memory_space<vmem>>, vector<1x32x1x1x16xf32>
    %73 = vector.shape_cast %72 : vector<1x32x1x1x16xf32> to vector<32x16xf32>
    %74 = vector.shape_cast %71 : vector<32x16xf32> to vector<1x32x1x1x16xf32>
    tpu.vector_store %arg4[%c0_16, %c0_17, %c0_18, %c2, %c0_19], %74 {strides = array<i32>} : memref<1x32x1x16x16xf32, #tpu.memory_space<vmem>>, vector<1x32x1x1x16xf32>,
    %75 = vector.extract_strided_slice %3 {offsets = [0, 3, 0], sizes = [4, 1, 16], strides = [1, 1, 1]} : vector<4x18x18xf32> to vector<4x1x16xf32>
    %76 = vector.shape_cast %75 : vector<4x1x16xf32> to vector<4x16xf32>
    %77 = vector.extract_strided_slice %3 {offsets = [0, 3, 1], sizes = [4, 1, 16], strides = [1, 1, 1]} : vector<4x18x18xf32> to vector<4x1x16xf32>
    %78 = vector.shape_cast %77 : vector<4x1x16xf32> to vector<4x16xf32>
    %79 = vector.extract_strided_slice %3 {offsets = [0, 3, 2], sizes = [4, 1, 16], strides = [1, 1, 1]} : vector<4x18x18xf32> to vector<4x1x16xf32>
    %80 = vector.shape_cast %79 : vector<4x1x16xf32> to vector<4x16xf32>
    %81 = vector.extract_strided_slice %3 {offsets = [0, 4, 0], sizes = [4, 1, 16], strides = [1, 1, 1]} : vector<4x18x18xf32> to vector<4x1x16xf32>
    %82 = vector.shape_cast %81 : vector<4x1x16xf32> to vector<4x16xf32>
    %83 = vector.extract_strided_slice %3 {offsets = [0, 4, 1], sizes = [4, 1, 16], strides = [1, 1, 1]} : vector<4x18x18xf32> to vector<4x1x16xf32>
    %84 = vector.shape_cast %83 : vector<4x1x16xf32> to vector<4x16xf32>
    %85 = vector.extract_strided_slice %3 {offsets = [0, 4, 2], sizes = [4, 1, 16], strides = [1, 1, 1]} : vector<4x18x18xf32> to vector<4x1x16xf32>
    %86 = vector.shape_cast %85 : vector<4x1x16xf32> to vector<4x16xf32>
    %87 = vector.extract_strided_slice %3 {offsets = [0, 5, 0], sizes = [4, 1, 16], strides = [1, 1, 1]} : vector<4x18x18xf32> to vector<4x1x16xf32>
    %88 = vector.shape_cast %87 : vector<4x1x16xf32> to vector<4x16xf32>
    %89 = vector.extract_strided_slice %3 {offsets = [0, 5, 1], sizes = [4, 1, 16], strides = [1, 1, 1]} : vector<4x18x18xf32> to vector<4x1x16xf32>
    %90 = vector.shape_cast %89 : vector<4x1x16xf32> to vector<4x16xf32>
    %91 = vector.extract_strided_slice %3 {offsets = [0, 5, 2], sizes = [4, 1, 16], strides = [1, 1, 1]} : vector<4x18x18xf32> to vector<4x1x16xf32>
    %92 = vector.shape_cast %91 : vector<4x1x16xf32> to vector<4x16xf32>
    %93 = tpu.concatenate %76, %78, %80, %82, %84, %86, %88, %90, %92, %5 in 0 : vector<4x16xf32>, vector<4x16xf32>, vector<4x16xf32>, vector<4x16xf32>, vector<4x16xf32>, vector<4x16xf32>, vector<4x16xf32>, vector<4x16xf32>, vector<4x16xf32>, vector<4x16xf32> -> vector<40x16xf32>
    %cst_20 = arith.constant dense<0.000000e+00> : vector<32x16xf32>
    %94 = tpu.matmul %4, %93, %cst_20 {dimension_numbers = #tpu.dot_dimension_numbers<[1], [0], [0], [1], [0, 0, 1, 1], [], []>} : vector<32x40xf32>, vector<40x16xf32>, vector<32x16xf32> -> vector<32x16xf32>
    %c0_21 = arith.constant 0 : index
    %c0_22 = arith.constant 0 : index
    %c0_23 = arith.constant 0 : index
    %c3 = arith.constant 3 : index
    %c0_24 = arith.constant 0 : index
    %95 = vector.load %arg4[%c0_21, %c0_22, %c0_23, %c3, %c0_24] : memref<1x32x1x16x16xf32, #tpu.memory_space<vmem>>, vector<1x32x1x1x16xf32>
    %96 = vector.shape_cast %95 : vector<1x32x1x1x16xf32> to vector<32x16xf32>
    %97 = vector.shape_cast %94 : vector<32x16xf32> to vector<1x32x1x1x16xf32>
    tpu.vector_store %arg4[%c0_21, %c0_22, %c0_23, %c3, %c0_24], %97 {strides = array<i32>} : memref<1x32x1x16x16xf32, #tpu.memory_space<vmem>>, vector<1x32x1x1x16xf32>,
    %98 = vector.extract_strided_slice %3 {offsets = [0, 4, 0], sizes = [4, 1, 16], strides = [1, 1, 1]} : vector<4x18x18xf32> to vector<4x1x16xf32>
    %99 = vector.shape_cast %98 : vector<4x1x16xf32> to vector<4x16xf32>
    %100 = vector.extract_strided_slice %3 {offsets = [0, 4, 1], sizes = [4, 1, 16], strides = [1, 1, 1]} : vector<4x18x18xf32> to vector<4x1x16xf32>
    %101 = vector.shape_cast %100 : vector<4x1x16xf32> to vector<4x16xf32>
    %102 = vector.extract_strided_slice %3 {offsets = [0, 4, 2], sizes = [4, 1, 16], strides = [1, 1, 1]} : vector<4x18x18xf32> to vector<4x1x16xf32>
    %103 = vector.shape_cast %102 : vector<4x1x16xf32> to vector<4x16xf32>
    %104 = vector.extract_strided_slice %3 {offsets = [0, 5, 0], sizes = [4, 1, 16], strides = [1, 1, 1]} : vector<4x18x18xf32> to vector<4x1x16xf32>
    %105 = vector.shape_cast %104 : vector<4x1x16xf32> to vector<4x16xf32>
    %106 = vector.extract_strided_slice %3 {offsets = [0, 5, 1], sizes = [4, 1, 16], strides = [1, 1, 1]} : vector<4x18x18xf32> to vector<4x1x16xf32>
    %107 = vector.shape_cast %106 : vector<4x1x16xf32> to vector<4x16xf32>
    %108 = vector.extract_strided_slice %3 {offsets = [0, 5, 2], sizes = [4, 1, 16], strides = [1, 1, 1]} : vector<4x18x18xf32> to vector<4x1x16xf32>
    %109 = vector.shape_cast %108 : vector<4x1x16xf32> to vector<4x16xf32>
    %110 = vector.extract_strided_slice %3 {offsets = [0, 6, 0], sizes = [4, 1, 16], strides = [1, 1, 1]} : vector<4x18x18xf32> to vector<4x1x16xf32>
    %111 = vector.shape_cast %110 : vector<4x1x16xf32> to vector<4x16xf32>
    %112 = vector.extract_strided_slice %3 {offsets = [0, 6, 1], sizes = [4, 1, 16], strides = [1, 1, 1]} : vector<4x18x18xf32> to vector<4x1x16xf32>
    %113 = vector.shape_cast %112 : vector<4x1x16xf32> to vector<4x16xf32>
    %114 = vector.extract_strided_slice %3 {offsets = [0, 6, 2], sizes = [4, 1, 16], strides = [1, 1, 1]} : vector<4x18x18xf32> to vector<4x1x16xf32>
    %115 = vector.shape_cast %114 : vector<4x1x16xf32> to vector<4x16xf32>
    %116 = tpu.concatenate %99, %101, %103, %105, %107, %109, %111, %113, %115, %5 in 0 : vector<4x16xf32>, vector<4x16xf32>, vector<4x16xf32>, vector<4x16xf32>, vector<4x16xf32>, vector<4x16xf32>, vector<4x16xf32>, vector<4x16xf32>, vector<4x16xf32>, vector<4x16xf32> -> vector<40x16xf32>
    %cst_25 = arith.constant dense<0.000000e+00> : vector<32x16xf32>
    %117 = tpu.matmul %4, %116, %cst_25 {dimension_numbers = #tpu.dot_dimension_numbers<[1], [0], [0], [1], [0, 0, 1, 1], [], []>} : vector<32x40xf32>, vector<40x16xf32>, vector<32x16xf32> -> vector<32x16xf32>
    %c0_26 = arith.constant 0 : index
    %c0_27 = arith.constant 0 : index
    %c0_28 = arith.constant 0 : index
    %c4 = arith.constant 4 : index
    %c0_29 = arith.constant 0 : index
    %118 = vector.load %arg4[%c0_26, %c0_27, %c0_28, %c4, %c0_29] : memref<1x32x1x16x16xf32, #tpu.memory_space<vmem>>, vector<1x32x1x1x16xf32>
    %119 = vector.shape_cast %118 : vector<1x32x1x1x16xf32> to vector<32x16xf32>
    %120 = vector.shape_cast %117 : vector<32x16xf32> to vector<1x32x1x1x16xf32>
    tpu.vector_store %arg4[%c0_26, %c0_27, %c0_28, %c4, %c0_29], %120 {strides = array<i32>} : memref<1x32x1x16x16xf32, #tpu.memory_space<vmem>>, vector<1x32x1x1x16xf32>,
    %121 = vector.extract_strided_slice %3 {offsets = [0, 5, 0], sizes = [4, 1, 16], strides = [1, 1, 1]} : vector<4x18x18xf32> to vector<4x1x16xf32>
    %122 = vector.shape_cast %121 : vector<4x1x16xf32> to vector<4x16xf32>
    %123 = vector.extract_strided_slice %3 {offsets = [0, 5, 1], sizes = [4, 1, 16], strides = [1, 1, 1]} : vector<4x18x18xf32> to vector<4x1x16xf32>
    %124 = vector.shape_cast %123 : vector<4x1x16xf32> to vector<4x16xf32>
    %125 = vector.extract_strided_slice %3 {offsets = [0, 5, 2], sizes = [4, 1, 16], strides = [1, 1, 1]} : vector<4x18x18xf32> to vector<4x1x16xf32>
    %126 = vector.shape_cast %125 : vector<4x1x16xf32> to vector<4x16xf32>
    %127 = vector.extract_strided_slice %3 {offsets = [0, 6, 0], sizes = [4, 1, 16], strides = [1, 1, 1]} : vector<4x18x18xf32> to vector<4x1x16xf32>
    %128 = vector.shape_cast %127 : vector<4x1x16xf32> to vector<4x16xf32>
    %129 = vector.extract_strided_slice %3 {offsets = [0, 6, 1], sizes = [4, 1, 16], strides = [1, 1, 1]} : vector<4x18x18xf32> to vector<4x1x16xf32>
    %130 = vector.shape_cast %129 : vector<4x1x16xf32> to vector<4x16xf32>
    %131 = vector.extract_strided_slice %3 {offsets = [0, 6, 2], sizes = [4, 1, 16], strides = [1, 1, 1]} : vector<4x18x18xf32> to vector<4x1x16xf32>
    %132 = vector.shape_cast %131 : vector<4x1x16xf32> to vector<4x16xf32>
    %133 = vector.extract_strided_slice %3 {offsets = [0, 7, 0], sizes = [4, 1, 16], strides = [1, 1, 1]} : vector<4x18x18xf32> to vector<4x1x16xf32>
    %134 = vector.shape_cast %133 : vector<4x1x16xf32> to vector<4x16xf32>
    %135 = vector.extract_strided_slice %3 {offsets = [0, 7, 1], sizes = [4, 1, 16], strides = [1, 1, 1]} : vector<4x18x18xf32> to vector<4x1x16xf32>
    %136 = vector.shape_cast %135 : vector<4x1x16xf32> to vector<4x16xf32>
    %137 = vector.extract_strided_slice %3 {offsets = [0, 7, 2], sizes = [4, 1, 16], strides = [1, 1, 1]} : vector<4x18x18xf32> to vector<4x1x16xf32>
    %138 = vector.shape_cast %137 : vector<4x1x16xf32> to vector<4x16xf32>
    %139 = tpu.concatenate %122, %124, %126, %128, %130, %132, %134, %136, %138, %5 in 0 : vector<4x16xf32>, vector<4x16xf32>, vector<4x16xf32>, vector<4x16xf32>, vector<4x16xf32>, vector<4x16xf32>, vector<4x16xf32>, vector<4x16xf32>, vector<4x16xf32>, vector<4x16xf32> -> vector<40x16xf32>
    %cst_30 = arith.constant dense<0.000000e+00> : vector<32x16xf32>
    %140 = tpu.matmul %4, %139, %cst_30 {dimension_numbers = #tpu.dot_dimension_numbers<[1], [0], [0], [1], [0, 0, 1, 1], [], []>} : vector<32x40xf32>, vector<40x16xf32>, vector<32x16xf32> -> vector<32x16xf32>
    %c0_31 = arith.constant 0 : index
    %c0_32 = arith.constant 0 : index
    %c0_33 = arith.constant 0 : index
    %c5 = arith.constant 5 : index
    %c0_34 = arith.constant 0 : index
    %141 = vector.load %arg4[%c0_31, %c0_32, %c0_33, %c5, %c0_34] : memref<1x32x1x16x16xf32, #tpu.memory_space<vmem>>, vector<1x32x1x1x16xf32>
    %142 = vector.shape_cast %141 : vector<1x32x1x1x16xf32> to vector<32x16xf32>
    %143 = vector.shape_cast %140 : vector<32x16xf32> to vector<1x32x1x1x16xf32>
    tpu.vector_store %arg4[%c0_31, %c0_32, %c0_33, %c5, %c0_34], %143 {strides = array<i32>} : memref<1x32x1x16x16xf32, #tpu.memory_space<vmem>>, vector<1x32x1x1x16xf32>,
    %144 = vector.extract_strided_slice %3 {offsets = [0, 6, 0], sizes = [4, 1, 16], strides = [1, 1, 1]} : vector<4x18x18xf32> to vector<4x1x16xf32>
    %145 = vector.shape_cast %144 : vector<4x1x16xf32> to vector<4x16xf32>
    %146 = vector.extract_strided_slice %3 {offsets = [0, 6, 1], sizes = [4, 1, 16], strides = [1, 1, 1]} : vector<4x18x18xf32> to vector<4x1x16xf32>
    %147 = vector.shape_cast %146 : vector<4x1x16xf32> to vector<4x16xf32>
    %148 = vector.extract_strided_slice %3 {offsets = [0, 6, 2], sizes = [4, 1, 16], strides = [1, 1, 1]} : vector<4x18x18xf32> to vector<4x1x16xf32>
    %149 = vector.shape_cast %148 : vector<4x1x16xf32> to vector<4x16xf32>
    %150 = vector.extract_strided_slice %3 {offsets = [0, 7, 0], sizes = [4, 1, 16], strides = [1, 1, 1]} : vector<4x18x18xf32> to vector<4x1x16xf32>
    %151 = vector.shape_cast %150 : vector<4x1x16xf32> to vector<4x16xf32>
    %152 = vector.extract_strided_slice %3 {offsets = [0, 7, 1], sizes = [4, 1, 16], strides = [1, 1, 1]} : vector<4x18x18xf32> to vector<4x1x16xf32>
    %153 = vector.shape_cast %152 : vector<4x1x16xf32> to vector<4x16xf32>
    %154 = vector.extract_strided_slice %3 {offsets = [0, 7, 2], sizes = [4, 1, 16], strides = [1, 1, 1]} : vector<4x18x18xf32> to vector<4x1x16xf32>
    %155 = vector.shape_cast %154 : vector<4x1x16xf32> to vector<4x16xf32>
    %156 = vector.extract_strided_slice %3 {offsets = [0, 8, 0], sizes = [4, 1, 16], strides = [1, 1, 1]} : vector<4x18x18xf32> to vector<4x1x16xf32>
    %157 = vector.shape_cast %156 : vector<4x1x16xf32> to vector<4x16xf32>
    %158 = vector.extract_strided_slice %3 {offsets = [0, 8, 1], sizes = [4, 1, 16], strides = [1, 1, 1]} : vector<4x18x18xf32> to vector<4x1x16xf32>
    %159 = vector.shape_cast %158 : vector<4x1x16xf32> to vector<4x16xf32>
    %160 = vector.extract_strided_slice %3 {offsets = [0, 8, 2], sizes = [4, 1, 16], strides = [1, 1, 1]} : vector<4x18x18xf32> to vector<4x1x16xf32>
    %161 = vector.shape_cast %160 : vector<4x1x16xf32> to vector<4x16xf32>
    %162 = tpu.concatenate %145, %147, %149, %151, %153, %155, %157, %159, %161, %5 in 0 : vector<4x16xf32>, vector<4x16xf32>, vector<4x16xf32>, vector<4x16xf32>, vector<4x16xf32>, vector<4x16xf32>, vector<4x16xf32>, vector<4x16xf32>, vector<4x16xf32>, vector<4x16xf32> -> vector<40x16xf32>
    %cst_35 = arith.constant dense<0.000000e+00> : vector<32x16xf32>
    %163 = tpu.matmul %4, %162, %cst_35 {dimension_numbers = #tpu.dot_dimension_numbers<[1], [0], [0], [1], [0, 0, 1, 1], [], []>} : vector<32x40xf32>, vector<40x16xf32>, vector<32x16xf32> -> vector<32x16xf32>
    %c0_36 = arith.constant 0 : index
    %c0_37 = arith.constant 0 : index
    %c0_38 = arith.constant 0 : index
    %c6 = arith.constant 6 : index
    %c0_39 = arith.constant 0 : index
    %164 = vector.load %arg4[%c0_36, %c0_37, %c0_38, %c6, %c0_39] : memref<1x32x1x16x16xf32, #tpu.memory_space<vmem>>, vector<1x32x1x1x16xf32>
    %165 = vector.shape_cast %164 : vector<1x32x1x1x16xf32> to vector<32x16xf32>
    %166 = vector.shape_cast %163 : vector<32x16xf32> to vector<1x32x1x1x16xf32>
    tpu.vector_store %arg4[%c0_36, %c0_37, %c0_38, %c6, %c0_39], %166 {strides = array<i32>} : memref<1x32x1x16x16xf32, #tpu.memory_space<vmem>>, vector<1x32x1x1x16xf32>,
    %167 = vector.extract_strided_slice %3 {offsets = [0, 7, 0], sizes = [4, 1, 16], strides = [1, 1, 1]} : vector<4x18x18xf32> to vector<4x1x16xf32>
    %168 = vector.shape_cast %167 : vector<4x1x16xf32> to vector<4x16xf32>
    %169 = vector.extract_strided_slice %3 {offsets = [0, 7, 1], sizes = [4, 1, 16], strides = [1, 1, 1]} : vector<4x18x18xf32> to vector<4x1x16xf32>
    %170 = vector.shape_cast %169 : vector<4x1x16xf32> to vector<4x16xf32>
    %171 = vector.extract_strided_slice %3 {offsets = [0, 7, 2], sizes = [4, 1, 16], strides = [1, 1, 1]} : vector<4x18x18xf32> to vector<4x1x16xf32>
    %172 = vector.shape_cast %171 : vector<4x1x16xf32> to vector<4x16xf32>
    %173 = vector.extract_strided_slice %3 {offsets = [0, 8, 0], sizes = [4, 1, 16], strides = [1, 1, 1]} : vector<4x18x18xf32> to vector<4x1x16xf32>
    %174 = vector.shape_cast %173 : vector<4x1x16xf32> to vector<4x16xf32>
    %175 = vector.extract_strided_slice %3 {offsets = [0, 8, 1], sizes = [4, 1, 16], strides = [1, 1, 1]} : vector<4x18x18xf32> to vector<4x1x16xf32>
    %176 = vector.shape_cast %175 : vector<4x1x16xf32> to vector<4x16xf32>
    %177 = vector.extract_strided_slice %3 {offsets = [0, 8, 2], sizes = [4, 1, 16], strides = [1, 1, 1]} : vector<4x18x18xf32> to vector<4x1x16xf32>
    %178 = vector.shape_cast %177 : vector<4x1x16xf32> to vector<4x16xf32>
    %179 = vector.extract_strided_slice %3 {offsets = [0, 9, 0], sizes = [4, 1, 16], strides = [1, 1, 1]} : vector<4x18x18xf32> to vector<4x1x16xf32>
    %180 = vector.shape_cast %179 : vector<4x1x16xf32> to vector<4x16xf32>
    %181 = vector.extract_strided_slice %3 {offsets = [0, 9, 1], sizes = [4, 1, 16], strides = [1, 1, 1]} : vector<4x18x18xf32> to vector<4x1x16xf32>
    %182 = vector.shape_cast %181 : vector<4x1x16xf32> to vector<4x16xf32>
    %183 = vector.extract_strided_slice %3 {offsets = [0, 9, 2], sizes = [4, 1, 16], strides = [1, 1, 1]} : vector<4x18x18xf32> to vector<4x1x16xf32>
    %184 = vector.shape_cast %183 : vector<4x1x16xf32> to vector<4x16xf32>
    %185 = tpu.concatenate %168, %170, %172, %174, %176, %178, %180, %182, %184, %5 in 0 : vector<4x16xf32>, vector<4x16xf32>, vector<4x16xf32>, vector<4x16xf32>, vector<4x16xf32>, vector<4x16xf32>, vector<4x16xf32>, vector<4x16xf32>, vector<4x16xf32>, vector<4x16xf32> -> vector<40x16xf32>
    %cst_40 = arith.constant dense<0.000000e+00> : vector<32x16xf32>
    %186 = tpu.matmul %4, %185, %cst_40 {dimension_numbers = #tpu.dot_dimension_numbers<[1], [0], [0], [1], [0, 0, 1, 1], [], []>} : vector<32x40xf32>, vector<40x16xf32>, vector<32x16xf32> -> vector<32x16xf32>
    %c0_41 = arith.constant 0 : index
    %c0_42 = arith.constant 0 : index
    %c0_43 = arith.constant 0 : index
    %c7 = arith.constant 7 : index
    %c0_44 = arith.constant 0 : index
    %187 = vector.load %arg4[%c0_41, %c0_42, %c0_43, %c7, %c0_44] : memref<1x32x1x16x16xf32, #tpu.memory_space<vmem>>, vector<1x32x1x1x16xf32>
    %188 = vector.shape_cast %187 : vector<1x32x1x1x16xf32> to vector<32x16xf32>
    %189 = vector.shape_cast %186 : vector<32x16xf32> to vector<1x32x1x1x16xf32>
    tpu.vector_store %arg4[%c0_41, %c0_42, %c0_43, %c7, %c0_44], %189 {strides = array<i32>} : memref<1x32x1x16x16xf32, #tpu.memory_space<vmem>>, vector<1x32x1x1x16xf32>,
    %190 = vector.extract_strided_slice %3 {offsets = [0, 8, 0], sizes = [4, 1, 16], strides = [1, 1, 1]} : vector<4x18x18xf32> to vector<4x1x16xf32>
    %191 = vector.shape_cast %190 : vector<4x1x16xf32> to vector<4x16xf32>
    %192 = vector.extract_strided_slice %3 {offsets = [0, 8, 1], sizes = [4, 1, 16], strides = [1, 1, 1]} : vector<4x18x18xf32> to vector<4x1x16xf32>
    %193 = vector.shape_cast %192 : vector<4x1x16xf32> to vector<4x16xf32>
    %194 = vector.extract_strided_slice %3 {offsets = [0, 8, 2], sizes = [4, 1, 16], strides = [1, 1, 1]} : vector<4x18x18xf32> to vector<4x1x16xf32>
    %195 = vector.shape_cast %194 : vector<4x1x16xf32> to vector<4x16xf32>
    %196 = vector.extract_strided_slice %3 {offsets = [0, 9, 0], sizes = [4, 1, 16], strides = [1, 1, 1]} : vector<4x18x18xf32> to vector<4x1x16xf32>
    %197 = vector.shape_cast %196 : vector<4x1x16xf32> to vector<4x16xf32>
    %198 = vector.extract_strided_slice %3 {offsets = [0, 9, 1], sizes = [4, 1, 16], strides = [1, 1, 1]} : vector<4x18x18xf32> to vector<4x1x16xf32>
    %199 = vector.shape_cast %198 : vector<4x1x16xf32> to vector<4x16xf32>
    %200 = vector.extract_strided_slice %3 {offsets = [0, 9, 2], sizes = [4, 1, 16], strides = [1, 1, 1]} : vector<4x18x18xf32> to vector<4x1x16xf32>
    %201 = vector.shape_cast %200 : vector<4x1x16xf32> to vector<4x16xf32>
    %202 = vector.extract_strided_slice %3 {offsets = [0, 10, 0], sizes = [4, 1, 16], strides = [1, 1, 1]} : vector<4x18x18xf32> to vector<4x1x16xf32>
    %203 = vector.shape_cast %202 : vector<4x1x16xf32> to vector<4x16xf32>
    %204 = vector.extract_strided_slice %3 {offsets = [0, 10, 1], sizes = [4, 1, 16], strides = [1, 1, 1]} : vector<4x18x18xf32> to vector<4x1x16xf32>
    %205 = vector.shape_cast %204 : vector<4x1x16xf32> to vector<4x16xf32>
    %206 = vector.extract_strided_slice %3 {offsets = [0, 10, 2], sizes = [4, 1, 16], strides = [1, 1, 1]} : vector<4x18x18xf32> to vector<4x1x16xf32>
    %207 = vector.shape_cast %206 : vector<4x1x16xf32> to vector<4x16xf32>
    %208 = tpu.concatenate %191, %193, %195, %197, %199, %201, %203, %205, %207, %5 in 0 : vector<4x16xf32>, vector<4x16xf32>, vector<4x16xf32>, vector<4x16xf32>, vector<4x16xf32>, vector<4x16xf32>, vector<4x16xf32>, vector<4x16xf32>, vector<4x16xf32>, vector<4x16xf32> -> vector<40x16xf32>
    %cst_45 = arith.constant dense<0.000000e+00> : vector<32x16xf32>
    %209 = tpu.matmul %4, %208, %cst_45 {dimension_numbers = #tpu.dot_dimension_numbers<[1], [0], [0], [1], [0, 0, 1, 1], [], []>} : vector<32x40xf32>, vector<40x16xf32>, vector<32x16xf32> -> vector<32x16xf32>
    %c0_46 = arith.constant 0 : index
    %c0_47 = arith.constant 0 : index
    %c0_48 = arith.constant 0 : index
    %c8 = arith.constant 8 : index
    %c0_49 = arith.constant 0 : index
    %210 = vector.load %arg4[%c0_46, %c0_47, %c0_48, %c8, %c0_49] : memref<1x32x1x16x16xf32, #tpu.memory_space<vmem>>, vector<1x32x1x1x16xf32>
    %211 = vector.shape_cast %210 : vector<1x32x1x1x16xf32> to vector<32x16xf32>
    %212 = vector.shape_cast %209 : vector<32x16xf32> to vector<1x32x1x1x16xf32>
    tpu.vector_store %arg4[%c0_46, %c0_47, %c0_48, %c8, %c0_49], %212 {strides = array<i32>} : memref<1x32x1x16x16xf32, #tpu.memory_space<vmem>>, vector<1x32x1x1x16xf32>,
    %213 = vector.extract_strided_slice %3 {offsets = [0, 9, 0], sizes = [4, 1, 16], strides = [1, 1, 1]} : vector<4x18x18xf32> to vector<4x1x16xf32>
    %214 = vector.shape_cast %213 : vector<4x1x16xf32> to vector<4x16xf32>
    %215 = vector.extract_strided_slice %3 {offsets = [0, 9, 1], sizes = [4, 1, 16], strides = [1, 1, 1]} : vector<4x18x18xf32> to vector<4x1x16xf32>
    %216 = vector.shape_cast %215 : vector<4x1x16xf32> to vector<4x16xf32>
    %217 = vector.extract_strided_slice %3 {offsets = [0, 9, 2], sizes = [4, 1, 16], strides = [1, 1, 1]} : vector<4x18x18xf32> to vector<4x1x16xf32>
    %218 = vector.shape_cast %217 : vector<4x1x16xf32> to vector<4x16xf32>
    %219 = vector.extract_strided_slice %3 {offsets = [0, 10, 0], sizes = [4, 1, 16], strides = [1, 1, 1]} : vector<4x18x18xf32> to vector<4x1x16xf32>
    %220 = vector.shape_cast %219 : vector<4x1x16xf32> to vector<4x16xf32>
    %221 = vector.extract_strided_slice %3 {offsets = [0, 10, 1], sizes = [4, 1, 16], strides = [1, 1, 1]} : vector<4x18x18xf32> to vector<4x1x16xf32>
    %222 = vector.shape_cast %221 : vector<4x1x16xf32> to vector<4x16xf32>
    %223 = vector.extract_strided_slice %3 {offsets = [0, 10, 2], sizes = [4, 1, 16], strides = [1, 1, 1]} : vector<4x18x18xf32> to vector<4x1x16xf32>
    %224 = vector.shape_cast %223 : vector<4x1x16xf32> to vector<4x16xf32>
    %225 = vector.extract_strided_slice %3 {offsets = [0, 11, 0], sizes = [4, 1, 16], strides = [1, 1, 1]} : vector<4x18x18xf32> to vector<4x1x16xf32>
    %226 = vector.shape_cast %225 : vector<4x1x16xf32> to vector<4x16xf32>
    %227 = vector.extract_strided_slice %3 {offsets = [0, 11, 1], sizes = [4, 1, 16], strides = [1, 1, 1]} : vector<4x18x18xf32> to vector<4x1x16xf32>
    %228 = vector.shape_cast %227 : vector<4x1x16xf32> to vector<4x16xf32>
    %229 = vector.extract_strided_slice %3 {offsets = [0, 11, 2], sizes = [4, 1, 16], strides = [1, 1, 1]} : vector<4x18x18xf32> to vector<4x1x16xf32>
    %230 = vector.shape_cast %229 : vector<4x1x16xf32> to vector<4x16xf32>
    %231 = tpu.concatenate %214, %216, %218, %220, %222, %224, %226, %228, %230, %5 in 0 : vector<4x16xf32>, vector<4x16xf32>, vector<4x16xf32>, vector<4x16xf32>, vector<4x16xf32>, vector<4x16xf32>, vector<4x16xf32>, vector<4x16xf32>, vector<4x16xf32>, vector<4x16xf32> -> vector<40x16xf32>
    %cst_50 = arith.constant dense<0.000000e+00> : vector<32x16xf32>
    %232 = tpu.matmul %4, %231, %cst_50 {dimension_numbers = #tpu.dot_dimension_numbers<[1], [0], [0], [1], [0, 0, 1, 1], [], []>} : vector<32x40xf32>, vector<40x16xf32>, vector<32x16xf32> -> vector<32x16xf32>
    %c0_51 = arith.constant 0 : index
    %c0_52 = arith.constant 0 : index
    %c0_53 = arith.constant 0 : index
    %c9 = arith.constant 9 : index
    %c0_54 = arith.constant 0 : index
    %233 = vector.load %arg4[%c0_51, %c0_52, %c0_53, %c9, %c0_54] : memref<1x32x1x16x16xf32, #tpu.memory_space<vmem>>, vector<1x32x1x1x16xf32>
    %234 = vector.shape_cast %233 : vector<1x32x1x1x16xf32> to vector<32x16xf32>
    %235 = vector.shape_cast %232 : vector<32x16xf32> to vector<1x32x1x1x16xf32>
    tpu.vector_store %arg4[%c0_51, %c0_52, %c0_53, %c9, %c0_54], %235 {strides = array<i32>} : memref<1x32x1x16x16xf32, #tpu.memory_space<vmem>>, vector<1x32x1x1x16xf32>,
    %236 = vector.extract_strided_slice %3 {offsets = [0, 10, 0], sizes = [4, 1, 16], strides = [1, 1, 1]} : vector<4x18x18xf32> to vector<4x1x16xf32>
    %237 = vector.shape_cast %236 : vector<4x1x16xf32> to vector<4x16xf32>
    %238 = vector.extract_strided_slice %3 {offsets = [0, 10, 1], sizes = [4, 1, 16], strides = [1, 1, 1]} : vector<4x18x18xf32> to vector<4x1x16xf32>
    %239 = vector.shape_cast %238 : vector<4x1x16xf32> to vector<4x16xf32>
    %240 = vector.extract_strided_slice %3 {offsets = [0, 10, 2], sizes = [4, 1, 16], strides = [1, 1, 1]} : vector<4x18x18xf32> to vector<4x1x16xf32>
    %241 = vector.shape_cast %240 : vector<4x1x16xf32> to vector<4x16xf32>
    %242 = vector.extract_strided_slice %3 {offsets = [0, 11, 0], sizes = [4, 1, 16], strides = [1, 1, 1]} : vector<4x18x18xf32> to vector<4x1x16xf32>
    %243 = vector.shape_cast %242 : vector<4x1x16xf32> to vector<4x16xf32>
    %244 = vector.extract_strided_slice %3 {offsets = [0, 11, 1], sizes = [4, 1, 16], strides = [1, 1, 1]} : vector<4x18x18xf32> to vector<4x1x16xf32>
    %245 = vector.shape_cast %244 : vector<4x1x16xf32> to vector<4x16xf32>
    %246 = vector.extract_strided_slice %3 {offsets = [0, 11, 2], sizes = [4, 1, 16], strides = [1, 1, 1]} : vector<4x18x18xf32> to vector<4x1x16xf32>
    %247 = vector.shape_cast %246 : vector<4x1x16xf32> to vector<4x16xf32>
    %248 = vector.extract_strided_slice %3 {offsets = [0, 12, 0], sizes = [4, 1, 16], strides = [1, 1, 1]} : vector<4x18x18xf32> to vector<4x1x16xf32>
    %249 = vector.shape_cast %248 : vector<4x1x16xf32> to vector<4x16xf32>
    %250 = vector.extract_strided_slice %3 {offsets = [0, 12, 1], sizes = [4, 1, 16], strides = [1, 1, 1]} : vector<4x18x18xf32> to vector<4x1x16xf32>
    %251 = vector.shape_cast %250 : vector<4x1x16xf32> to vector<4x16xf32>
    %252 = vector.extract_strided_slice %3 {offsets = [0, 12, 2], sizes = [4, 1, 16], strides = [1, 1, 1]} : vector<4x18x18xf32> to vector<4x1x16xf32>
    %253 = vector.shape_cast %252 : vector<4x1x16xf32> to vector<4x16xf32>
    %254 = tpu.concatenate %237, %239, %241, %243, %245, %247, %249, %251, %253, %5 in 0 : vector<4x16xf32>, vector<4x16xf32>, vector<4x16xf32>, vector<4x16xf32>, vector<4x16xf32>, vector<4x16xf32>, vector<4x16xf32>, vector<4x16xf32>, vector<4x16xf32>, vector<4x16xf32> -> vector<40x16xf32>
    %cst_55 = arith.constant dense<0.000000e+00> : vector<32x16xf32>
    %255 = tpu.matmul %4, %254, %cst_55 {dimension_numbers = #tpu.dot_dimension_numbers<[1], [0], [0], [1], [0, 0, 1, 1], [], []>} : vector<32x40xf32>, vector<40x16xf32>, vector<32x16xf32> -> vector<32x16xf32>
    %c0_56 = arith.constant 0 : index
    %c0_57 = arith.constant 0 : index
    %c0_58 = arith.constant 0 : index
    %c10 = arith.constant 10 : index
    %c0_59 = arith.constant 0 : index
    %256 = vector.load %arg4[%c0_56, %c0_57, %c0_58, %c10, %c0_59] : memref<1x32x1x16x16xf32, #tpu.memory_space<vmem>>, vector<1x32x1x1x16xf32>
    %257 = vector.shape_cast %256 : vector<1x32x1x1x16xf32> to vector<32x16xf32>
    %258 = vector.shape_cast %255 : vector<32x16xf32> to vector<1x32x1x1x16xf32>
    tpu.vector_store %arg4[%c0_56, %c0_57, %c0_58, %c10, %c0_59], %258 {strides = array<i32>} : memref<1x32x1x16x16xf32, #tpu.memory_space<vmem>>, vector<1x32x1x1x16xf32>,
    %259 = vector.extract_strided_slice %3 {offsets = [0, 11, 0], sizes = [4, 1, 16], strides = [1, 1, 1]} : vector<4x18x18xf32> to vector<4x1x16xf32>
    %260 = vector.shape_cast %259 : vector<4x1x16xf32> to vector<4x16xf32>
    %261 = vector.extract_strided_slice %3 {offsets = [0, 11, 1], sizes = [4, 1, 16], strides = [1, 1, 1]} : vector<4x18x18xf32> to vector<4x1x16xf32>
    %262 = vector.shape_cast %261 : vector<4x1x16xf32> to vector<4x16xf32>
    %263 = vector.extract_strided_slice %3 {offsets = [0, 11, 2], sizes = [4, 1, 16], strides = [1, 1, 1]} : vector<4x18x18xf32> to vector<4x1x16xf32>
    %264 = vector.shape_cast %263 : vector<4x1x16xf32> to vector<4x16xf32>
    %265 = vector.extract_strided_slice %3 {offsets = [0, 12, 0], sizes = [4, 1, 16], strides = [1, 1, 1]} : vector<4x18x18xf32> to vector<4x1x16xf32>
    %266 = vector.shape_cast %265 : vector<4x1x16xf32> to vector<4x16xf32>
    %267 = vector.extract_strided_slice %3 {offsets = [0, 12, 1], sizes = [4, 1, 16], strides = [1, 1, 1]} : vector<4x18x18xf32> to vector<4x1x16xf32>
    %268 = vector.shape_cast %267 : vector<4x1x16xf32> to vector<4x16xf32>
    %269 = vector.extract_strided_slice %3 {offsets = [0, 12, 2], sizes = [4, 1, 16], strides = [1, 1, 1]} : vector<4x18x18xf32> to vector<4x1x16xf32>
    %270 = vector.shape_cast %269 : vector<4x1x16xf32> to vector<4x16xf32>
    %271 = vector.extract_strided_slice %3 {offsets = [0, 13, 0], sizes = [4, 1, 16], strides = [1, 1, 1]} : vector<4x18x18xf32> to vector<4x1x16xf32>
    %272 = vector.shape_cast %271 : vector<4x1x16xf32> to vector<4x16xf32>
    %273 = vector.extract_strided_slice %3 {offsets = [0, 13, 1], sizes = [4, 1, 16], strides = [1, 1, 1]} : vector<4x18x18xf32> to vector<4x1x16xf32>
    %274 = vector.shape_cast %273 : vector<4x1x16xf32> to vector<4x16xf32>
    %275 = vector.extract_strided_slice %3 {offsets = [0, 13, 2], sizes = [4, 1, 16], strides = [1, 1, 1]} : vector<4x18x18xf32> to vector<4x1x16xf32>
    %276 = vector.shape_cast %275 : vector<4x1x16xf32> to vector<4x16xf32>
    %277 = tpu.concatenate %260, %262, %264, %266, %268, %270, %272, %274, %276, %5 in 0 : vector<4x16xf32>, vector<4x16xf32>, vector<4x16xf32>, vector<4x16xf32>, vector<4x16xf32>, vector<4x16xf32>, vector<4x16xf32>, vector<4x16xf32>, vector<4x16xf32>, vector<4x16xf32> -> vector<40x16xf32>
    %cst_60 = arith.constant dense<0.000000e+00> : vector<32x16xf32>
    %278 = tpu.matmul %4, %277, %cst_60 {dimension_numbers = #tpu.dot_dimension_numbers<[1], [0], [0], [1], [0, 0, 1, 1], [], []>} : vector<32x40xf32>, vector<40x16xf32>, vector<32x16xf32> -> vector<32x16xf32>
    %c0_61 = arith.constant 0 : index
    %c0_62 = arith.constant 0 : index
    %c0_63 = arith.constant 0 : index
    %c11 = arith.constant 11 : index
    %c0_64 = arith.constant 0 : index
    %279 = vector.load %arg4[%c0_61, %c0_62, %c0_63, %c11, %c0_64] : memref<1x32x1x16x16xf32, #tpu.memory_space<vmem>>, vector<1x32x1x1x16xf32>
    %280 = vector.shape_cast %279 : vector<1x32x1x1x16xf32> to vector<32x16xf32>
    %281 = vector.shape_cast %278 : vector<32x16xf32> to vector<1x32x1x1x16xf32>
    tpu.vector_store %arg4[%c0_61, %c0_62, %c0_63, %c11, %c0_64], %281 {strides = array<i32>} : memref<1x32x1x16x16xf32, #tpu.memory_space<vmem>>, vector<1x32x1x1x16xf32>,
    %282 = vector.extract_strided_slice %3 {offsets = [0, 12, 0], sizes = [4, 1, 16], strides = [1, 1, 1]} : vector<4x18x18xf32> to vector<4x1x16xf32>
    %283 = vector.shape_cast %282 : vector<4x1x16xf32> to vector<4x16xf32>
    %284 = vector.extract_strided_slice %3 {offsets = [0, 12, 1], sizes = [4, 1, 16], strides = [1, 1, 1]} : vector<4x18x18xf32> to vector<4x1x16xf32>
    %285 = vector.shape_cast %284 : vector<4x1x16xf32> to vector<4x16xf32>
    %286 = vector.extract_strided_slice %3 {offsets = [0, 12, 2], sizes = [4, 1, 16], strides = [1, 1, 1]} : vector<4x18x18xf32> to vector<4x1x16xf32>
    %287 = vector.shape_cast %286 : vector<4x1x16xf32> to vector<4x16xf32>
    %288 = vector.extract_strided_slice %3 {offsets = [0, 13, 0], sizes = [4, 1, 16], strides = [1, 1, 1]} : vector<4x18x18xf32> to vector<4x1x16xf32>
    %289 = vector.shape_cast %288 : vector<4x1x16xf32> to vector<4x16xf32>
    %290 = vector.extract_strided_slice %3 {offsets = [0, 13, 1], sizes = [4, 1, 16], strides = [1, 1, 1]} : vector<4x18x18xf32> to vector<4x1x16xf32>
    %291 = vector.shape_cast %290 : vector<4x1x16xf32> to vector<4x16xf32>
    %292 = vector.extract_strided_slice %3 {offsets = [0, 13, 2], sizes = [4, 1, 16], strides = [1, 1, 1]} : vector<4x18x18xf32> to vector<4x1x16xf32>
    %293 = vector.shape_cast %292 : vector<4x1x16xf32> to vector<4x16xf32>
    %294 = vector.extract_strided_slice %3 {offsets = [0, 14, 0], sizes = [4, 1, 16], strides = [1, 1, 1]} : vector<4x18x18xf32> to vector<4x1x16xf32>
    %295 = vector.shape_cast %294 : vector<4x1x16xf32> to vector<4x16xf32>
    %296 = vector.extract_strided_slice %3 {offsets = [0, 14, 1], sizes = [4, 1, 16], strides = [1, 1, 1]} : vector<4x18x18xf32> to vector<4x1x16xf32>
    %297 = vector.shape_cast %296 : vector<4x1x16xf32> to vector<4x16xf32>
    %298 = vector.extract_strided_slice %3 {offsets = [0, 14, 2], sizes = [4, 1, 16], strides = [1, 1, 1]} : vector<4x18x18xf32> to vector<4x1x16xf32>
    %299 = vector.shape_cast %298 : vector<4x1x16xf32> to vector<4x16xf32>
    %300 = tpu.concatenate %283, %285, %287, %289, %291, %293, %295, %297, %299, %5 in 0 : vector<4x16xf32>, vector<4x16xf32>, vector<4x16xf32>, vector<4x16xf32>, vector<4x16xf32>, vector<4x16xf32>, vector<4x16xf32>, vector<4x16xf32>, vector<4x16xf32>, vector<4x16xf32> -> vector<40x16xf32>
    %cst_65 = arith.constant dense<0.000000e+00> : vector<32x16xf32>
    %301 = tpu.matmul %4, %300, %cst_65 {dimension_numbers = #tpu.dot_dimension_numbers<[1], [0], [0], [1], [0, 0, 1, 1], [], []>} : vector<32x40xf32>, vector<40x16xf32>, vector<32x16xf32> -> vector<32x16xf32>
    %c0_66 = arith.constant 0 : index
    %c0_67 = arith.constant 0 : index
    %c0_68 = arith.constant 0 : index
    %c12 = arith.constant 12 : index
    %c0_69 = arith.constant 0 : index
    %302 = vector.load %arg4[%c0_66, %c0_67, %c0_68, %c12, %c0_69] : memref<1x32x1x16x16xf32, #tpu.memory_space<vmem>>, vector<1x32x1x1x16xf32>
    %303 = vector.shape_cast %302 : vector<1x32x1x1x16xf32> to vector<32x16xf32>
    %304 = vector.shape_cast %301 : vector<32x16xf32> to vector<1x32x1x1x16xf32>
    tpu.vector_store %arg4[%c0_66, %c0_67, %c0_68, %c12, %c0_69], %304 {strides = array<i32>} : memref<1x32x1x16x16xf32, #tpu.memory_space<vmem>>, vector<1x32x1x1x16xf32>,
    %305 = vector.extract_strided_slice %3 {offsets = [0, 13, 0], sizes = [4, 1, 16], strides = [1, 1, 1]} : vector<4x18x18xf32> to vector<4x1x16xf32>
    %306 = vector.shape_cast %305 : vector<4x1x16xf32> to vector<4x16xf32>
    %307 = vector.extract_strided_slice %3 {offsets = [0, 13, 1], sizes = [4, 1, 16], strides = [1, 1, 1]} : vector<4x18x18xf32> to vector<4x1x16xf32>
    %308 = vector.shape_cast %307 : vector<4x1x16xf32> to vector<4x16xf32>
    %309 = vector.extract_strided_slice %3 {offsets = [0, 13, 2], sizes = [4, 1, 16], strides = [1, 1, 1]} : vector<4x18x18xf32> to vector<4x1x16xf32>
    %310 = vector.shape_cast %309 : vector<4x1x16xf32> to vector<4x16xf32>
    %311 = vector.extract_strided_slice %3 {offsets = [0, 14, 0], sizes = [4, 1, 16], strides = [1, 1, 1]} : vector<4x18x18xf32> to vector<4x1x16xf32>
    %312 = vector.shape_cast %311 : vector<4x1x16xf32> to vector<4x16xf32>
    %313 = vector.extract_strided_slice %3 {offsets = [0, 14, 1], sizes = [4, 1, 16], strides = [1, 1, 1]} : vector<4x18x18xf32> to vector<4x1x16xf32>
    %314 = vector.shape_cast %313 : vector<4x1x16xf32> to vector<4x16xf32>
    %315 = vector.extract_strided_slice %3 {offsets = [0, 14, 2], sizes = [4, 1, 16], strides = [1, 1, 1]} : vector<4x18x18xf32> to vector<4x1x16xf32>
    %316 = vector.shape_cast %315 : vector<4x1x16xf32> to vector<4x16xf32>
    %317 = vector.extract_strided_slice %3 {offsets = [0, 15, 0], sizes = [4, 1, 16], strides = [1, 1, 1]} : vector<4x18x18xf32> to vector<4x1x16xf32>
    %318 = vector.shape_cast %317 : vector<4x1x16xf32> to vector<4x16xf32>
    %319 = vector.extract_strided_slice %3 {offsets = [0, 15, 1], sizes = [4, 1, 16], strides = [1, 1, 1]} : vector<4x18x18xf32> to vector<4x1x16xf32>
    %320 = vector.shape_cast %319 : vector<4x1x16xf32> to vector<4x16xf32>
    %321 = vector.extract_strided_slice %3 {offsets = [0, 15, 2], sizes = [4, 1, 16], strides = [1, 1, 1]} : vector<4x18x18xf32> to vector<4x1x16xf32>
    %322 = vector.shape_cast %321 : vector<4x1x16xf32> to vector<4x16xf32>
    %323 = tpu.concatenate %306, %308, %310, %312, %314, %316, %318, %320, %322, %5 in 0 : vector<4x16xf32>, vector<4x16xf32>, vector<4x16xf32>, vector<4x16xf32>, vector<4x16xf32>, vector<4x16xf32>, vector<4x16xf32>, vector<4x16xf32>, vector<4x16xf32>, vector<4x16xf32> -> vector<40x16xf32>
    %cst_70 = arith.constant dense<0.000000e+00> : vector<32x16xf32>
    %324 = tpu.matmul %4, %323, %cst_70 {dimension_numbers = #tpu.dot_dimension_numbers<[1], [0], [0], [1], [0, 0, 1, 1], [], []>} : vector<32x40xf32>, vector<40x16xf32>, vector<32x16xf32> -> vector<32x16xf32>
    %c0_71 = arith.constant 0 : index
    %c0_72 = arith.constant 0 : index
    %c0_73 = arith.constant 0 : index
    %c13 = arith.constant 13 : index
    %c0_74 = arith.constant 0 : index
    %325 = vector.load %arg4[%c0_71, %c0_72, %c0_73, %c13, %c0_74] : memref<1x32x1x16x16xf32, #tpu.memory_space<vmem>>, vector<1x32x1x1x16xf32>
    %326 = vector.shape_cast %325 : vector<1x32x1x1x16xf32> to vector<32x16xf32>
    %327 = vector.shape_cast %324 : vector<32x16xf32> to vector<1x32x1x1x16xf32>
    tpu.vector_store %arg4[%c0_71, %c0_72, %c0_73, %c13, %c0_74], %327 {strides = array<i32>} : memref<1x32x1x16x16xf32, #tpu.memory_space<vmem>>, vector<1x32x1x1x16xf32>,
    %328 = vector.extract_strided_slice %3 {offsets = [0, 14, 0], sizes = [4, 1, 16], strides = [1, 1, 1]} : vector<4x18x18xf32> to vector<4x1x16xf32>
    %329 = vector.shape_cast %328 : vector<4x1x16xf32> to vector<4x16xf32>
    %330 = vector.extract_strided_slice %3 {offsets = [0, 14, 1], sizes = [4, 1, 16], strides = [1, 1, 1]} : vector<4x18x18xf32> to vector<4x1x16xf32>
    %331 = vector.shape_cast %330 : vector<4x1x16xf32> to vector<4x16xf32>
    %332 = vector.extract_strided_slice %3 {offsets = [0, 14, 2], sizes = [4, 1, 16], strides = [1, 1, 1]} : vector<4x18x18xf32> to vector<4x1x16xf32>
    %333 = vector.shape_cast %332 : vector<4x1x16xf32> to vector<4x16xf32>
    %334 = vector.extract_strided_slice %3 {offsets = [0, 15, 0], sizes = [4, 1, 16], strides = [1, 1, 1]} : vector<4x18x18xf32> to vector<4x1x16xf32>
    %335 = vector.shape_cast %334 : vector<4x1x16xf32> to vector<4x16xf32>
    %336 = vector.extract_strided_slice %3 {offsets = [0, 15, 1], sizes = [4, 1, 16], strides = [1, 1, 1]} : vector<4x18x18xf32> to vector<4x1x16xf32>
    %337 = vector.shape_cast %336 : vector<4x1x16xf32> to vector<4x16xf32>
    %338 = vector.extract_strided_slice %3 {offsets = [0, 15, 2], sizes = [4, 1, 16], strides = [1, 1, 1]} : vector<4x18x18xf32> to vector<4x1x16xf32>
    %339 = vector.shape_cast %338 : vector<4x1x16xf32> to vector<4x16xf32>
    %340 = vector.extract_strided_slice %3 {offsets = [0, 16, 0], sizes = [4, 1, 16], strides = [1, 1, 1]} : vector<4x18x18xf32> to vector<4x1x16xf32>
    %341 = vector.shape_cast %340 : vector<4x1x16xf32> to vector<4x16xf32>
    %342 = vector.extract_strided_slice %3 {offsets = [0, 16, 1], sizes = [4, 1, 16], strides = [1, 1, 1]} : vector<4x18x18xf32> to vector<4x1x16xf32>
    %343 = vector.shape_cast %342 : vector<4x1x16xf32> to vector<4x16xf32>
    %344 = vector.extract_strided_slice %3 {offsets = [0, 16, 2], sizes = [4, 1, 16], strides = [1, 1, 1]} : vector<4x18x18xf32> to vector<4x1x16xf32>
    %345 = vector.shape_cast %344 : vector<4x1x16xf32> to vector<4x16xf32>
    %346 = tpu.concatenate %329, %331, %333, %335, %337, %339, %341, %343, %345, %5 in 0 : vector<4x16xf32>, vector<4x16xf32>, vector<4x16xf32>, vector<4x16xf32>, vector<4x16xf32>, vector<4x16xf32>, vector<4x16xf32>, vector<4x16xf32>, vector<4x16xf32>, vector<4x16xf32> -> vector<40x16xf32>
    %cst_75 = arith.constant dense<0.000000e+00> : vector<32x16xf32>
    %347 = tpu.matmul %4, %346, %cst_75 {dimension_numbers = #tpu.dot_dimension_numbers<[1], [0], [0], [1], [0, 0, 1, 1], [], []>} : vector<32x40xf32>, vector<40x16xf32>, vector<32x16xf32> -> vector<32x16xf32>
    %c0_76 = arith.constant 0 : index
    %c0_77 = arith.constant 0 : index
    %c0_78 = arith.constant 0 : index
    %c14 = arith.constant 14 : index
    %c0_79 = arith.constant 0 : index
    %348 = vector.load %arg4[%c0_76, %c0_77, %c0_78, %c14, %c0_79] : memref<1x32x1x16x16xf32, #tpu.memory_space<vmem>>, vector<1x32x1x1x16xf32>
    %349 = vector.shape_cast %348 : vector<1x32x1x1x16xf32> to vector<32x16xf32>
    %350 = vector.shape_cast %347 : vector<32x16xf32> to vector<1x32x1x1x16xf32>
    tpu.vector_store %arg4[%c0_76, %c0_77, %c0_78, %c14, %c0_79], %350 {strides = array<i32>} : memref<1x32x1x16x16xf32, #tpu.memory_space<vmem>>, vector<1x32x1x1x16xf32>,
    %351 = vector.extract_strided_slice %3 {offsets = [0, 15, 0], sizes = [4, 1, 16], strides = [1, 1, 1]} : vector<4x18x18xf32> to vector<4x1x16xf32>
    %352 = vector.shape_cast %351 : vector<4x1x16xf32> to vector<4x16xf32>
    %353 = vector.extract_strided_slice %3 {offsets = [0, 15, 1], sizes = [4, 1, 16], strides = [1, 1, 1]} : vector<4x18x18xf32> to vector<4x1x16xf32>
    %354 = vector.shape_cast %353 : vector<4x1x16xf32> to vector<4x16xf32>
    %355 = vector.extract_strided_slice %3 {offsets = [0, 15, 2], sizes = [4, 1, 16], strides = [1, 1, 1]} : vector<4x18x18xf32> to vector<4x1x16xf32>
    %356 = vector.shape_cast %355 : vector<4x1x16xf32> to vector<4x16xf32>
    %357 = vector.extract_strided_slice %3 {offsets = [0, 16, 0], sizes = [4, 1, 16], strides = [1, 1, 1]} : vector<4x18x18xf32> to vector<4x1x16xf32>
    %358 = vector.shape_cast %357 : vector<4x1x16xf32> to vector<4x16xf32>
    %359 = vector.extract_strided_slice %3 {offsets = [0, 16, 1], sizes = [4, 1, 16], strides = [1, 1, 1]} : vector<4x18x18xf32> to vector<4x1x16xf32>
    %360 = vector.shape_cast %359 : vector<4x1x16xf32> to vector<4x16xf32>
    %361 = vector.extract_strided_slice %3 {offsets = [0, 16, 2], sizes = [4, 1, 16], strides = [1, 1, 1]} : vector<4x18x18xf32> to vector<4x1x16xf32>
    %362 = vector.shape_cast %361 : vector<4x1x16xf32> to vector<4x16xf32>
    %363 = vector.extract_strided_slice %3 {offsets = [0, 17, 0], sizes = [4, 1, 16], strides = [1, 1, 1]} : vector<4x18x18xf32> to vector<4x1x16xf32>
    %364 = vector.shape_cast %363 : vector<4x1x16xf32> to vector<4x16xf32>
    %365 = vector.extract_strided_slice %3 {offsets = [0, 17, 1], sizes = [4, 1, 16], strides = [1, 1, 1]} : vector<4x18x18xf32> to vector<4x1x16xf32>
    %366 = vector.shape_cast %365 : vector<4x1x16xf32> to vector<4x16xf32>
    %367 = vector.extract_strided_slice %3 {offsets = [0, 17, 2], sizes = [4, 1, 16], strides = [1, 1, 1]} : vector<4x18x18xf32> to vector<4x1x16xf32>
    %368 = vector.shape_cast %367 : vector<4x1x16xf32> to vector<4x16xf32>
    %369 = tpu.concatenate %352, %354, %356, %358, %360, %362, %364, %366, %368, %5 in 0 : vector<4x16xf32>, vector<4x16xf32>, vector<4x16xf32>, vector<4x16xf32>, vector<4x16xf32>, vector<4x16xf32>, vector<4x16xf32>, vector<4x16xf32>, vector<4x16xf32>, vector<4x16xf32> -> vector<40x16xf32>
    %cst_80 = arith.constant dense<0.000000e+00> : vector<32x16xf32>
    %370 = tpu.matmul %4, %369, %cst_80 {dimension_numbers = #tpu.dot_dimension_numbers<[1], [0], [0], [1], [0, 0, 1, 1], [], []>} : vector<32x40xf32>, vector<40x16xf32>, vector<32x16xf32> -> vector<32x16xf32>
    %c0_81 = arith.constant 0 : index
    %c0_82 = arith.constant 0 : index
    %c0_83 = arith.constant 0 : index
    %c15 = arith.constant 15 : index
    %c0_84 = arith.constant 0 : index
    %371 = vector.load %arg4[%c0_81, %c0_82, %c0_83, %c15, %c0_84] : memref<1x32x1x16x16xf32, #tpu.memory_space<vmem>>, vector<1x32x1x1x16xf32>
    %372 = vector.shape_cast %371 : vector<1x32x1x1x16xf32> to vector<32x16xf32>
    %373 = vector.shape_cast %370 : vector<32x16xf32> to vector<1x32x1x1x16xf32>
    tpu.vector_store %arg4[%c0_81, %c0_82, %c0_83, %c15, %c0_84], %373 {strides = array<i32>} : memref<1x32x1x16x16xf32, #tpu.memory_space<vmem>>, vector<1x32x1x1x16xf32>,
    return
  }
  func.func @transform_0(%arg0: i32, %arg1: i32) -> (i32, i32, i32, i32) {
    %c0_i32 = arith.constant 0 : i32
    %c0_i32_0 = arith.constant 0 : i32
    %c0_i32_1 = arith.constant 0 : i32
    %c0_i32_2 = arith.constant 0 : i32
    return %arg0, %c0_i32, %c0_i32_0, %c0_i32_1 : i32, i32, i32, i32
  }
  func.func @transform_1(%arg0: i32, %arg1: i32) -> (i32, i32) {
    %c0_i32 = arith.constant 0 : i32
    %c0_i32_0 = arith.constant 0 : i32
    %c0_i32_1 = arith.constant 0 : i32
    return %c0_i32, %c0_i32_0 : i32, i32
  }
  func.func @transform_2(%arg0: i32, %arg1: i32) -> (i32, i32, i32, i32, i32) {
    %c0_i32 = arith.constant 0 : i32
    %c0_i32_0 = arith.constant 0 : i32
    %c0_i32_1 = arith.constant 0 : i32
    %c0_i32_2 = arith.constant 0 : i32
    return %arg0, %c0_i32, %arg1, %c0_i32_0, %c0_i32_1 : i32, i32, i32, i32, i32
  }
}

</mosaic_0001>

<bundles_post_ra>
// kernel: tpu_custom_call.1
= control target key start
LH: loop header
LB: loop body
LE: loop exit
PB: predicated region body
PF: predicated region fallthrough
CT: control target
= control target key end

     0   :  { %s3009_s9 = smov 0   ;;  %s3011_s10 = smov 0   ;;  %s4904_s0 = inlined_call_operand.vmem [shape: f32[2,4,18,18], index: 0, kind: input, shape index: {}]   ;;  %s4905_s1 = inlined_call_operand.vmem [shape: f32[32,40], index: 1, kind: input, shape index: {}]   ;;  %s4906_s2 = inlined_call_operand.vmem [shape: f32[2,32,1,16,16], index: 2, kind: output, shape index: {}]  }
   0x1   :  { %s3013_s11 = smov 0  }
   0x2 LB: > { %s24_s12 = sadd.s32 1, %s2986_s10  ;;  %p2724_p0 = scmp.ge.s32.totalorder %s2990_s11, 1  ;;  %s2990_s11 = sphi %s3013_s11, %s12_s11   ;;  %s2986_s10 = sphi %s3011_s10, %s4916_s10   ;;  %s2982_s9 = sphi %s3009_s9, %s4915_s9  }
   0x3   : > { %p26_p1 = scmp.ge.s32.totalorder %s24_s12, 2  ;;  %p126_p2 = scmp.lt.s32.totalorder %s2990_s11, 3 }
   0x5   : > { %s4918_s12 = smov (%p26_p1, %s24_s12), 0  ;;  %p127_p3 = pnand %p2724_p0, %p126_p2 }
   0x6   : > { %p152_p4 = scmp.lt.s32.totalorder (!%p127_p3), %s2982_s9, 1  ;;  %s2992_s17 = smov (!%p127_p3), 126  }
   0x7   : > { %130 = sbr.rel (%p127_p3) target bundleno = 805 (0x325), region = 28  ;;  %s2993_s18 = smov (!%p127_p3), 127  }
   0xc   : > { %s4920_s9 = smov (!%p152_p4, %s2982_s9), 1  ;;  %vm189_vm0 = vcmask 1041409   ;;  %vm192_vm1 = vcmask 1042434   ;;  %vm195_vm2 = vcmask 1043459   ;;  %vm200_vm3 = vcmask 1045509  }
   0xd   : > { %s2811_s13 = smul.u32 96, %s4920_s9  ;;  %vm203_vm4 = vcmask 1046534   ;;  %vm206_vm5 = vcmask 1047559   ;;  %vm254_vm6 = vcmask 1043456   ;;  %vm260_vm7 = vcmask 326656   ;;  %s2810_s27 = sshll.u32 %s4920_s9, 9 }
   0xe   : > { %s3855_s30 = scalar_lea.vmem %s4906_s2, %s2810_s27  ;;  %vm362_vm8 = vcmask 122880  }
   0xf   : > { %s3033_s16 = scalar_lea.vmem %s4904_s0, %s2811_s13 }
  0x10   : > { %v3036_v0 = vld [vmem:[%s3033_s16] sm:$0xff]  ;;  %v3039_v1 = vld [vmem:[%s3033_s16 + $0x18] sm:$0xff]  ;;  %v3042_v2 = vld [vmem:[%s3033_s16 + $0x30] sm:$0xff] }
  0x11   : > { %v3045_v3 = vld [vmem:[%s3033_s16 + $0x48] sm:$0xff]  ;;  %v198_v4 = vrot.slane %v3036_v0, 4  ;;  %v199_v5 = vrot.slane %v3039_v1, 3  ;;  %v202_v6 = vrot.slane %v3042_v2, 2  ;;  %v188_v7 = vrot.slane %v3039_v1, 7  ;;  %v3178_v63 = vld [vmem:[%s3033_s16 + $0x20] sm:$0xff] }
  0x12   : > { %v205_v8 = vrot.slane %v3045_v3, 1  ;;  %v191_v9 = vrot.slane %v3042_v2, 6  ;;  %v194_v10 = vrot.slane %v3045_v3, 5  ;;  %v222_v11 = vrot.slane %v3036_v0, 1 }
  0x13   : > { %v562_v12 = vsel %vm189_vm0, %v199_v5, %v198_v4  ;;  %v224_v13 = vrot.slane %v3042_v2, 7  ;;  %v226_v14 = vrot.slane %v3045_v3, 6  ;;  %v566_v15 = vsel %vm200_vm3, %v188_v7, %v3036_v0 }
  0x14   : > { %v563_v16 = vsel %vm192_vm1, %v202_v6, %v562_v12  ;;  %v567_v17 = vsel %vm203_vm4, %v191_v9, %v566_v15  ;;  %v711_v18 = vsel %vm200_vm3, %v3039_v1, %v222_v11  ;;  %v214_v19 = vrot.slane %v3036_v0, 5 }
  0x15   : > { %v3076_v20 = vsel %vm195_vm2, %v205_v8, %v563_v16  ;;  %v3081_v21 = vsel %vm206_vm5, %v194_v10, %v567_v17  ;;  %v712_v22 = vsel %vm203_vm4, %v224_v13, %v711_v18  ;;  %v215_v23 = vrot.slane %v3039_v1, 4  ;;  %v3197_v16 = vld [vmem:[%s3033_s16 + $0x8] sm:$0xff]  ;;  %v3200_v17 = vld [vmem:[%s3033_s16 + $0x38] sm:$0xff] }
  0x16   : > { %572 = vrot.lane.b32.xlu0 %v3076_v20, %s2992_s17  ;;  %v3092_v24 = vsel %vm206_vm5, %v226_v14, %v712_v22  ;;  %v217_v25 = vrot.slane %v3042_v2, 3  ;;  %v219_v26 = vrot.slane %v3045_v3, 2  ;;  %v409_v27 = vrot.slane %v3036_v0, 3  ;;  %v3219_v22 = vld [vmem:[%s3033_s16 + $0x50] sm:$0xff] }
  0x17   : > { %v2838_v28 = vpack.i.bf16 %v3092_v24, %v3081_v21  ;;  %v707_v29 = vsel %vm189_vm0, %v215_v23, %v214_v19  ;;  %v410_v30 = vrot.slane %v3039_v1, 2  ;;  %v412_v31 = vrot.slane %v3042_v2, 1 }
  0x18   : > { %v708_v32 = vsel %vm192_vm1, %v217_v25, %v707_v29  ;;  %v241_v33 = vrot.slane %v3036_v0, 6  ;;  %v242_v34 = vrot.slane %v3039_v1, 5  ;;  %v416_v36 = vrot.slane %v3036_v0, 7 }
  0x19   : > { %2839 = vrot.lane.b32.xlu1 %v2838_v28, %s2993_s18  ;;  %v411_v35 = vsel %vm189_vm0, %v410_v30, %v409_v27  ;;  %v417_v38 = vrot.slane %v3039_v1, 6  ;;  %v419_v39 = vrot.slane %v3042_v2, 5  ;;  %v3118_v40 = vsel %vm195_vm2, %v219_v26, %v708_v32 }
  0x1a   : > { %v413_v37 = vsel %vm192_vm1, %v412_v31, %v411_v35  ;;  %v244_v42 = vrot.slane %v3042_v2, 4  ;;  %v421_v43 = vrot.slane %v3045_v3, 4  ;;  %v243_v44 = vsel %vm200_vm3, %v242_v34, %v241_v33 }
  0x1b   : > { %v3122_v41 = vsel %vm195_vm2, %v3045_v3, %v413_v37  ;;  %v418_v45 = vsel %vm200_vm3, %v417_v38, %v416_v36  ;;  %v246_v48 = vrot.slane %v3045_v3, 3  ;;  %v216_v52 = vsel %vm200_vm3, %v215_v23, %v214_v19 }
  0x1c   : > { %v2843_v46 = vpack.i.bf16 %v3076_v20, %v3122_v41  ;;  %v420_v47 = vsel %vm203_vm4, %v419_v39, %v418_v45  ;;  %v245_v50 = vsel %vm203_vm4, %v244_v42, %v243_v44  ;;  %v234_v53 = vrot.slane %v3036_v0, 2 }
  0x1d   : > { %v3145_v49 = vsel %vm206_vm5, %v421_v43, %v420_v47  ;;  %v235_v54 = vrot.slane %v3039_v1, 1  ;;  %v3160_v55 = vsel %vm206_vm5, %v246_v48, %v245_v50  ;;  %v238_v56 = vrot.slane %v3045_v3, 7 }
  0x1e   : > { %717 = vrot.lane.b32.xlu0 %v3118_v40, %s2992_s17  ;;  %v2848_v51 = vpack.i.bf16 %v3081_v21, %v3145_v49  ;;  %v218_v58 = vsel %vm203_vm4, %v217_v25, %v216_v52  ;;  %v190_v59 = vsel %vm189_vm0, %v188_v7, %v3036_v0  ;;  %v223_v60 = vsel %vm189_vm0, %v3039_v1, %v222_v11 }
  0x1f   : > { %v236_v57 = vsel %vm189_vm0, %v235_v54, %v234_v53  ;;  %v2853_v62 = vpack.i.bf16 %v3145_v49, %v3160_v55  ;;  %v3188_v7 = vsel %vm206_vm5, %v219_v26, %v218_v58  ;;  %v193_v11 = vsel %vm192_vm1, %v191_v9, %v190_v59 }
  0x20   : > { %2849 = vrot.lane.b32.xlu2 %v2848_v51, %s2992_s17  ;;  %v237_v61 = vsel %vm192_vm1, %v3042_v2, %v236_v57  ;;  %v225_v15 = vsel %vm192_vm1, %v224_v13, %v223_v60  ;;  %v1146_v18 = vrot.slane %v3178_v63, 7  ;;  %v2863_v19 = vpack.i.bf16 %v3160_v55, %v3188_v7 }
  0x21   : > { %2844 = vrot.lane.b32.xlu1 %v2843_v46, %s2993_s18  ;;  %v3185_v12 = vsel %vm195_vm2, %v238_v56, %v237_v61  ;;  %v3211_v9 = vsel %vm195_vm2, %v194_v10, %v193_v11  ;;  %v3216_v13 = vsel %vm195_vm2, %v226_v14, %v225_v15  ;;  %v1148_v23 = vrot.slane %v3200_v17, 6 }
  0x22   : > { %v1298_v25 = vrot.slane %v3197_v16, 1  ;;  %v1147_v26 = vsel %vm189_vm0, %v1146_v18, %v3197_v16  ;;  %v201_v10 = vsel %vm200_vm3, %v199_v5, %v198_v4  ;;  %v2868_v14 = vpack.i.bf16 %v3216_v13, %v3211_v9 }
  0x23   : > { %v2858_v28 = vpack.i.bf16 %v3185_v12, %v3216_v13  ;;  %v1150_v29 = vrot.slane %v3219_v22, 5  ;;  %v1149_v32 = vsel %vm192_vm1, %v1148_v23, %v1147_v26  ;;  %v1300_v37 = vrot.slane %v3200_v17, 7 }
  0x24   : > { %v1299_v35 = vsel %vm189_vm0, %v3178_v63, %v1298_v25  ;;  %v204_v4 = vsel %vm203_vm4, %v202_v6, %v201_v10  ;;  %v1153_v5 = vrot.slane %v3197_v16, 4  ;;  %v1154_v44 = vrot.slane %v3178_v63, 3 }
  0x25   : > { %v1305_v45 = vrot.slane %v3197_v16, 5  ;;  %v1306_v46 = vrot.slane %v3178_v63, 4  ;;  %v997_v47 = vsel %vm189_vm0, %v417_v38, %v416_v36  ;;  %v1302_v50 = vrot.slane %v3219_v22, 6 }
  0x26   : > { %426 = vrot.lane.b32.xlu0 %v3122_v41, %s2992_s17  ;;  %v207_v6 = vsel %vm206_vm5, %v205_v8, %v204_v4  ;;  %v3263_v51 = vsel %vm195_vm2, %v1150_v29, %v1149_v32  ;;  %v1301_v52 = vsel %vm192_vm1, %v1300_v37, %v1299_v35  ;;  %v1156_v57 = vrot.slane %v3200_v17, 2 }
  0x27   : > { %v1308_v58 = vrot.slane %v3200_v17, 3  ;;  %v998_v36 = vsel %vm192_vm1, %v419_v39, %v997_v47  ;;  %v1001_v8 = vsel %vm200_vm3, %v410_v30, %v409_v27  ;;  %v1155_v38 = vsel %vm200_vm3, %v1154_v44, %v1153_v5 }
  0x28   : > { %251 = vrot.lane.b32.xlu2 %v3185_v12, %s2992_s17  ;;  %v1307_v59 = vsel %vm200_vm3, %v1306_v46, %v1305_v45  ;;  %v2873_v60 = vpack.i.bf16 %v3188_v7, %v207_v6  ;;  %v3284_v61 = vsel %vm195_vm2, %v1302_v50, %v1301_v52  ;;  %v1158_v39 = vrot.slane %v3219_v22, 1 }
  0x29   : > { %2854 = vrot.lane.b32.xlu1 %v2853_v62, %s2993_s18  ;;  %v1310_v62 = vrot.slane %v3219_v22, 2  ;;  %v3291_v27 = vsel %vm195_vm2, %v421_v43, %v998_v36  ;;  %v1002_v30 = vsel %vm203_vm4, %v412_v31, %v1001_v8  ;;  %v1157_v11 = vsel %vm203_vm4, %v1156_v57, %v1155_v38 }
  0x2a   : > { %v1309_v15 = vsel %vm203_vm4, %v1308_v58, %v1307_v59  ;;  %v3305_v43 = vsel %vm206_vm5, %v3045_v3, %v1002_v30  ;;  %v3308_v26 = vsel %vm206_vm5, %v1158_v39, %v1157_v11  ;;  %v856_v10 = vsel %vm200_vm3, %v235_v54, %v234_v53 }
  0x2b   : > { %v3311_v31 = vsel %vm206_vm5, %v1310_v62, %v1309_v15  ;;  %v857_v32 = vsel %vm203_vm4, %v3042_v2, %v856_v10  ;;  %v852_v35 = vsel %vm189_vm0, %v242_v34, %v241_v33  ;;  %v1754_v33 = vsel %vm189_vm0, %v1154_v44, %v1153_v5 }
  0x2c   : > { %v3335_v53 = vsel %vm206_vm5, %v238_v56, %v857_v32  ;;  %v853_v54 = vsel %vm192_vm1, %v244_v42, %v852_v35  ;;  %v1602_v34 = vrot.slane %v3197_v16, 3  ;;  %v1603_v56 = vrot.slane %v3178_v63, 2 }
  0x2d   : > { %v2893_v0 = vpack.i.bf16 %v3305_v43, %v3335_v53  ;;  %v3347_v1 = vsel %vm195_vm2, %v246_v48, %v853_v54  ;;  %v1758_v2 = vsel %vm200_vm3, %v1146_v18, %v3197_v16  ;;  %v1903_v42 = vsel %vm200_vm3, %v3178_v63, %v1298_v25  ;;  %v170_v54 = vld [vmem:[%s3033_s16 + $0x10] sm:$0x3] }
  0x2e   : > { %2864 = vrot.lane.b32.xlu0 %v2863_v19, %s2992_s17  ;;  %v2883_v19 = vpack.i.bf16 %v3263_v51, %v3291_v27  ;;  %v2903_v3 = vpack.i.bf16 %v3335_v53, %v3092_v24  ;;  %v1755_v48 = vsel %vm192_vm1, %v1156_v57, %v1754_v33  ;;  %v1605_v4 = vrot.slane %v3200_v17, 1 }
  0x2f   : > { %v1759_v5 = vsel %vm203_vm4, %v1148_v23, %v1758_v2  ;;  %v1904_v44 = vsel %vm203_vm4, %v1300_v37, %v1903_v42  ;;  %v1604_v18 = vsel %vm189_vm0, %v1603_v56, %v1602_v34  ;;  %v2898_v25 = vpack.i.bf16 %v3347_v1, %v3118_v40 }
  0x30   : > { %2859 = vrot.lane.b32.xlu2 %v2858_v28, %s2993_s18  ;;  %v2878_v28 = vpack.i.bf16 %v3311_v31, %v3308_v26  ;;  %v3378_v47 = vsel %vm195_vm2, %v1158_v39, %v1755_v48  ;;  %v3383_v23 = vsel %vm206_vm5, %v1150_v29, %v1759_v5  ;;  %v3386_v37 = vsel %vm206_vm5, %v1302_v50, %v1904_v44 }
  0x31   : > { %2869 = vrot.lane.b32.xlu1 %v2868_v14, %s2992_s17  ;;  %v2888_v14 = vpack.i.bf16 %v3308_v26, %v3305_v43  ;;  %v1606_v6 = vsel %vm192_vm1, %v1605_v4, %v1604_v18  ;;  %v1899_v52 = vsel %vm189_vm0, %v1306_v46, %v1305_v45  ;;  %v1609_v57 = vrot.slane %v3197_v16, 7 }
  0x32   : > { %v1610_v36 = vrot.slane %v3178_v63, 6  ;;  %v4910_v29 = vrot.slane %v3197_v16, 2  ;;  %v4909_v50 = vrot.slane %v3178_v63, 1  ;;  %v2908_v8 = vpack.i.bf16 %v3386_v37, %v3383_v23 }
  0x33   : > { %v3405_v38 = vsel %vm195_vm2, %v3219_v22, %v1606_v6  ;;  %v1900_v45 = vsel %vm192_vm1, %v1308_v58, %v1899_v52  ;;  %v1612_v46 = vrot.slane %v3200_v17, 5  ;;  %v4908_v30 = vrot.slane %v3219_v22, 4 }
  0x34   : > { %v1611_v59 = vsel %vm200_vm3, %v1610_v36, %v1609_v57  ;;  %v1452_v39 = vsel %vm189_vm0, %v4909_v50, %v4910_v29  ;;  %v3423_v58 = vsel %vm195_vm2, %v1310_v62, %v1900_v45  ;;  %v4907_v11 = vrot.slane %v3219_v22, 7 }
  0x35   : > { %v1613_v15 = vsel %vm203_vm4, %v1612_v46, %v1611_v59  ;;  %v1457_v10 = vrot.slane %v3197_v16, 6  ;;  %v1460_v32 = vrot.slane %v3200_v17, 4  ;;  %v1462_v2 = vrot.slane %v3219_v22, 3 }
  0x36   : > { %1163 = vrot.lane.b32.xlu0 %v3263_v51, %s2992_s17  ;;  %v3440_v62 = vsel %vm206_vm5, %v4908_v30, %v1613_v15  ;;  %v2345_v5 = vrot.slane %v170_v54, 4  ;;  %v2497_v44 = vrot.slane %v170_v54, 5 }
  0x37   : > { %v2918_v33 = vpack.i.bf16 %v3383_v23, %v3440_v62 }
  0x38   : > { %2874 = vrot.lane.b32.xlu2 %v2873_v60, %s2993_s18  ;;  %v2913_v60 = vpack.i.bf16 %v3378_v47, %v3405_v38 }
  0x39   : > { %1315 = vrot.lane.b32.xlu1 %v3284_v61, %s2992_s17 }
  0x3e   : > { %2884 = vrot.lane.b32.xlu0 %v2883_v19, %s2993_s18  ;;  %v1453_v19 = vsel %vm192_vm1, %v3200_v17, %v1452_v39 }
  0x40   : > { %2879 = vrot.lane.b32.xlu2 %v2878_v28, %s2993_s18  ;;  %v3445_v28 = vsel %vm195_vm2, %v4907_v11, %v1453_v19 }
  0x41   : > { %2889 = vrot.lane.b32.xlu1 %v2888_v14, %s2992_s17  ;;  %v1458_v14 = vrot.slane %v3178_v63, 5  ;;  %v2928_v6 = vpack.i.bf16 %v3445_v28, %v3284_v61 }
  0x43   : > { %v1459_v35 = vsel %vm200_vm3, %v1458_v14, %v1457_v10 }
  0x44   : > { %v1461_v42 = vsel %vm203_vm4, %v1460_v32, %v1459_v35 }
  0x45   : > { %v3464_v52 = vsel %vm206_vm5, %v1462_v2, %v1461_v42 }
  0x46   : > { %1007 = vrot.lane.b32.xlu0 %v3291_v27, %s2992_s17  ;;  %v2933_v35 = vpack.i.bf16 %v3464_v52, %v3311_v31  ;;  %v2923_v11 = vpack.i.bf16 %v3440_v62, %v3464_v52 }
  0x48   : > { %862 = vrot.lane.b32.xlu2 %v3347_v1, %s2992_s17 }
  0x49   : > { %2894 = vrot.lane.b32.xlu1 %v2893_v0, %s2993_s18  ;;  %v173_v0 = vld [vmem:[%s3033_s16 + $0x28] sm:$0x3] }
  0x4a   : > { %v2346_v48 = vrot.slane %v173_v0, 3  ;;  %v2498_v18 = vrot.slane %v173_v0, 4  ;;  %v2338_v19 = vrot.slane %v173_v0, 7 }
  0x4c   : > { %v2347_v39 = vsel %vm200_vm3, %v2346_v48, %v2345_v5  ;;  %v2499_v15 = vsel %vm200_vm3, %v2498_v18, %v2497_v44  ;;  %v2339_v18 = vsel %vm189_vm0, %v2338_v19, %v170_v54 }
  0x4e   : > { %2904 = vrot.lane.b32.xlu0 %v2903_v3, %s2992_s17  ;;  %v176_v3 = vld [vmem:[%s3033_s16 + $0x40] sm:$0x3] }
  0x4f   : > { %v2348_v45 = vrot.slane %v176_v3, 2  ;;  %v2500_v59 = vrot.slane %v176_v3, 3  ;;  %v2340_v5 = vrot.slane %v176_v3, 6 }
  0x50   : > { %2899 = vrot.lane.b32.xlu2 %v2898_v25, %s2993_s18  ;;  %v2490_v25 = vrot.slane %v170_v54, 1 }
  0x51   : > { %1764 = vrot.lane.b32.xlu1 %v3378_v47, %s2992_s17  ;;  %v2349_v29 = vsel %vm203_vm4, %v2348_v45, %v2347_v39  ;;  %v2501_v48 = vsel %vm203_vm4, %v2500_v59, %v2499_v15  ;;  %v2341_v54 = vsel %vm192_vm1, %v2340_v5, %v2339_v18  ;;  %v4914_v39 = vrot.slane %v3219_v22, 7 }
  0x56   : > { %2909 = vrot.lane.b32.xlu0 %v2908_v8, %s2993_s18  ;;  %v179_v8 = vld [vmem:[%s3033_s16 + $0x58] sm:$0x3] }
  0x57   : > { %v2350_v42 = vrot.slane %v179_v8, 1  ;;  %v2502_v30 = vrot.slane %v179_v8, 2  ;;  %v2494_v50 = vrot.slane %v179_v8, 6 }
  0x58   : > { %1909 = vrot.lane.b32.xlu2 %v3423_v58, %s2992_s17 }
  0x59   : > { %2914 = vrot.lane.b32.xlu1 %v2913_v60, %s2993_s18  ;;  %v2492_v60 = vrot.slane %v176_v3, 7  ;;  %v2342_v3 = vrot.slane %v179_v8, 5 }
  0x5e   : > { %1467 = vrot.lane.b32.xlu0 %v3445_v28, %s2992_s17 }
  0x60   : > { %2919 = vrot.lane.b32.xlu2 %v2918_v33, %s2992_s17  ;;  %v2491_v33 = vsel %vm189_vm0, %v173_v0, %v2490_v25  ;;  %v2193_v0 = vsel %vm200_vm3, %v1603_v56, %v1602_v34  ;;  %v3487_v25 = vsel %vm206_vm5, %v2350_v42, %v2349_v29  ;;  %v2189_v34 = vsel %vm189_vm0, %v1610_v36, %v1609_v57 }
  0x61   : > { %1619 = vrot.lane.b32.xlu1 %v3405_v38, %s2992_s17  ;;  %v2493_v44 = vsel %vm192_vm1, %v2492_v60, %v2491_v33  ;;  %v2194_v59 = vsel %vm203_vm4, %v1605_v4, %v2193_v0  ;;  %v3506_v29 = vsel %vm195_vm2, %v2342_v3, %v2341_v54  ;;  %v2190_v4 = vsel %vm192_vm1, %v1612_v46, %v2189_v34 }
  0x62   : > { %v3491_v45 = vsel %vm195_vm2, %v2494_v50, %v2493_v44  ;;  %v3510_v50 = vsel %vm206_vm5, %v3219_v22, %v2194_v59  ;;  %v4911_v57 = vrot.slane %v3197_v16, 2  ;;  %v4912_v36 = vrot.slane %v3178_v63, 1 }
  0x63   : > { %v2948_v8 = vpack.i.bf16 %v3487_v25, %v3510_v50  ;;  %v4913_v60 = vrot.slane %v3219_v22, 4 }
  0x65   : > { %v3529_v46 = vsel %vm195_vm2, %v4913_v60, %v2190_v4 }
  0x66   : > { %2929 = vrot.lane.b32.xlu0 %v2928_v6, %s2993_s18  ;;  %v2503_v6 = vsel %vm206_vm5, %v2502_v30, %v2501_v48  ;;  %v2044_v30 = vsel %vm189_vm0, %v1458_v14, %v1457_v10  ;;  %v2943_v63 = vpack.i.bf16 %v3506_v29, %v3529_v46 }
  0x67   : > { %v2938_v56 = vpack.i.bf16 %v2503_v6, %v3487_v25  ;;  %v2045_v10 = vsel %vm192_vm1, %v1460_v32, %v2044_v30 }
  0x68   : > { %2924 = vrot.lane.b32.xlu2 %v2923_v11, %s2993_s18  ;;  %v2048_v11 = vsel %vm200_vm3, %v4912_v36, %v4911_v57  ;;  %v3538_v14 = vsel %vm195_vm2, %v1462_v2, %v2045_v10 }
  0x69   : > { %2934 = vrot.lane.b32.xlu1 %v2933_v35, %s2992_s17  ;;  %v2049_v16 = vsel %vm203_vm4, %v3200_v17, %v2048_v11  ;;  %v2958_v19 = vpack.i.bf16 %v3538_v14, %v3423_v58 }
  0x6a   : > { %v3543_v15 = vsel %vm206_vm5, %v4914_v39, %v2049_v16 }
  0x6b   : > { %v2953_v17 = vpack.i.bf16 %v3510_v50, %v3543_v15  ;;  %v2963_v2 = vpack.i.bf16 %v3543_v15, %v3386_v37 }
  0x6e   : > { %2507 = vrot.lane.b32.xlu0 %v3491_v45, %s2992_s17 }
  0x70   : > { %2355 = vrot.lane.b32.xlu2 %v3506_v29, %s2992_s17 }
  0x71   : > { %2939 = vrot.lane.b32.xlu1 %v2938_v56, %s2993_s18 }
  0x76   : > { %2949 = vrot.lane.b32.xlu0 %v2948_v8, %s2992_s17 }
  0x78   : > { %2944 = vrot.lane.b32.xlu2 %v2943_v63, %s2993_s18 }
  0x79   : > { %2054 = vrot.lane.b32.xlu1 %v3538_v14, %s2992_s17 }
  0x7a   : > { %v2850_v32 = vpop.permute.xlu2 %2849 }
  0x7b   : > { %v2852_v54 = vunpack.i.h.bf16 %v2850_v32  ;;  %v2851_v59 = vunpack.i.l.bf16 %v2850_v32 }
  0x7e   : > { %2954 = vrot.lane.b32.xlu0 %v2953_v17, %s2993_s18 }
  0x80   : > { %2199 = vrot.lane.b32.xlu2 %v3529_v46, %s2992_s17 }
  0x81   : > { %2959 = vrot.lane.b32.xlu1 %v2958_v19, %s2993_s18 }
  0x82   : > { %v252_v22 = vpop.permute.xlu2 %251 }
  0x83   : > { %2728 = vmatpush.msk.msra.mxu0 %vm254_vm6, %v252_v22  ;;  %v575_v57 = vsel %vm254_vm6, %v252_v22, %v3145_v49  ;;  %v3592_v49 = vld [vmem:[%s4905_s1] sm:$0xff] }
  0x88   : > { %v3559_v35 = vpop.permute.xlu0 %572  ;;  %2964 = vrot.lane.b32.xlu2 %v2963_v2, %s2992_s17 }
  0x89   : > { %2738 = vmatpush.msk.msra.mxu2 %vm254_vm6, %v3559_v35 }
  0x8a   : > { %v2860_v42 = vpop.permute.xlu2 %2859 }
  0x8b   : > { %v2840_v33 = vpop.permute.xlu1 %2839  ;;  %v2862_v63 = vunpack.i.h.bf16 %v2860_v42  ;;  %v2861_v39 = vunpack.i.l.bf16 %v2860_v42 }
  0x8c   : > { %v2841_v48 = vunpack.i.l.bf16 %v2840_v33  ;;  %v2842_v5 = vunpack.i.h.bf16 %v2840_v33 }
  0x8e   : > { %v3566_v44 = vsel %vm254_vm6, %v3076_v20, %v2841_v48  ;;  %v3575_v0 = vsel %vm254_vm6, %v3118_v40, %v2842_v5 }
  0x8f   : > { %591 = vmatpush.msra.mxu2 %v3566_v44 }
  0x90   : > { %v3569_v18 = vpop.permute.xlu0 %717 }
  0x91   : > { %2743 = vmatpush.msk.msra.mxu3 %vm254_vm6, %v3569_v18 }
  0x92   : > { %v2875_v3 = vpop.permute.xlu2 %2874 }
  0x93   : > { %v2845_v6 = vpop.permute.xlu1 %2844  ;;  %736 = vmatpush.msra.mxu3 %v3575_v0 }
  0x94   : > { %v2847_v34 = vunpack.i.h.bf16 %v2845_v6  ;;  %v2846_v20 = vunpack.i.l.bf16 %v2845_v6 }
  0x96   : > { %v576_v56 = vsel %vm254_vm6, %v2846_v20, %v2851_v59  ;;  %v721_v4 = vsel %vm254_vm6, %v2847_v34, %v2852_v54 }
  0x97   : > { %592 = vmatpush.msra.mxu2 %v576_v56  ;;  %737 = vmatpush.msra.mxu3 %v721_v4 }
  0x98   : > { %v427_v30 = vpop.permute.xlu0 %426 }
  0x99   : > { %2733 = vmatpush.msk.msra.mxu1 %vm254_vm6, %v427_v30  ;;  %593 = vmatpush.msra.mxu2 %v575_v57  ;;  %v720_v40 = vsel %vm254_vm6, %v427_v30, %v3081_v21 }
  0x9a   : > { %738 = vmatpush.msra.mxu3 %v720_v40  ;;  %v2880_v11 = vpop.permute.xlu2 %2879 }
  0x9b   : > { %v2855_v36 = vpop.permute.xlu1 %2854  ;;  %v2881_v42 = vunpack.i.l.bf16 %v2880_v11  ;;  %v2882_v59 = vunpack.i.h.bf16 %v2880_v11 }
  0x9c   : > { %v2857_v8 = vunpack.i.h.bf16 %v2855_v36  ;;  %v2856_v60 = vunpack.i.l.bf16 %v2855_v36 }
  0x9d   : > { %v3612_v56 = vsel %vm254_vm6, %v3263_v51, %v2881_v42  ;;  %v1010_v42 = vsel %vm254_vm6, %v3569_v18, %v3335_v53 }
  0x9e   : > { %v258_v10 = vsel %vm254_vm6, %v3185_v12, %v2856_v60  ;;  %v432_v16 = vsel %vm254_vm6, %v3122_v41, %v2857_v8  ;;  %v2876_v41 = vunpack.i.l.bf16 %v2875_v3  ;;  %v2877_v12 = vunpack.i.h.bf16 %v2875_v3 }
  0x9f   : > { %285 = vmatpush.msra.mxu0 %v258_v10  ;;  %446 = vmatpush.msra.mxu1 %v432_v16 }
  0xa0   : > { %739 = vmatpush.msra.mxu3 %v432_v16  ;;  %v2865_v21 = vpop.permute.xlu0 %2864  ;;  %594 = vmatpush.msra.mxu2 %v258_v10  ;;  %v255_v3 = vsel %vm254_vm6, %v3211_v9, %v2876_v41  ;;  %v429_v34 = vsel %vm254_vm6, %v3216_v13, %v2877_v12  ;;  %v3628_v9 = vsel %vm254_vm6, %v3284_v61, %v2882_v59  ;;  %v3645_v61 = vld [vmem:[%s4905_s1 + $0x10] sm:$0xff] }
  0xa1   : > { %v2867_v17 = vunpack.i.h.bf16 %v2865_v21  ;;  %v2866_v32 = vunpack.i.l.bf16 %v2865_v21  ;;  %2739 = vmatmul.msk.f32.vlgmr.msra.gmra.mxu2 %vm260_vm7, %v3592_v49  ;;  %2744 = vmatmul.msk.f32.vlgmr.msra.gmra.mxu3 %vm260_vm7, %v3592_v49 }
  0xa2   : > { %v863_v33 = vpop.permute.xlu2 %862 }
  0xa3   : > { %v2870_v19 = vpop.permute.xlu1 %2869  ;;  %v257_v22 = vsel %vm254_vm6, %v2861_v39, %v2866_v32  ;;  %v431_v2 = vsel %vm254_vm6, %v2862_v63, %v2867_v17  ;;  %v1166_v10 = vsel %vm254_vm6, %v863_v33, %v3305_v43  ;;  %v3667_v63 = vld [vmem:[%s4905_s1 + $0x18] sm:$0xff] }
  0xa4   : > { %v2872_v48 = vunpack.i.h.bf16 %v2870_v19  ;;  %v2871_v5 = vunpack.i.l.bf16 %v2870_v19  ;;  %286 = vmatpush.msra.mxu0 %v257_v22  ;;  %447 = vmatpush.msra.mxu1 %v431_v2 }
  0xa6   : > { %v256_v6 = vsel %vm254_vm6, %v2871_v5, %v3188_v7  ;;  %v430_v54 = vsel %vm254_vm6, %v2872_v48, %v3160_v55  ;;  %v3621_v55 = vld [vmem:[%s4905_s1 + $0x8] sm:$0xff]  ;;  %v865_v5 = vsel %vm254_vm6, %v3559_v35, %v3092_v24 }
  0xa7   : > { %287 = vmatpush.msra.mxu0 %v256_v6  ;;  %448 = vmatpush.msra.mxu1 %v430_v54 }
  0xa8   : > { %v3608_v20 = vpop.permute.xlu0 %1163 }
  0xa9   : > { %2758 = vmatpush.msk.msrb.mxu2 %vm254_vm6, %v3608_v20  ;;  %288 = vmatpush.msra.mxu0 %v255_v3 }
  0xaa   : > { %449 = vmatpush.msra.mxu1 %v429_v34  ;;  %2729 = vmatmul.msk.f32.vlgmr.msra.gmra.mxu0 %vm260_vm7, %v3592_v49  ;;  %v2900_v13 = vpop.permute.xlu2 %2899 }
  0xab   : > { %v3623_v7 = vpop.permute.xlu1 %1315  ;;  %1182 = vmatpush.msrb.mxu2 %v3612_v56  ;;  %2734 = vmatmul.msk.f32.vlgmr.msra.gmra.mxu1 %vm260_vm7, %v3592_v49  ;;  %v2902_v12 = vunpack.i.h.bf16 %v2900_v13  ;;  %v2901_v19 = vunpack.i.l.bf16 %v2900_v13 }
  0xac   : > { %2763 = vmatpush.msk.msrb.mxu3 %vm254_vm6, %v3623_v7  ;;  %2748 = vmatpush.msk.msrb.mxu0 %vm254_vm6, %v863_v33 }
  0xad   : > { %2740 = vmatmul.msk.f32.gmra.mxu2 %vm260_vm7, %v3621_v55  ;;  %2745 = vmatmul.msk.f32.gmra.mxu3 %vm260_vm7, %v3621_v55 }
  0xae   : > { %1334 = vmatpush.msrb.mxu3 %v3628_v9 }
  0xb0   : > { %v2885_v51 = vpop.permute.xlu0 %2884 }
  0xb1   : > { %v2887_v57 = vunpack.i.h.bf16 %v2885_v51  ;;  %v2886_v40 = vunpack.i.l.bf16 %v2885_v51 }
  0xb2   : > { %2730 = vmatmul.msk.f32.gmra.mxu0 %vm260_vm7, %v3621_v55  ;;  %v3649_v30 = vpop.permute.xlu2 %1909 }
  0xb3   : > { %v2890_v4 = vpop.permute.xlu1 %2889  ;;  %2735 = vmatmul.msk.f32.gmra.mxu1 %vm260_vm7, %v3621_v55 }
  0xb4   : > { %v2892_v36 = vunpack.i.h.bf16 %v2890_v4  ;;  %v2891_v11 = vunpack.i.l.bf16 %v2890_v4 }
  0xb5   : > { %2741 = vmatmul.msk.f32.gmra.mxu2 %vm260_vm7, %v3645_v61  ;;  %2746 = vmatmul.msk.f32.gmra.mxu3 %vm260_vm7, %v3645_v61 }
  0xb6   : > { %v1167_v8 = vsel %vm254_vm6, %v2886_v40, %v2891_v11  ;;  %v1319_v60 = vsel %vm254_vm6, %v2887_v57, %v2892_v36 }
  0xb7   : > { %1183 = vmatpush.msrb.mxu2 %v1167_v8  ;;  %1335 = vmatpush.msrb.mxu3 %v1319_v60 }
  0xb8   : > { %v1008_v16 = vpop.permute.xlu0 %1007 }
  0xb9   : > { %2753 = vmatpush.msk.msrb.mxu1 %vm254_vm6, %v1008_v16  ;;  %1184 = vmatpush.msrb.mxu2 %v1166_v10  ;;  %v1318_v21 = vsel %vm254_vm6, %v1008_v16, %v3308_v26 }
  0xba   : > { %1336 = vmatpush.msrb.mxu3 %v1318_v21  ;;  %2731 = vmatmul.msk.f32.gmra.mxu0 %vm260_vm7, %v3645_v61  ;;  %v2920_v32 = vpop.permute.xlu2 %2919 }
  0xbb   : > { %v2895_v39 = vpop.permute.xlu1 %2894  ;;  %2736 = vmatmul.msk.f32.gmra.mxu1 %vm260_vm7, %v3645_v61  ;;  %v2922_v53 = vunpack.i.h.bf16 %v2920_v32  ;;  %v2921_v18 = vunpack.i.l.bf16 %v2920_v32  ;;  %v1470_v32 = vsel %vm254_vm6, %v3608_v20, %v3311_v31 }
  0xbc   : > { %v2897_v43 = vunpack.i.h.bf16 %v2895_v39  ;;  %v2896_v17 = vunpack.i.l.bf16 %v2895_v39 }
  0xbd   : > { %2742 = vmatmul.msk.f32.gmra.mxu2 %vm260_vm7, %v3667_v63  ;;  %2747 = vmatmul.msk.f32.gmra.mxu3 %vm260_vm7, %v3667_v63 }
  0xbe   : > { %v867_v26 = vsel %vm254_vm6, %v3347_v1, %v2896_v17  ;;  %v1012_v41 = vsel %vm254_vm6, %v3291_v27, %v2897_v43 }
  0xbf   : > { %881 = vmatpush.msrb.mxu0 %v867_v26  ;;  %1026 = vmatpush.msrb.mxu1 %v1012_v41 }
  0xc0   : > { %v2905_v22 = vpop.permute.xlu0 %2904  ;;  %1185 = vmatpush.msrb.mxu2 %v867_v26  ;;  %1337 = vmatpush.msrb.mxu3 %v1012_v41  ;;  %v1622_v26 = vsel %vm254_vm6, %v3623_v7, %v3464_v52 }
  0xc1   : > { %v2907_v2 = vunpack.i.h.bf16 %v2905_v22  ;;  %v2906_v33 = vunpack.i.l.bf16 %v2905_v22 }
  0xc2   : > { %2783 = vmatpush.msk.msra.mxu3 %vm254_vm6, %v3649_v30  ;;  %2732 = vmatmul.msk.f32.gmra.mxu0 %vm260_vm7, %v3667_v63  ;;  %v2925_v6 = vpop.permute.xlu2 %2924 }
  0xc3   : > { %v3683_v48 = vpop.permute.xlu1 %1764  ;;  %v866_v1 = vsel %vm254_vm6, %v2901_v19, %v2906_v33  ;;  %v1011_v27 = vsel %vm254_vm6, %v2902_v12, %v2907_v2  ;;  %2737 = vmatmul.msk.f32.gmra.mxu1 %vm260_vm7, %v3667_v63  ;;  %v2926_v13 = vunpack.i.l.bf16 %v2925_v6  ;;  %v2927_v4 = vunpack.i.h.bf16 %v2925_v6 }
  0xc4   : > { %882 = vmatpush.msrb.mxu0 %v866_v1  ;;  %1027 = vmatpush.msrb.mxu1 %v1011_v27 }
  0xc5   : > { %2778 = vmatpush.msk.msra.mxu2 %vm254_vm6, %v3683_v48  ;;  %2764 = vmatmul.msk.f32.vlgmr.msrb.gmra.mxu3 %vm260_vm7, %v3592_v49  ;;  %v1472_v40 = vsel %vm254_vm6, %v3445_v28, %v2926_v13  ;;  %v1624_v8 = vsel %vm254_vm6, %v3405_v38, %v2927_v4 }
  0xc6   : > { %883 = vmatpush.msrb.mxu0 %v865_v5  ;;  %1028 = vmatpush.msrb.mxu1 %v1010_v42 }
  0xc7   : > { %2759 = vmatmul.msk.f32.vlgmr.msrb.gmra.mxu2 %vm260_vm7, %v3592_v49 }
  0xc8   : > { %v2910_v54 = vpop.permute.xlu0 %2909  ;;  %884 = vmatpush.msrb.mxu0 %v3566_v44  ;;  %1029 = vmatpush.msrb.mxu1 %v3575_v0 }
  0xc9   : > { %v2912_v24 = vunpack.i.h.bf16 %v2910_v54  ;;  %v2911_v35 = vunpack.i.l.bf16 %v2910_v54 }
  0xca   : > { %2749 = vmatmul.msk.f32.vlgmr.msrb.gmra.mxu0 %vm260_vm7, %v3592_v49  ;;  %v2356_v57 = vpop.permute.xlu2 %2355 }
  0xcb   : > { %v2915_v3 = vpop.permute.xlu1 %2914  ;;  %v3707_v59 = vsel %vm254_vm6, %v3378_v47, %v2911_v35  ;;  %v3711_v34 = vsel %vm254_vm6, %v3423_v58, %v2912_v24  ;;  %2754 = vmatmul.msk.f32.vlgmr.msrb.gmra.mxu1 %vm260_vm7, %v3592_v49 }
  0xcc   : > { %v2917_v44 = vunpack.i.h.bf16 %v2915_v3  ;;  %v2916_v0 = vunpack.i.l.bf16 %v2915_v3  ;;  %1783 = vmatpush.msra.mxu2 %v3707_v59  ;;  %1928 = vmatpush.msra.mxu3 %v3711_v34 }
  0xcd   : > { %2765 = vmatmul.msk.f32.gmra.mxu3 %vm260_vm7, %v3621_v55 }
  0xce   : > { %v1768_v47 = vsel %vm254_vm6, %v2916_v0, %v2921_v18  ;;  %v1913_v51 = vsel %vm254_vm6, %v2917_v44, %v2922_v53 }
  0xcf   : > { %1784 = vmatpush.msra.mxu2 %v1768_v47  ;;  %1929 = vmatpush.msra.mxu3 %v1913_v51 }
  0xd0   : > { %v1468_v58 = vpop.permute.xlu0 %1467  ;;  %2760 = vmatmul.msk.f32.gmra.mxu2 %vm260_vm7, %v3621_v55 }
  0xd1   : > { %2768 = vmatpush.msk.msra.mxu0 %vm254_vm6, %v1468_v58  ;;  %v1767_v36 = vsel %vm254_vm6, %v1468_v58, %v3440_v62 }
  0xd2   : > { %1785 = vmatpush.msra.mxu2 %v1767_v36  ;;  %2750 = vmatmul.msk.f32.gmra.mxu0 %vm260_vm7, %v3621_v55  ;;  %v2945_v10 = vpop.permute.xlu2 %2944 }
  0xd3   : > { %v1620_v11 = vpop.permute.xlu1 %1619  ;;  %1486 = vmatpush.msra.mxu0 %v1472_v40  ;;  %2755 = vmatmul.msk.f32.gmra.mxu1 %vm260_vm7, %v3621_v55  ;;  %v2946_v19 = vunpack.i.l.bf16 %v2945_v10 }
  0xd4   : > { %2773 = vmatpush.msk.msra.mxu1 %vm254_vm6, %v1620_v11  ;;  %v1912_v28 = vsel %vm254_vm6, %v1620_v11, %v3383_v23  ;;  %1786 = vmatpush.msra.mxu2 %v1472_v40 }
  0xd5   : > { %1930 = vmatpush.msra.mxu3 %v1912_v28 }
  0xd6   : > { %2798 = vmatpush.msk.msrb.mxu2 %vm254_vm6, %v2356_v57  ;;  %1638 = vmatpush.msra.mxu1 %v1624_v8 }
  0xd7   : > { %2766 = vmatmul.msk.f32.gmra.mxu3 %vm260_vm7, %v3645_v61 }
  0xd8   : > { %1931 = vmatpush.msra.mxu3 %v1624_v8  ;;  %v2930_v62 = vpop.permute.xlu0 %2929  ;;  %2761 = vmatmul.msk.f32.gmra.mxu2 %vm260_vm7, %v3645_v61 }
  0xd9   : > { %v2932_v38 = vunpack.i.h.bf16 %v2930_v62  ;;  %v2931_v60 = vunpack.i.l.bf16 %v2930_v62 }
  0xda   : > { %2751 = vmatmul.msk.f32.gmra.mxu0 %vm260_vm7, %v3645_v61  ;;  %v2200_v12 = vpop.permute.xlu2 %2199 }
  0xdb   : > { %v2935_v23 = vpop.permute.xlu1 %2934  ;;  %2756 = vmatmul.msk.f32.gmra.mxu1 %vm260_vm7, %v3645_v61  ;;  %v2510_v27 = vsel %vm254_vm6, %v2200_v12, %v3487_v25 }
  0xdc   : > { %v2937_v16 = vunpack.i.h.bf16 %v2935_v23  ;;  %v2936_v21 = vunpack.i.l.bf16 %v2935_v23 }
  0xde   : > { %v1471_v39 = vsel %vm254_vm6, %v2931_v60, %v2936_v21  ;;  %v1623_v43 = vsel %vm254_vm6, %v2932_v38, %v2937_v16 }
  0xdf   : > { %2767 = vmatmul.msk.f32.gmra.mxu3 %vm260_vm7, %v3667_v63  ;;  %1487 = vmatpush.msra.mxu0 %v1471_v39 }
  0xe0   : > { %1639 = vmatpush.msra.mxu1 %v1623_v43  ;;  %v2508_v17 = vpop.permute.xlu0 %2507  ;;  %2762 = vmatmul.msk.f32.gmra.mxu2 %vm260_vm7, %v3667_v63 }
  0xe1   : > { %1488 = vmatpush.msra.mxu0 %v1470_v32  ;;  %2803 = vmatpush.msk.msrb.mxu3 %vm254_vm6, %v2508_v17 }
  0xe2   : > { %1640 = vmatpush.msra.mxu1 %v1622_v26  ;;  %2752 = vmatmul.msk.f32.gmra.mxu0 %vm260_vm7, %v3667_v63  ;;  %v2965_v5 = vpop.permute.xlu2 %2964 }
  0xe3   : > { %v2940_v41 = vpop.permute.xlu1 %2939  ;;  %1489 = vmatpush.msra.mxu0 %v3612_v56  ;;  %2757 = vmatmul.msk.f32.gmra.mxu1 %vm260_vm7, %v3667_v63  ;;  %v2947_v56 = vunpack.i.h.bf16 %v2945_v10  ;;  %v2966_v24 = vunpack.i.l.bf16 %v2965_v5 }
  0xe4   : > { %1641 = vmatpush.msra.mxu1 %v3628_v9  ;;  %v2942_v31 = vunpack.i.h.bf16 %v2940_v41  ;;  %v2941_v20 = vunpack.i.l.bf16 %v2940_v41 }
  0xe6   : > { %2793 = vmatpush.msk.msrb.mxu1 %vm254_vm6, %v2200_v12  ;;  %v2360_v52 = vsel %vm254_vm6, %v3506_v29, %v2941_v20  ;;  %v2512_v7 = vsel %vm254_vm6, %v3491_v45, %v2942_v31 }
  0xe7   : > { %2784 = vmatmul.msk.f32.vlgmr.msra.gmra.mxu3 %vm260_vm7, %v3592_v49  ;;  %2374 = vmatpush.msrb.mxu2 %v2360_v52 }
  0xe8   : > { %2526 = vmatpush.msrb.mxu3 %v2512_v7  ;;  %v2950_v9 = vpop.permute.xlu0 %2949  ;;  %2779 = vmatmul.msk.f32.vlgmr.msra.gmra.mxu2 %vm260_vm7, %v3592_v49 }
  0xe9   : > { %v2952_v22 = vunpack.i.h.bf16 %v2950_v9  ;;  %v2951_v2 = vunpack.i.l.bf16 %v2950_v9 }
  0xea   : > { %2769 = vmatmul.msk.f32.vlgmr.msra.gmra.mxu0 %vm260_vm7, %v3592_v49 }
  0xeb   : > { %v2055_v29 = vpop.permute.xlu1 %2054  ;;  %v2359_v33 = vsel %vm254_vm6, %v2946_v19, %v2951_v2  ;;  %v2511_v45 = vsel %vm254_vm6, %v2947_v56, %v2952_v22  ;;  %2774 = vmatmul.msk.f32.vlgmr.msra.gmra.mxu1 %vm260_vm7, %v3592_v49 }
  0xec   : > { %2788 = vmatpush.msk.msrb.mxu0 %vm254_vm6, %v2055_v29  ;;  %2375 = vmatpush.msrb.mxu2 %v2359_v33  ;;  %v2358_v1 = vsel %vm254_vm6, %v2055_v29, %v3510_v50  ;;  %v2967_v50 = vunpack.i.h.bf16 %v2965_v5 }
  0xed   : > { %2527 = vmatpush.msrb.mxu3 %v2511_v45 }
  0xee   : > { %2376 = vmatpush.msrb.mxu2 %v2358_v1 }
  0xef   : > { %2785 = vmatmul.msk.f32.gmra.mxu3 %vm260_vm7, %v3621_v55 }
  0xf0   : > { %2528 = vmatpush.msrb.mxu3 %v2510_v27  ;;  %v2955_v42 = vpop.permute.xlu0 %2954  ;;  %2780 = vmatmul.msk.f32.gmra.mxu2 %vm260_vm7, %v3621_v55 }
  0xf1   : > { %v2957_v6 = vunpack.i.h.bf16 %v2955_v42  ;;  %v2956_v54 = vunpack.i.l.bf16 %v2955_v42 }
  0xf2   : > { %2770 = vmatmul.msk.f32.gmra.mxu0 %vm260_vm7, %v3621_v55 }
  0xf3   : > { %v2960_v25 = vpop.permute.xlu1 %2959  ;;  %v2059_v35 = vsel %vm254_vm6, %v3538_v14, %v2956_v54  ;;  %v2204_v53 = vsel %vm254_vm6, %v3529_v46, %v2957_v6  ;;  %2775 = vmatmul.msk.f32.gmra.mxu1 %vm260_vm7, %v3621_v55  ;;  %v2057_v46 = vsel %vm254_vm6, %v3683_v48, %v3386_v37  ;;  %v2202_v14 = vsel %vm254_vm6, %v3649_v30, %v3543_v15 }
  0xf4   : > { %v2962_v18 = vunpack.i.h.bf16 %v2960_v25  ;;  %v2961_v3 = vunpack.i.l.bf16 %v2960_v25  ;;  %2073 = vmatpush.msrb.mxu0 %v2059_v35  ;;  %2218 = vmatpush.msrb.mxu1 %v2204_v53 }
  0xf5   : > { %2377 = vmatpush.msrb.mxu2 %v2059_v35  ;;  %2529 = vmatpush.msrb.mxu3 %v2204_v53 }
  0xf6   : > { %v2058_v44 = vsel %vm254_vm6, %v2961_v3, %v2966_v24  ;;  %v2203_v0 = vsel %vm254_vm6, %v2962_v18, %v2967_v50 }
  0xf7   : > { %2786 = vmatmul.msk.f32.gmra.mxu3 %vm260_vm7, %v3645_v61  ;;  %2074 = vmatpush.msrb.mxu0 %v2058_v44 }
  0xf8   : > { %2219 = vmatpush.msrb.mxu1 %v2203_v0  ;;  %2781 = vmatmul.msk.f32.gmra.mxu2 %vm260_vm7, %v3645_v61 }
  0xf9   : > { %2075 = vmatpush.msrb.mxu0 %v2057_v46 }
  0xfa   : > { %2220 = vmatpush.msrb.mxu1 %v2202_v14  ;;  %2771 = vmatmul.msk.f32.gmra.mxu0 %vm260_vm7, %v3645_v61 }
  0xfb   : > { %2076 = vmatpush.msrb.mxu0 %v3707_v59  ;;  %2776 = vmatmul.msk.f32.gmra.mxu1 %vm260_vm7, %v3645_v61 }
  0xfc   : > { %2221 = vmatpush.msrb.mxu1 %v3711_v34 }
  0xff   : > { %2787 = vmatmul.msk.f32.gmra.mxu3 %vm260_vm7, %v3667_v63 }
 0x100   : > { %2782 = vmatmul.msk.f32.gmra.mxu2 %vm260_vm7, %v3667_v63 }
 0x102   : > { %2772 = vmatmul.msk.f32.gmra.mxu0 %vm260_vm7, %v3667_v63 }
 0x103   : > { %2777 = vmatmul.msk.f32.gmra.mxu1 %vm260_vm7, %v3667_v63 }
 0x107   : > { %2804 = vmatmul.msk.f32.vlgmr.msrb.gmra.mxu3 %vm260_vm7, %v3592_v49 }
 0x108   : > { %2799 = vmatmul.msk.f32.vlgmr.msrb.gmra.mxu2 %vm260_vm7, %v3592_v49 }
 0x10a   : > { %2789 = vmatmul.msk.f32.vlgmr.msrb.gmra.mxu0 %vm260_vm7, %v3592_v49 }
 0x10b   : > { %2794 = vmatmul.msk.f32.vlgmr.msrb.gmra.mxu1 %vm260_vm7, %v3592_v49 }
 0x10f   : > { %2805 = vmatmul.msk.f32.gmra.mxu3 %vm260_vm7, %v3621_v55 }
 0x110   : > { %2800 = vmatmul.msk.f32.gmra.mxu2 %vm260_vm7, %v3621_v55 }
 0x112   : > { %2790 = vmatmul.msk.f32.gmra.mxu0 %vm260_vm7, %v3621_v55 }
 0x113   : > { %2795 = vmatmul.msk.f32.gmra.mxu1 %vm260_vm7, %v3621_v55 }
 0x117   : > { %2806 = vmatmul.msk.f32.gmra.mxu3 %vm260_vm7, %v3645_v61 }
 0x118   : > { %2801 = vmatmul.msk.f32.gmra.mxu2 %vm260_vm7, %v3645_v61 }
 0x11a   : > { %2791 = vmatmul.msk.f32.gmra.mxu0 %vm260_vm7, %v3645_v61 }
 0x11b   : > { %2796 = vmatmul.msk.f32.gmra.mxu1 %vm260_vm7, %v3645_v61 }
 0x11f   : > { %2807 = vmatmul.msk.f32.gmra.mxu3 %vm260_vm7, %v3667_v63 }
 0x120   : > { %2802 = vmatmul.msk.f32.gmra.mxu2 %vm260_vm7, %v3667_v63 }
 0x122   : > { %2792 = vmatmul.msk.f32.gmra.mxu0 %vm260_vm7, %v3667_v63 }
 0x123   : > { %2797 = vmatmul.msk.f32.gmra.mxu1 %vm260_vm7, %v3667_v63 }
 0x124   : > { %v596_v37 = vpop.f32.mrf.mxu2  ;;  %v3859_v15 = vpop.f32.mrf.mxu3 }
 0x125   : > { %v612_v49 = vrot.slane %v596_v37, 1  ;;  %668 = vst.msk [vmem:[%s3855_s30 + $0x2] sm:$0x1] %vm362_vm8, %v596_v37  ;;  %v613_v8 = vrot.slane %v596_v37, 2  ;;  %v614_v28 = vrot.slane %v596_v37, 3  ;;  %v615_v62 = vrot.slane %v596_v37, 4 }
 0x126   : > { %813 = vst.msk [vmem:[%s3855_s30 + $0x3] sm:$0x1] %vm362_vm8, %v3859_v15  ;;  %v616_v38 = vrot.slane %v596_v37, 5  ;;  %v617_v60 = vrot.slane %v596_v37, 6  ;;  %v618_v10 = vrot.slane %v596_v37, 7  ;;  %v757_v23 = vrot.slane %v3859_v15, 1 }
 0x127   : > { %v290_v55 = vpop.f32.mrf.mxu0  ;;  %669 = vst.msk [vmem:[%s3855_s30 + $0x12] sm:$0x1] %vm362_vm8, %v612_v49  ;;  %v758_v16 = vrot.slane %v3859_v15, 2  ;;  %v759_v21 = vrot.slane %v3859_v15, 3  ;;  %v760_v39 = vrot.slane %v3859_v15, 4  ;;  %v761_v43 = vrot.slane %v3859_v15, 5 }
 0x128   : > { %v306_v61 = vrot.slane %v290_v55, 1  ;;  %v307_v30 = vrot.slane %v290_v55, 2  ;;  %v308_v48 = vrot.slane %v290_v55, 3  ;;  %363 = vst.msk [vmem:[%s3855_s30] sm:$0x1] %vm362_vm8, %v290_v55  ;;  %v451_v59 = vpop.f32.mrf.mxu1  ;;  %v309_v34 = vrot.slane %v290_v55, 4 }
 0x129   : > { %523 = vst.msk [vmem:[%s3855_s30 + $0x1] sm:$0x1] %vm362_vm8, %v451_v59  ;;  %v310_v63 = vrot.slane %v290_v55, 5  ;;  %v311_v13 = vrot.slane %v290_v55, 6  ;;  %v312_v47 = vrot.slane %v290_v55, 7  ;;  %v467_v51 = vrot.slane %v451_v59, 1 }
 0x12a   : > { %364 = vst.msk [vmem:[%s3855_s30 + $0x10] sm:$0x1] %vm362_vm8, %v306_v61  ;;  %v468_v4 = vrot.slane %v451_v59, 2  ;;  %v469_v58 = vrot.slane %v451_v59, 3  ;;  %v470_v57 = vrot.slane %v451_v59, 4  ;;  %v471_v40 = vrot.slane %v451_v59, 5 }
 0x12b   : > { %365 = vst.msk [vmem:[%s3855_s30 + $0x20] sm:$0x1] %vm362_vm8, %v307_v30  ;;  %v472_v36 = vrot.slane %v451_v59, 6  ;;  %v473_v11 = vrot.slane %v451_v59, 7  ;;  %v762_v17 = vrot.slane %v3859_v15, 6  ;;  %v763_v26 = vrot.slane %v3859_v15, 7 }
 0x12c   : > { %366 = vst.msk [vmem:[%s3855_s30 + $0x30] sm:$0x1] %vm362_vm8, %v308_v48 }
 0x12d   : > { %367 = vst.msk [vmem:[%s3855_s30 + $0x40] sm:$0x1] %vm362_vm8, %v309_v34 }
 0x12e   : > { %368 = vst.msk [vmem:[%s3855_s30 + $0x50] sm:$0x1] %vm362_vm8, %v310_v63 }
 0x12f   : > { %369 = vst.msk [vmem:[%s3855_s30 + $0x60] sm:$0x1] %vm362_vm8, %v311_v13  ;;  %v293_v32 = vpop.f32.mrf.mxu0 }
 0x130   : > { %370 = vst.msk [vmem:[%s3855_s30 + $0x70] sm:$0x1] %vm362_vm8, %v312_v47  ;;  %v313_v41 = vrot.slane %v293_v32, 1  ;;  %v314_v31 = vrot.slane %v293_v32, 2  ;;  %v315_v20 = vrot.slane %v293_v32, 3  ;;  %v316_v12 = vrot.slane %v293_v32, 4  ;;  %v454_v56 = vpop.f32.mrf.mxu1  ;;  %v599_v1 = vpop.f32.mrf.mxu2 }
 0x131   : > { %524 = vst.msk [vmem:[%s3855_s30 + $0x11] sm:$0x1] %vm362_vm8, %v467_v51  ;;  %v317_v52 = vrot.slane %v293_v32, 5  ;;  %v318_v7 = vrot.slane %v293_v32, 6  ;;  %v319_v19 = vrot.slane %v293_v32, 7  ;;  %v474_v9 = vrot.slane %v454_v56, 1  ;;  %v744_v25 = vpop.f32.mrf.mxu3 }
 0x132   : > { %525 = vst.msk [vmem:[%s3855_s30 + $0x21] sm:$0x1] %vm362_vm8, %v468_v4  ;;  %v475_v22 = vrot.slane %v454_v56, 2  ;;  %v476_v2 = vrot.slane %v454_v56, 3  ;;  %v477_v29 = vrot.slane %v454_v56, 4  ;;  %v478_v33 = vrot.slane %v454_v56, 5 }
 0x133   : > { %526 = vst.msk [vmem:[%s3855_s30 + $0x31] sm:$0x1] %vm362_vm8, %v469_v58  ;;  %v479_v45 = vrot.slane %v454_v56, 6  ;;  %v480_v27 = vrot.slane %v454_v56, 7  ;;  %v619_v5 = vrot.slane %v599_v1, 1  ;;  %v620_v42 = vrot.slane %v599_v1, 2 }
 0x134   : > { %527 = vst.msk [vmem:[%s3855_s30 + $0x41] sm:$0x1] %vm362_vm8, %v470_v57  ;;  %v621_v6 = vrot.slane %v599_v1, 3  ;;  %v622_v54 = vrot.slane %v599_v1, 4  ;;  %v623_v50 = vrot.slane %v599_v1, 5  ;;  %v624_v24 = vrot.slane %v599_v1, 6 }
 0x135   : > { %528 = vst.msk [vmem:[%s3855_s30 + $0x51] sm:$0x1] %vm362_vm8, %v471_v40  ;;  %v625_v35 = vrot.slane %v599_v1, 7  ;;  %v764_v53 = vrot.slane %v744_v25, 1  ;;  %v765_v18 = vrot.slane %v744_v25, 2  ;;  %v766_v3 = vrot.slane %v744_v25, 3 }
 0x136   : > { %529 = vst.msk [vmem:[%s3855_s30 + $0x61] sm:$0x1] %vm362_vm8, %v472_v36  ;;  %v767_v44 = vrot.slane %v744_v25, 4  ;;  %v768_v0 = vrot.slane %v744_v25, 5  ;;  %v769_v46 = vrot.slane %v744_v25, 6  ;;  %v770_v37 = vrot.slane %v744_v25, 7 }
 0x137   : > { %530 = vst.msk [vmem:[%s3855_s30 + $0x71] sm:$0x1] %vm362_vm8, %v473_v11  ;;  %v296_v14 = vpop.f32.mrf.mxu0 }
 0x138   : > { %670 = vst.msk [vmem:[%s3855_s30 + $0x22] sm:$0x1] %vm362_vm8, %v613_v8  ;;  %v320_v15 = vrot.slane %v296_v14, 1  ;;  %v321_v49 = vrot.slane %v296_v14, 2  ;;  %v322_v55 = vrot.slane %v296_v14, 3  ;;  %v323_v61 = vrot.slane %v296_v14, 4  ;;  %v457_v59 = vpop.f32.mrf.mxu1  ;;  %v602_v57 = vpop.f32.mrf.mxu2 }
 0x139   : > { %671 = vst.msk [vmem:[%s3855_s30 + $0x32] sm:$0x1] %vm362_vm8, %v614_v28  ;;  %v324_v30 = vrot.slane %v296_v14, 5  ;;  %v325_v48 = vrot.slane %v296_v14, 6  ;;  %v326_v34 = vrot.slane %v296_v14, 7  ;;  %v481_v63 = vrot.slane %v457_v59, 1 }
 0x13a   : > { %672 = vst.msk [vmem:[%s3855_s30 + $0x42] sm:$0x1] %vm362_vm8, %v615_v62  ;;  %v482_v13 = vrot.slane %v457_v59, 2  ;;  %v483_v47 = vrot.slane %v457_v59, 3  ;;  %v484_v51 = vrot.slane %v457_v59, 4  ;;  %v485_v4 = vrot.slane %v457_v59, 5 }
 0x13b   : > { %673 = vst.msk [vmem:[%s3855_s30 + $0x52] sm:$0x1] %vm362_vm8, %v616_v38  ;;  %v486_v58 = vrot.slane %v457_v59, 6  ;;  %v487_v40 = vrot.slane %v457_v59, 7  ;;  %v626_v36 = vrot.slane %v602_v57, 1  ;;  %v627_v11 = vrot.slane %v602_v57, 2 }
 0x13c   : > { %674 = vst.msk [vmem:[%s3855_s30 + $0x62] sm:$0x1] %vm362_vm8, %v617_v60  ;;  %v628_v8 = vrot.slane %v602_v57, 3  ;;  %v629_v28 = vrot.slane %v602_v57, 4  ;;  %v630_v62 = vrot.slane %v602_v57, 5  ;;  %v631_v38 = vrot.slane %v602_v57, 6  ;;  %v747_v60 = vpop.f32.mrf.mxu3 }
 0x13d   : > { %675 = vst.msk [vmem:[%s3855_s30 + $0x72] sm:$0x1] %vm362_vm8, %v618_v10  ;;  %v632_v10 = vrot.slane %v602_v57, 7 }
 0x13e   : > { %814 = vst.msk [vmem:[%s3855_s30 + $0x13] sm:$0x1] %vm362_vm8, %v757_v23  ;;  %v771_v23 = vrot.slane %v747_v60, 1 }
 0x13f   : > { %815 = vst.msk [vmem:[%s3855_s30 + $0x23] sm:$0x1] %vm362_vm8, %v758_v16  ;;  %v772_v16 = vrot.slane %v747_v60, 2 }
 0x140   : > { %816 = vst.msk [vmem:[%s3855_s30 + $0x33] sm:$0x1] %vm362_vm8, %v759_v21  ;;  %v773_v21 = vrot.slane %v747_v60, 3 }
 0x141   : > { %817 = vst.msk [vmem:[%s3855_s30 + $0x43] sm:$0x1] %vm362_vm8, %v760_v39  ;;  %v774_v39 = vrot.slane %v747_v60, 4 }
 0x142   : > { %818 = vst.msk [vmem:[%s3855_s30 + $0x53] sm:$0x1] %vm362_vm8, %v761_v43  ;;  %v775_v43 = vrot.slane %v747_v60, 5 }
 0x143   : > { %819 = vst.msk [vmem:[%s3855_s30 + $0x63] sm:$0x1] %vm362_vm8, %v762_v17  ;;  %v776_v17 = vrot.slane %v747_v60, 6 }
 0x144   : > { %820 = vst.msk [vmem:[%s3855_s30 + $0x73] sm:$0x1] %vm362_vm8, %v763_v26  ;;  %v777_v26 = vrot.slane %v747_v60, 7 }
 0x145   : > { %371 = vst.msk [vmem:[%s3855_s30 + $0x80] sm:$0x1] %vm362_vm8, %v293_v32  ;;  %v299_v32 = vpop.f32.mrf.mxu0 }
 0x146   : > { %372 = vst.msk [vmem:[%s3855_s30 + $0x90] sm:$0x1] %vm362_vm8, %v313_v41  ;;  %v327_v41 = vrot.slane %v299_v32, 1 }
 0x147   : > { %373 = vst.msk [vmem:[%s3855_s30 + $0xa0] sm:$0x1] %vm362_vm8, %v314_v31  ;;  %v328_v31 = vrot.slane %v299_v32, 2 }
 0x148   : > { %374 = vst.msk [vmem:[%s3855_s30 + $0xb0] sm:$0x1] %vm362_vm8, %v315_v20  ;;  %v329_v20 = vrot.slane %v299_v32, 3 }
 0x149   : > { %375 = vst.msk [vmem:[%s3855_s30 + $0xc0] sm:$0x1] %vm362_vm8, %v316_v12  ;;  %v330_v12 = vrot.slane %v299_v32, 4 }
 0x14a   : > { %376 = vst.msk [vmem:[%s3855_s30 + $0xd0] sm:$0x1] %vm362_vm8, %v317_v52  ;;  %v331_v52 = vrot.slane %v299_v32, 5 }
 0x14b   : > { %377 = vst.msk [vmem:[%s3855_s30 + $0xe0] sm:$0x1] %vm362_vm8, %v318_v7  ;;  %v332_v7 = vrot.slane %v299_v32, 6 }
 0x14c   : > { %378 = vst.msk [vmem:[%s3855_s30 + $0xf0] sm:$0x1] %vm362_vm8, %v319_v19  ;;  %v333_v19 = vrot.slane %v299_v32, 7 }
 0x14d   : > { %531 = vst.msk [vmem:[%s3855_s30 + $0x81] sm:$0x1] %vm362_vm8, %v454_v56  ;;  %v460_v56 = vpop.f32.mrf.mxu1 }
 0x14e   : > { %532 = vst.msk [vmem:[%s3855_s30 + $0x91] sm:$0x1] %vm362_vm8, %v474_v9  ;;  %v488_v9 = vrot.slane %v460_v56, 1 }
 0x14f   : > { %533 = vst.msk [vmem:[%s3855_s30 + $0xa1] sm:$0x1] %vm362_vm8, %v475_v22  ;;  %v489_v22 = vrot.slane %v460_v56, 2 }
 0x150   : > { %534 = vst.msk [vmem:[%s3855_s30 + $0xb1] sm:$0x1] %vm362_vm8, %v476_v2  ;;  %v490_v2 = vrot.slane %v460_v56, 3 }
 0x151   : > { %535 = vst.msk [vmem:[%s3855_s30 + $0xc1] sm:$0x1] %vm362_vm8, %v477_v29  ;;  %v491_v29 = vrot.slane %v460_v56, 4 }
 0x152   : > { %536 = vst.msk [vmem:[%s3855_s30 + $0xd1] sm:$0x1] %vm362_vm8, %v478_v33  ;;  %v492_v33 = vrot.slane %v460_v56, 5 }
 0x153   : > { %537 = vst.msk [vmem:[%s3855_s30 + $0xe1] sm:$0x1] %vm362_vm8, %v479_v45  ;;  %v493_v45 = vrot.slane %v460_v56, 6 }
 0x154   : > { %538 = vst.msk [vmem:[%s3855_s30 + $0xf1] sm:$0x1] %vm362_vm8, %v480_v27  ;;  %v494_v27 = vrot.slane %v460_v56, 7 }
 0x155   : > { %676 = vst.msk [vmem:[%s3855_s30 + $0x82] sm:$0x1] %vm362_vm8, %v599_v1  ;;  %v605_v1 = vpop.f32.mrf.mxu2 }
 0x156   : > { %677 = vst.msk [vmem:[%s3855_s30 + $0x92] sm:$0x1] %vm362_vm8, %v619_v5  ;;  %v633_v5 = vrot.slane %v605_v1, 1 }
 0x157   : > { %678 = vst.msk [vmem:[%s3855_s30 + $0xa2] sm:$0x1] %vm362_vm8, %v620_v42  ;;  %v634_v42 = vrot.slane %v605_v1, 2 }
 0x158   : > { %679 = vst.msk [vmem:[%s3855_s30 + $0xb2] sm:$0x1] %vm362_vm8, %v621_v6  ;;  %v635_v6 = vrot.slane %v605_v1, 3 }
 0x159   : > { %680 = vst.msk [vmem:[%s3855_s30 + $0xc2] sm:$0x1] %vm362_vm8, %v622_v54  ;;  %v636_v54 = vrot.slane %v605_v1, 4 }
 0x15a   : > { %681 = vst.msk [vmem:[%s3855_s30 + $0xd2] sm:$0x1] %vm362_vm8, %v623_v50  ;;  %v637_v50 = vrot.slane %v605_v1, 5 }
 0x15b   : > { %682 = vst.msk [vmem:[%s3855_s30 + $0xe2] sm:$0x1] %vm362_vm8, %v624_v24  ;;  %v638_v24 = vrot.slane %v605_v1, 6 }
 0x15c   : > { %683 = vst.msk [vmem:[%s3855_s30 + $0xf2] sm:$0x1] %vm362_vm8, %v625_v35  ;;  %v639_v35 = vrot.slane %v605_v1, 7 }
 0x15d   : > { %821 = vst.msk [vmem:[%s3855_s30 + $0x83] sm:$0x1] %vm362_vm8, %v744_v25  ;;  %v750_v25 = vpop.f32.mrf.mxu3 }
 0x15e   : > { %822 = vst.msk [vmem:[%s3855_s30 + $0x93] sm:$0x1] %vm362_vm8, %v764_v53  ;;  %v778_v53 = vrot.slane %v750_v25, 1 }
 0x15f   : > { %823 = vst.msk [vmem:[%s3855_s30 + $0xa3] sm:$0x1] %vm362_vm8, %v765_v18  ;;  %v779_v18 = vrot.slane %v750_v25, 2 }
 0x160   : > { %824 = vst.msk [vmem:[%s3855_s30 + $0xb3] sm:$0x1] %vm362_vm8, %v766_v3  ;;  %v780_v3 = vrot.slane %v750_v25, 3 }
 0x161   : > { %825 = vst.msk [vmem:[%s3855_s30 + $0xc3] sm:$0x1] %vm362_vm8, %v767_v44  ;;  %v781_v44 = vrot.slane %v750_v25, 4 }
 0x162   : > { %826 = vst.msk [vmem:[%s3855_s30 + $0xd3] sm:$0x1] %vm362_vm8, %v768_v0  ;;  %v782_v0 = vrot.slane %v750_v25, 5 }
 0x163   : > { %827 = vst.msk [vmem:[%s3855_s30 + $0xe3] sm:$0x1] %vm362_vm8, %v769_v46  ;;  %v783_v46 = vrot.slane %v750_v25, 6 }
 0x164   : > { %828 = vst.msk [vmem:[%s3855_s30 + $0xf3] sm:$0x1] %vm362_vm8, %v770_v37  ;;  %v784_v37 = vrot.slane %v750_v25, 7 }
 0x165   : > { %379 = vst.msk [vmem:[%s3855_s30 + $0x100] sm:$0x1] %vm362_vm8, %v296_v14  ;;  %v886_v14 = vpop.f32.mrf.mxu0 }
 0x166   : > { %380 = vst.msk [vmem:[%s3855_s30 + $0x110] sm:$0x1] %vm362_vm8, %v320_v15  ;;  %v902_v15 = vrot.slane %v886_v14, 1 }
 0x167   : > { %381 = vst.msk [vmem:[%s3855_s30 + $0x120] sm:$0x1] %vm362_vm8, %v321_v49  ;;  %v903_v49 = vrot.slane %v886_v14, 2 }
 0x168   : > { %382 = vst.msk [vmem:[%s3855_s30 + $0x130] sm:$0x1] %vm362_vm8, %v322_v55  ;;  %v904_v55 = vrot.slane %v886_v14, 3 }
 0x169   : > { %383 = vst.msk [vmem:[%s3855_s30 + $0x140] sm:$0x1] %vm362_vm8, %v323_v61  ;;  %v905_v61 = vrot.slane %v886_v14, 4 }
 0x16a   : > { %384 = vst.msk [vmem:[%s3855_s30 + $0x150] sm:$0x1] %vm362_vm8, %v324_v30  ;;  %v906_v30 = vrot.slane %v886_v14, 5 }
 0x16b   : > { %385 = vst.msk [vmem:[%s3855_s30 + $0x160] sm:$0x1] %vm362_vm8, %v325_v48  ;;  %v907_v48 = vrot.slane %v886_v14, 6 }
 0x16c   : > { %386 = vst.msk [vmem:[%s3855_s30 + $0x170] sm:$0x1] %vm362_vm8, %v326_v34  ;;  %v908_v34 = vrot.slane %v886_v14, 7 }
 0x16d   : > { %539 = vst.msk [vmem:[%s3855_s30 + $0x101] sm:$0x1] %vm362_vm8, %v457_v59  ;;  %v1031_v59 = vpop.f32.mrf.mxu1 }
 0x16e   : > { %540 = vst.msk [vmem:[%s3855_s30 + $0x111] sm:$0x1] %vm362_vm8, %v481_v63  ;;  %v1047_v63 = vrot.slane %v1031_v59, 1 }
 0x16f   : > { %541 = vst.msk [vmem:[%s3855_s30 + $0x121] sm:$0x1] %vm362_vm8, %v482_v13  ;;  %v1048_v13 = vrot.slane %v1031_v59, 2 }
 0x170   : > { %542 = vst.msk [vmem:[%s3855_s30 + $0x131] sm:$0x1] %vm362_vm8, %v483_v47  ;;  %v1049_v47 = vrot.slane %v1031_v59, 3 }
 0x171   : > { %543 = vst.msk [vmem:[%s3855_s30 + $0x141] sm:$0x1] %vm362_vm8, %v484_v51  ;;  %v1050_v51 = vrot.slane %v1031_v59, 4 }
 0x172   : > { %544 = vst.msk [vmem:[%s3855_s30 + $0x151] sm:$0x1] %vm362_vm8, %v485_v4  ;;  %v1051_v4 = vrot.slane %v1031_v59, 5 }
 0x173   : > { %545 = vst.msk [vmem:[%s3855_s30 + $0x161] sm:$0x1] %vm362_vm8, %v486_v58  ;;  %v1052_v58 = vrot.slane %v1031_v59, 6 }
 0x174   : > { %546 = vst.msk [vmem:[%s3855_s30 + $0x171] sm:$0x1] %vm362_vm8, %v487_v40  ;;  %v1053_v40 = vrot.slane %v1031_v59, 7 }
 0x175   : > { %684 = vst.msk [vmem:[%s3855_s30 + $0x102] sm:$0x1] %vm362_vm8, %v602_v57  ;;  %v1187_v57 = vpop.f32.mrf.mxu2 }
 0x176   : > { %685 = vst.msk [vmem:[%s3855_s30 + $0x112] sm:$0x1] %vm362_vm8, %v626_v36  ;;  %v1203_v36 = vrot.slane %v1187_v57, 1 }
 0x177   : > { %686 = vst.msk [vmem:[%s3855_s30 + $0x122] sm:$0x1] %vm362_vm8, %v627_v11  ;;  %v1204_v11 = vrot.slane %v1187_v57, 2 }
 0x178   : > { %687 = vst.msk [vmem:[%s3855_s30 + $0x132] sm:$0x1] %vm362_vm8, %v628_v8  ;;  %v1205_v8 = vrot.slane %v1187_v57, 3 }
 0x179   : > { %688 = vst.msk [vmem:[%s3855_s30 + $0x142] sm:$0x1] %vm362_vm8, %v629_v28  ;;  %v1206_v28 = vrot.slane %v1187_v57, 4 }
 0x17a   : > { %689 = vst.msk [vmem:[%s3855_s30 + $0x152] sm:$0x1] %vm362_vm8, %v630_v62  ;;  %v1207_v62 = vrot.slane %v1187_v57, 5 }
 0x17b   : > { %690 = vst.msk [vmem:[%s3855_s30 + $0x162] sm:$0x1] %vm362_vm8, %v631_v38  ;;  %v1208_v38 = vrot.slane %v1187_v57, 6 }
 0x17c   : > { %691 = vst.msk [vmem:[%s3855_s30 + $0x172] sm:$0x1] %vm362_vm8, %v632_v10  ;;  %v1209_v10 = vrot.slane %v1187_v57, 7 }
 0x17d   : > { %829 = vst.msk [vmem:[%s3855_s30 + $0x103] sm:$0x1] %vm362_vm8, %v747_v60  ;;  %v1339_v60 = vpop.f32.mrf.mxu3 }
 0x17e   : > { %830 = vst.msk [vmem:[%s3855_s30 + $0x113] sm:$0x1] %vm362_vm8, %v771_v23  ;;  %v1355_v23 = vrot.slane %v1339_v60, 1 }
 0x17f   : > { %831 = vst.msk [vmem:[%s3855_s30 + $0x123] sm:$0x1] %vm362_vm8, %v772_v16  ;;  %v1356_v16 = vrot.slane %v1339_v60, 2 }
 0x180   : > { %832 = vst.msk [vmem:[%s3855_s30 + $0x133] sm:$0x1] %vm362_vm8, %v773_v21  ;;  %v1357_v21 = vrot.slane %v1339_v60, 3 }
 0x181   : > { %833 = vst.msk [vmem:[%s3855_s30 + $0x143] sm:$0x1] %vm362_vm8, %v774_v39  ;;  %v1358_v39 = vrot.slane %v1339_v60, 4 }
 0x182   : > { %834 = vst.msk [vmem:[%s3855_s30 + $0x153] sm:$0x1] %vm362_vm8, %v775_v43  ;;  %v1359_v43 = vrot.slane %v1339_v60, 5 }
 0x183   : > { %835 = vst.msk [vmem:[%s3855_s30 + $0x163] sm:$0x1] %vm362_vm8, %v776_v17  ;;  %v1360_v17 = vrot.slane %v1339_v60, 6 }
 0x184   : > { %836 = vst.msk [vmem:[%s3855_s30 + $0x173] sm:$0x1] %vm362_vm8, %v777_v26  ;;  %v1361_v26 = vrot.slane %v1339_v60, 7 }
 0x185   : > { %387 = vst.msk [vmem:[%s3855_s30 + $0x180] sm:$0x1] %vm362_vm8, %v299_v32  ;;  %v889_v32 = vpop.f32.mrf.mxu0 }
 0x186   : > { %388 = vst.msk [vmem:[%s3855_s30 + $0x190] sm:$0x1] %vm362_vm8, %v327_v41  ;;  %v909_v41 = vrot.slane %v889_v32, 1 }
 0x187   : > { %389 = vst.msk [vmem:[%s3855_s30 + $0x1a0] sm:$0x1] %vm362_vm8, %v328_v31  ;;  %v910_v31 = vrot.slane %v889_v32, 2 }
 0x188   : > { %390 = vst.msk [vmem:[%s3855_s30 + $0x1b0] sm:$0x1] %vm362_vm8, %v329_v20  ;;  %v911_v20 = vrot.slane %v889_v32, 3 }
 0x189   : > { %391 = vst.msk [vmem:[%s3855_s30 + $0x1c0] sm:$0x1] %vm362_vm8, %v330_v12  ;;  %v912_v12 = vrot.slane %v889_v32, 4 }
 0x18a   : > { %392 = vst.msk [vmem:[%s3855_s30 + $0x1d0] sm:$0x1] %vm362_vm8, %v331_v52  ;;  %v913_v52 = vrot.slane %v889_v32, 5 }
 0x18b   : > { %393 = vst.msk [vmem:[%s3855_s30 + $0x1e0] sm:$0x1] %vm362_vm8, %v332_v7  ;;  %v914_v7 = vrot.slane %v889_v32, 6 }
 0x18c   : > { %394 = vst.msk [vmem:[%s3855_s30 + $0x1f0] sm:$0x1] %vm362_vm8, %v333_v19  ;;  %v915_v19 = vrot.slane %v889_v32, 7 }
 0x18d   : > { %547 = vst.msk [vmem:[%s3855_s30 + $0x181] sm:$0x1] %vm362_vm8, %v460_v56  ;;  %v1034_v56 = vpop.f32.mrf.mxu1 }
 0x18e   : > { %548 = vst.msk [vmem:[%s3855_s30 + $0x191] sm:$0x1] %vm362_vm8, %v488_v9  ;;  %v1054_v9 = vrot.slane %v1034_v56, 1 }
 0x18f   : > { %549 = vst.msk [vmem:[%s3855_s30 + $0x1a1] sm:$0x1] %vm362_vm8, %v489_v22  ;;  %v1055_v22 = vrot.slane %v1034_v56, 2 }
 0x190   : > { %550 = vst.msk [vmem:[%s3855_s30 + $0x1b1] sm:$0x1] %vm362_vm8, %v490_v2  ;;  %v1056_v2 = vrot.slane %v1034_v56, 3 }
 0x191   : > { %551 = vst.msk [vmem:[%s3855_s30 + $0x1c1] sm:$0x1] %vm362_vm8, %v491_v29  ;;  %v1057_v29 = vrot.slane %v1034_v56, 4 }
 0x192   : > { %552 = vst.msk [vmem:[%s3855_s30 + $0x1d1] sm:$0x1] %vm362_vm8, %v492_v33  ;;  %v1058_v33 = vrot.slane %v1034_v56, 5 }
 0x193   : > { %553 = vst.msk [vmem:[%s3855_s30 + $0x1e1] sm:$0x1] %vm362_vm8, %v493_v45  ;;  %v1059_v45 = vrot.slane %v1034_v56, 6 }
 0x194   : > { %554 = vst.msk [vmem:[%s3855_s30 + $0x1f1] sm:$0x1] %vm362_vm8, %v494_v27  ;;  %v1060_v27 = vrot.slane %v1034_v56, 7 }
 0x195   : > { %692 = vst.msk [vmem:[%s3855_s30 + $0x182] sm:$0x1] %vm362_vm8, %v605_v1  ;;  %v1190_v1 = vpop.f32.mrf.mxu2 }
 0x196   : > { %693 = vst.msk [vmem:[%s3855_s30 + $0x192] sm:$0x1] %vm362_vm8, %v633_v5  ;;  %v1210_v5 = vrot.slane %v1190_v1, 1 }
 0x197   : > { %694 = vst.msk [vmem:[%s3855_s30 + $0x1a2] sm:$0x1] %vm362_vm8, %v634_v42  ;;  %v1211_v42 = vrot.slane %v1190_v1, 2 }
 0x198   : > { %695 = vst.msk [vmem:[%s3855_s30 + $0x1b2] sm:$0x1] %vm362_vm8, %v635_v6  ;;  %v1212_v6 = vrot.slane %v1190_v1, 3 }
 0x199   : > { %696 = vst.msk [vmem:[%s3855_s30 + $0x1c2] sm:$0x1] %vm362_vm8, %v636_v54  ;;  %v1213_v54 = vrot.slane %v1190_v1, 4 }
 0x19a   : > { %697 = vst.msk [vmem:[%s3855_s30 + $0x1d2] sm:$0x1] %vm362_vm8, %v637_v50  ;;  %v1214_v50 = vrot.slane %v1190_v1, 5 }
 0x19b   : > { %698 = vst.msk [vmem:[%s3855_s30 + $0x1e2] sm:$0x1] %vm362_vm8, %v638_v24  ;;  %v1215_v24 = vrot.slane %v1190_v1, 6 }
 0x19c   : > { %699 = vst.msk [vmem:[%s3855_s30 + $0x1f2] sm:$0x1] %vm362_vm8, %v639_v35  ;;  %v1216_v35 = vrot.slane %v1190_v1, 7 }
 0x19d   : > { %837 = vst.msk [vmem:[%s3855_s30 + $0x183] sm:$0x1] %vm362_vm8, %v750_v25  ;;  %v1342_v25 = vpop.f32.mrf.mxu3 }
 0x19e   : > { %838 = vst.msk [vmem:[%s3855_s30 + $0x193] sm:$0x1] %vm362_vm8, %v778_v53  ;;  %v1362_v53 = vrot.slane %v1342_v25, 1 }
 0x19f   : > { %839 = vst.msk [vmem:[%s3855_s30 + $0x1a3] sm:$0x1] %vm362_vm8, %v779_v18  ;;  %v1363_v18 = vrot.slane %v1342_v25, 2 }
 0x1a0   : > { %840 = vst.msk [vmem:[%s3855_s30 + $0x1b3] sm:$0x1] %vm362_vm8, %v780_v3  ;;  %v1364_v3 = vrot.slane %v1342_v25, 3 }
 0x1a1   : > { %841 = vst.msk [vmem:[%s3855_s30 + $0x1c3] sm:$0x1] %vm362_vm8, %v781_v44  ;;  %v1365_v44 = vrot.slane %v1342_v25, 4 }
 0x1a2   : > { %842 = vst.msk [vmem:[%s3855_s30 + $0x1d3] sm:$0x1] %vm362_vm8, %v782_v0  ;;  %v1366_v0 = vrot.slane %v1342_v25, 5 }
 0x1a3   : > { %843 = vst.msk [vmem:[%s3855_s30 + $0x1e3] sm:$0x1] %vm362_vm8, %v783_v46  ;;  %v1367_v46 = vrot.slane %v1342_v25, 6 }
 0x1a4   : > { %844 = vst.msk [vmem:[%s3855_s30 + $0x1f3] sm:$0x1] %vm362_vm8, %v784_v37  ;;  %v1368_v37 = vrot.slane %v1342_v25, 7 }
 0x1a5   : > { %958 = vst.msk [vmem:[%s3855_s30 + $0x4] sm:$0x1] %vm362_vm8, %v886_v14  ;;  %v892_v14 = vpop.f32.mrf.mxu0 }
 0x1a6   : > { %959 = vst.msk [vmem:[%s3855_s30 + $0x14] sm:$0x1] %vm362_vm8, %v902_v15  ;;  %v916_v15 = vrot.slane %v892_v14, 1 }
 0x1a7   : > { %960 = vst.msk [vmem:[%s3855_s30 + $0x24] sm:$0x1] %vm362_vm8, %v903_v49  ;;  %v917_v49 = vrot.slane %v892_v14, 2 }
 0x1a8   : > { %961 = vst.msk [vmem:[%s3855_s30 + $0x34] sm:$0x1] %vm362_vm8, %v904_v55  ;;  %v918_v55 = vrot.slane %v892_v14, 3 }
 0x1a9   : > { %962 = vst.msk [vmem:[%s3855_s30 + $0x44] sm:$0x1] %vm362_vm8, %v905_v61  ;;  %v919_v61 = vrot.slane %v892_v14, 4 }
 0x1aa   : > { %963 = vst.msk [vmem:[%s3855_s30 + $0x54] sm:$0x1] %vm362_vm8, %v906_v30  ;;  %v920_v30 = vrot.slane %v892_v14, 5 }
 0x1ab   : > { %964 = vst.msk [vmem:[%s3855_s30 + $0x64] sm:$0x1] %vm362_vm8, %v907_v48  ;;  %v921_v48 = vrot.slane %v892_v14, 6 }
 0x1ac   : > { %965 = vst.msk [vmem:[%s3855_s30 + $0x74] sm:$0x1] %vm362_vm8, %v908_v34  ;;  %v922_v34 = vrot.slane %v892_v14, 7 }
 0x1ad   : > { %1103 = vst.msk [vmem:[%s3855_s30 + $0x5] sm:$0x1] %vm362_vm8, %v1031_v59  ;;  %v1037_v59 = vpop.f32.mrf.mxu1 }
 0x1ae   : > { %1104 = vst.msk [vmem:[%s3855_s30 + $0x15] sm:$0x1] %vm362_vm8, %v1047_v63  ;;  %v1061_v63 = vrot.slane %v1037_v59, 1 }
 0x1af   : > { %1105 = vst.msk [vmem:[%s3855_s30 + $0x25] sm:$0x1] %vm362_vm8, %v1048_v13  ;;  %v1062_v13 = vrot.slane %v1037_v59, 2 }
 0x1b0   : > { %1106 = vst.msk [vmem:[%s3855_s30 + $0x35] sm:$0x1] %vm362_vm8, %v1049_v47  ;;  %v1063_v47 = vrot.slane %v1037_v59, 3 }
 0x1b1   : > { %1107 = vst.msk [vmem:[%s3855_s30 + $0x45] sm:$0x1] %vm362_vm8, %v1050_v51  ;;  %v1064_v51 = vrot.slane %v1037_v59, 4 }
 0x1b2   : > { %1108 = vst.msk [vmem:[%s3855_s30 + $0x55] sm:$0x1] %vm362_vm8, %v1051_v4  ;;  %v1065_v4 = vrot.slane %v1037_v59, 5 }
 0x1b3   : > { %1109 = vst.msk [vmem:[%s3855_s30 + $0x65] sm:$0x1] %vm362_vm8, %v1052_v58  ;;  %v1066_v58 = vrot.slane %v1037_v59, 6 }
 0x1b4   : > { %1110 = vst.msk [vmem:[%s3855_s30 + $0x75] sm:$0x1] %vm362_vm8, %v1053_v40  ;;  %v1067_v40 = vrot.slane %v1037_v59, 7 }
 0x1b5   : > { %1259 = vst.msk [vmem:[%s3855_s30 + $0x6] sm:$0x1] %vm362_vm8, %v1187_v57  ;;  %v1193_v57 = vpop.f32.mrf.mxu2 }
 0x1b6   : > { %1260 = vst.msk [vmem:[%s3855_s30 + $0x16] sm:$0x1] %vm362_vm8, %v1203_v36  ;;  %v1217_v36 = vrot.slane %v1193_v57, 1 }
 0x1b7   : > { %1261 = vst.msk [vmem:[%s3855_s30 + $0x26] sm:$0x1] %vm362_vm8, %v1204_v11  ;;  %v1218_v11 = vrot.slane %v1193_v57, 2 }
 0x1b8   : > { %1262 = vst.msk [vmem:[%s3855_s30 + $0x36] sm:$0x1] %vm362_vm8, %v1205_v8  ;;  %v1219_v8 = vrot.slane %v1193_v57, 3 }
 0x1b9   : > { %1263 = vst.msk [vmem:[%s3855_s30 + $0x46] sm:$0x1] %vm362_vm8, %v1206_v28  ;;  %v1220_v28 = vrot.slane %v1193_v57, 4 }
 0x1ba   : > { %1264 = vst.msk [vmem:[%s3855_s30 + $0x56] sm:$0x1] %vm362_vm8, %v1207_v62  ;;  %v1221_v62 = vrot.slane %v1193_v57, 5 }
 0x1bb   : > { %1265 = vst.msk [vmem:[%s3855_s30 + $0x66] sm:$0x1] %vm362_vm8, %v1208_v38  ;;  %v1222_v38 = vrot.slane %v1193_v57, 6 }
 0x1bc   : > { %1266 = vst.msk [vmem:[%s3855_s30 + $0x76] sm:$0x1] %vm362_vm8, %v1209_v10  ;;  %v1223_v10 = vrot.slane %v1193_v57, 7 }
 0x1bd   : > { %1411 = vst.msk [vmem:[%s3855_s30 + $0x7] sm:$0x1] %vm362_vm8, %v1339_v60  ;;  %v1345_v60 = vpop.f32.mrf.mxu3 }
 0x1be   : > { %1412 = vst.msk [vmem:[%s3855_s30 + $0x17] sm:$0x1] %vm362_vm8, %v1355_v23  ;;  %v1369_v23 = vrot.slane %v1345_v60, 1 }
 0x1bf   : > { %1413 = vst.msk [vmem:[%s3855_s30 + $0x27] sm:$0x1] %vm362_vm8, %v1356_v16  ;;  %v1370_v16 = vrot.slane %v1345_v60, 2 }
 0x1c0   : > { %1414 = vst.msk [vmem:[%s3855_s30 + $0x37] sm:$0x1] %vm362_vm8, %v1357_v21  ;;  %v1371_v21 = vrot.slane %v1345_v60, 3 }
 0x1c1   : > { %1415 = vst.msk [vmem:[%s3855_s30 + $0x47] sm:$0x1] %vm362_vm8, %v1358_v39  ;;  %v1372_v39 = vrot.slane %v1345_v60, 4 }
 0x1c2   : > { %1416 = vst.msk [vmem:[%s3855_s30 + $0x57] sm:$0x1] %vm362_vm8, %v1359_v43  ;;  %v1373_v43 = vrot.slane %v1345_v60, 5 }
 0x1c3   : > { %1417 = vst.msk [vmem:[%s3855_s30 + $0x67] sm:$0x1] %vm362_vm8, %v1360_v17  ;;  %v1374_v17 = vrot.slane %v1345_v60, 6 }
 0x1c4   : > { %1418 = vst.msk [vmem:[%s3855_s30 + $0x77] sm:$0x1] %vm362_vm8, %v1361_v26  ;;  %v1375_v26 = vrot.slane %v1345_v60, 7 }
 0x1c5   : > { %966 = vst.msk [vmem:[%s3855_s30 + $0x84] sm:$0x1] %vm362_vm8, %v889_v32  ;;  %v895_v32 = vpop.f32.mrf.mxu0 }
 0x1c6   : > { %967 = vst.msk [vmem:[%s3855_s30 + $0x94] sm:$0x1] %vm362_vm8, %v909_v41  ;;  %v923_v41 = vrot.slane %v895_v32, 1 }
 0x1c7   : > { %968 = vst.msk [vmem:[%s3855_s30 + $0xa4] sm:$0x1] %vm362_vm8, %v910_v31  ;;  %v924_v31 = vrot.slane %v895_v32, 2 }
 0x1c8   : > { %969 = vst.msk [vmem:[%s3855_s30 + $0xb4] sm:$0x1] %vm362_vm8, %v911_v20  ;;  %v925_v20 = vrot.slane %v895_v32, 3 }
 0x1c9   : > { %970 = vst.msk [vmem:[%s3855_s30 + $0xc4] sm:$0x1] %vm362_vm8, %v912_v12  ;;  %v926_v12 = vrot.slane %v895_v32, 4 }
 0x1ca   : > { %971 = vst.msk [vmem:[%s3855_s30 + $0xd4] sm:$0x1] %vm362_vm8, %v913_v52  ;;  %v927_v52 = vrot.slane %v895_v32, 5 }
 0x1cb   : > { %972 = vst.msk [vmem:[%s3855_s30 + $0xe4] sm:$0x1] %vm362_vm8, %v914_v7  ;;  %v928_v7 = vrot.slane %v895_v32, 6 }
 0x1cc   : > { %973 = vst.msk [vmem:[%s3855_s30 + $0xf4] sm:$0x1] %vm362_vm8, %v915_v19  ;;  %v929_v19 = vrot.slane %v895_v32, 7 }
 0x1cd   : > { %1111 = vst.msk [vmem:[%s3855_s30 + $0x85] sm:$0x1] %vm362_vm8, %v1034_v56  ;;  %v1040_v56 = vpop.f32.mrf.mxu1 }
 0x1ce   : > { %1112 = vst.msk [vmem:[%s3855_s30 + $0x95] sm:$0x1] %vm362_vm8, %v1054_v9  ;;  %v1068_v9 = vrot.slane %v1040_v56, 1 }
 0x1cf   : > { %1113 = vst.msk [vmem:[%s3855_s30 + $0xa5] sm:$0x1] %vm362_vm8, %v1055_v22  ;;  %v1069_v22 = vrot.slane %v1040_v56, 2 }
 0x1d0   : > { %1114 = vst.msk [vmem:[%s3855_s30 + $0xb5] sm:$0x1] %vm362_vm8, %v1056_v2  ;;  %v1070_v2 = vrot.slane %v1040_v56, 3 }
 0x1d1   : > { %1115 = vst.msk [vmem:[%s3855_s30 + $0xc5] sm:$0x1] %vm362_vm8, %v1057_v29  ;;  %v1071_v29 = vrot.slane %v1040_v56, 4 }
 0x1d2   : > { %1116 = vst.msk [vmem:[%s3855_s30 + $0xd5] sm:$0x1] %vm362_vm8, %v1058_v33  ;;  %v1072_v33 = vrot.slane %v1040_v56, 5 }
 0x1d3   : > { %1117 = vst.msk [vmem:[%s3855_s30 + $0xe5] sm:$0x1] %vm362_vm8, %v1059_v45  ;;  %v1073_v45 = vrot.slane %v1040_v56, 6 }
 0x1d4   : > { %1118 = vst.msk [vmem:[%s3855_s30 + $0xf5] sm:$0x1] %vm362_vm8, %v1060_v27  ;;  %v1074_v27 = vrot.slane %v1040_v56, 7 }
 0x1d5   : > { %1267 = vst.msk [vmem:[%s3855_s30 + $0x86] sm:$0x1] %vm362_vm8, %v1190_v1  ;;  %v1196_v1 = vpop.f32.mrf.mxu2 }
 0x1d6   : > { %1268 = vst.msk [vmem:[%s3855_s30 + $0x96] sm:$0x1] %vm362_vm8, %v1210_v5  ;;  %v1224_v5 = vrot.slane %v1196_v1, 1 }
 0x1d7   : > { %1269 = vst.msk [vmem:[%s3855_s30 + $0xa6] sm:$0x1] %vm362_vm8, %v1211_v42  ;;  %v1225_v42 = vrot.slane %v1196_v1, 2 }
 0x1d8   : > { %1270 = vst.msk [vmem:[%s3855_s30 + $0xb6] sm:$0x1] %vm362_vm8, %v1212_v6  ;;  %v1226_v6 = vrot.slane %v1196_v1, 3 }
 0x1d9   : > { %1271 = vst.msk [vmem:[%s3855_s30 + $0xc6] sm:$0x1] %vm362_vm8, %v1213_v54  ;;  %v1227_v54 = vrot.slane %v1196_v1, 4 }
 0x1da   : > { %1272 = vst.msk [vmem:[%s3855_s30 + $0xd6] sm:$0x1] %vm362_vm8, %v1214_v50  ;;  %v1228_v50 = vrot.slane %v1196_v1, 5 }
 0x1db   : > { %1273 = vst.msk [vmem:[%s3855_s30 + $0xe6] sm:$0x1] %vm362_vm8, %v1215_v24  ;;  %v1229_v24 = vrot.slane %v1196_v1, 6 }
 0x1dc   : > { %1274 = vst.msk [vmem:[%s3855_s30 + $0xf6] sm:$0x1] %vm362_vm8, %v1216_v35  ;;  %v1230_v35 = vrot.slane %v1196_v1, 7 }
 0x1dd   : > { %1419 = vst.msk [vmem:[%s3855_s30 + $0x87] sm:$0x1] %vm362_vm8, %v1342_v25  ;;  %v1348_v25 = vpop.f32.mrf.mxu3 }
 0x1de   : > { %1420 = vst.msk [vmem:[%s3855_s30 + $0x97] sm:$0x1] %vm362_vm8, %v1362_v53  ;;  %v1376_v53 = vrot.slane %v1348_v25, 1 }
 0x1df   : > { %1421 = vst.msk [vmem:[%s3855_s30 + $0xa7] sm:$0x1] %vm362_vm8, %v1363_v18  ;;  %v1377_v18 = vrot.slane %v1348_v25, 2 }
 0x1e0   : > { %1422 = vst.msk [vmem:[%s3855_s30 + $0xb7] sm:$0x1] %vm362_vm8, %v1364_v3  ;;  %v1378_v3 = vrot.slane %v1348_v25, 3 }
 0x1e1   : > { %1423 = vst.msk [vmem:[%s3855_s30 + $0xc7] sm:$0x1] %vm362_vm8, %v1365_v44  ;;  %v1379_v44 = vrot.slane %v1348_v25, 4 }
 0x1e2   : > { %1424 = vst.msk [vmem:[%s3855_s30 + $0xd7] sm:$0x1] %vm362_vm8, %v1366_v0  ;;  %v1380_v0 = vrot.slane %v1348_v25, 5 }
 0x1e3   : > { %1425 = vst.msk [vmem:[%s3855_s30 + $0xe7] sm:$0x1] %vm362_vm8, %v1367_v46  ;;  %v1381_v46 = vrot.slane %v1348_v25, 6 }
 0x1e4   : > { %1426 = vst.msk [vmem:[%s3855_s30 + $0xf7] sm:$0x1] %vm362_vm8, %v1368_v37  ;;  %v1382_v37 = vrot.slane %v1348_v25, 7 }
 0x1e5   : > { %974 = vst.msk [vmem:[%s3855_s30 + $0x104] sm:$0x1] %vm362_vm8, %v892_v14  ;;  %v1491_v14 = vpop.f32.mrf.mxu0 }
 0x1e6   : > { %975 = vst.msk [vmem:[%s3855_s30 + $0x114] sm:$0x1] %vm362_vm8, %v916_v15  ;;  %v1507_v15 = vrot.slane %v1491_v14, 1 }
 0x1e7   : > { %976 = vst.msk [vmem:[%s3855_s30 + $0x124] sm:$0x1] %vm362_vm8, %v917_v49  ;;  %v1508_v49 = vrot.slane %v1491_v14, 2 }
 0x1e8   : > { %977 = vst.msk [vmem:[%s3855_s30 + $0x134] sm:$0x1] %vm362_vm8, %v918_v55  ;;  %v1509_v55 = vrot.slane %v1491_v14, 3 }
 0x1e9   : > { %978 = vst.msk [vmem:[%s3855_s30 + $0x144] sm:$0x1] %vm362_vm8, %v919_v61  ;;  %v1510_v61 = vrot.slane %v1491_v14, 4 }
 0x1ea   : > { %979 = vst.msk [vmem:[%s3855_s30 + $0x154] sm:$0x1] %vm362_vm8, %v920_v30  ;;  %v1511_v30 = vrot.slane %v1491_v14, 5 }
 0x1eb   : > { %980 = vst.msk [vmem:[%s3855_s30 + $0x164] sm:$0x1] %vm362_vm8, %v921_v48  ;;  %v1512_v48 = vrot.slane %v1491_v14, 6 }
 0x1ec   : > { %981 = vst.msk [vmem:[%s3855_s30 + $0x174] sm:$0x1] %vm362_vm8, %v922_v34  ;;  %v1513_v34 = vrot.slane %v1491_v14, 7 }
 0x1ed   : > { %1119 = vst.msk [vmem:[%s3855_s30 + $0x105] sm:$0x1] %vm362_vm8, %v1037_v59  ;;  %v1643_v59 = vpop.f32.mrf.mxu1 }
 0x1ee   : > { %1120 = vst.msk [vmem:[%s3855_s30 + $0x115] sm:$0x1] %vm362_vm8, %v1061_v63  ;;  %v1659_v63 = vrot.slane %v1643_v59, 1 }
 0x1ef   : > { %1121 = vst.msk [vmem:[%s3855_s30 + $0x125] sm:$0x1] %vm362_vm8, %v1062_v13  ;;  %v1660_v13 = vrot.slane %v1643_v59, 2 }
 0x1f0   : > { %1122 = vst.msk [vmem:[%s3855_s30 + $0x135] sm:$0x1] %vm362_vm8, %v1063_v47  ;;  %v1661_v47 = vrot.slane %v1643_v59, 3 }
 0x1f1   : > { %1123 = vst.msk [vmem:[%s3855_s30 + $0x145] sm:$0x1] %vm362_vm8, %v1064_v51  ;;  %v1662_v51 = vrot.slane %v1643_v59, 4 }
 0x1f2   : > { %1124 = vst.msk [vmem:[%s3855_s30 + $0x155] sm:$0x1] %vm362_vm8, %v1065_v4  ;;  %v1663_v4 = vrot.slane %v1643_v59, 5 }
 0x1f3   : > { %1125 = vst.msk [vmem:[%s3855_s30 + $0x165] sm:$0x1] %vm362_vm8, %v1066_v58  ;;  %v1664_v58 = vrot.slane %v1643_v59, 6 }
 0x1f4   : > { %1126 = vst.msk [vmem:[%s3855_s30 + $0x175] sm:$0x1] %vm362_vm8, %v1067_v40  ;;  %v1665_v40 = vrot.slane %v1643_v59, 7 }
 0x1f5   : > { %1275 = vst.msk [vmem:[%s3855_s30 + $0x106] sm:$0x1] %vm362_vm8, %v1193_v57  ;;  %v1788_v57 = vpop.f32.mrf.mxu2 }
 0x1f6   : > { %1276 = vst.msk [vmem:[%s3855_s30 + $0x116] sm:$0x1] %vm362_vm8, %v1217_v36  ;;  %v1804_v36 = vrot.slane %v1788_v57, 1 }
 0x1f7   : > { %1277 = vst.msk [vmem:[%s3855_s30 + $0x126] sm:$0x1] %vm362_vm8, %v1218_v11  ;;  %v1805_v11 = vrot.slane %v1788_v57, 2 }
 0x1f8   : > { %1278 = vst.msk [vmem:[%s3855_s30 + $0x136] sm:$0x1] %vm362_vm8, %v1219_v8  ;;  %v1806_v8 = vrot.slane %v1788_v57, 3 }
 0x1f9   : > { %1279 = vst.msk [vmem:[%s3855_s30 + $0x146] sm:$0x1] %vm362_vm8, %v1220_v28  ;;  %v1807_v28 = vrot.slane %v1788_v57, 4 }
 0x1fa   : > { %1280 = vst.msk [vmem:[%s3855_s30 + $0x156] sm:$0x1] %vm362_vm8, %v1221_v62  ;;  %v1808_v62 = vrot.slane %v1788_v57, 5 }
 0x1fb   : > { %1281 = vst.msk [vmem:[%s3855_s30 + $0x166] sm:$0x1] %vm362_vm8, %v1222_v38  ;;  %v1809_v38 = vrot.slane %v1788_v57, 6 }
 0x1fc   : > { %1282 = vst.msk [vmem:[%s3855_s30 + $0x176] sm:$0x1] %vm362_vm8, %v1223_v10  ;;  %v1810_v10 = vrot.slane %v1788_v57, 7 }
 0x1fd   : > { %1427 = vst.msk [vmem:[%s3855_s30 + $0x107] sm:$0x1] %vm362_vm8, %v1345_v60  ;;  %v1933_v60 = vpop.f32.mrf.mxu3 }
 0x1fe   : > { %1428 = vst.msk [vmem:[%s3855_s30 + $0x117] sm:$0x1] %vm362_vm8, %v1369_v23  ;;  %v1949_v23 = vrot.slane %v1933_v60, 1 }
 0x1ff   : > { %1429 = vst.msk [vmem:[%s3855_s30 + $0x127] sm:$0x1] %vm362_vm8, %v1370_v16  ;;  %v1950_v16 = vrot.slane %v1933_v60, 2 }
 0x200   : > { %1430 = vst.msk [vmem:[%s3855_s30 + $0x137] sm:$0x1] %vm362_vm8, %v1371_v21  ;;  %v1951_v21 = vrot.slane %v1933_v60, 3 }
 0x201   : > { %1431 = vst.msk [vmem:[%s3855_s30 + $0x147] sm:$0x1] %vm362_vm8, %v1372_v39  ;;  %v1952_v39 = vrot.slane %v1933_v60, 4 }
 0x202   : > { %1432 = vst.msk [vmem:[%s3855_s30 + $0x157] sm:$0x1] %vm362_vm8, %v1373_v43  ;;  %v1953_v43 = vrot.slane %v1933_v60, 5 }
 0x203   : > { %1433 = vst.msk [vmem:[%s3855_s30 + $0x167] sm:$0x1] %vm362_vm8, %v1374_v17  ;;  %v1954_v17 = vrot.slane %v1933_v60, 6 }
 0x204   : > { %1434 = vst.msk [vmem:[%s3855_s30 + $0x177] sm:$0x1] %vm362_vm8, %v1375_v26  ;;  %v1955_v26 = vrot.slane %v1933_v60, 7 }
 0x205   : > { %982 = vst.msk [vmem:[%s3855_s30 + $0x184] sm:$0x1] %vm362_vm8, %v895_v32  ;;  %v1494_v32 = vpop.f32.mrf.mxu0 }
 0x206   : > { %983 = vst.msk [vmem:[%s3855_s30 + $0x194] sm:$0x1] %vm362_vm8, %v923_v41  ;;  %v1514_v41 = vrot.slane %v1494_v32, 1 }
 0x207   : > { %984 = vst.msk [vmem:[%s3855_s30 + $0x1a4] sm:$0x1] %vm362_vm8, %v924_v31  ;;  %v1515_v31 = vrot.slane %v1494_v32, 2 }
 0x208   : > { %985 = vst.msk [vmem:[%s3855_s30 + $0x1b4] sm:$0x1] %vm362_vm8, %v925_v20  ;;  %v1516_v20 = vrot.slane %v1494_v32, 3 }
 0x209   : > { %986 = vst.msk [vmem:[%s3855_s30 + $0x1c4] sm:$0x1] %vm362_vm8, %v926_v12  ;;  %v1517_v12 = vrot.slane %v1494_v32, 4 }
 0x20a   : > { %987 = vst.msk [vmem:[%s3855_s30 + $0x1d4] sm:$0x1] %vm362_vm8, %v927_v52  ;;  %v1518_v52 = vrot.slane %v1494_v32, 5 }
 0x20b   : > { %988 = vst.msk [vmem:[%s3855_s30 + $0x1e4] sm:$0x1] %vm362_vm8, %v928_v7  ;;  %v1519_v7 = vrot.slane %v1494_v32, 6 }
 0x20c   : > { %989 = vst.msk [vmem:[%s3855_s30 + $0x1f4] sm:$0x1] %vm362_vm8, %v929_v19  ;;  %v1520_v19 = vrot.slane %v1494_v32, 7 }
 0x20d   : > { %1127 = vst.msk [vmem:[%s3855_s30 + $0x185] sm:$0x1] %vm362_vm8, %v1040_v56  ;;  %v1646_v56 = vpop.f32.mrf.mxu1 }
 0x20e   : > { %1128 = vst.msk [vmem:[%s3855_s30 + $0x195] sm:$0x1] %vm362_vm8, %v1068_v9  ;;  %v1666_v9 = vrot.slane %v1646_v56, 1 }
 0x20f   : > { %1129 = vst.msk [vmem:[%s3855_s30 + $0x1a5] sm:$0x1] %vm362_vm8, %v1069_v22  ;;  %v1667_v22 = vrot.slane %v1646_v56, 2 }
 0x210   : > { %1130 = vst.msk [vmem:[%s3855_s30 + $0x1b5] sm:$0x1] %vm362_vm8, %v1070_v2  ;;  %v1668_v2 = vrot.slane %v1646_v56, 3 }
 0x211   : > { %1131 = vst.msk [vmem:[%s3855_s30 + $0x1c5] sm:$0x1] %vm362_vm8, %v1071_v29  ;;  %v1669_v29 = vrot.slane %v1646_v56, 4 }
 0x212   : > { %1132 = vst.msk [vmem:[%s3855_s30 + $0x1d5] sm:$0x1] %vm362_vm8, %v1072_v33  ;;  %v1670_v33 = vrot.slane %v1646_v56, 5 }
 0x213   : > { %1133 = vst.msk [vmem:[%s3855_s30 + $0x1e5] sm:$0x1] %vm362_vm8, %v1073_v45  ;;  %v1671_v45 = vrot.slane %v1646_v56, 6 }
 0x214   : > { %1134 = vst.msk [vmem:[%s3855_s30 + $0x1f5] sm:$0x1] %vm362_vm8, %v1074_v27  ;;  %v1672_v27 = vrot.slane %v1646_v56, 7 }
 0x215   : > { %1283 = vst.msk [vmem:[%s3855_s30 + $0x186] sm:$0x1] %vm362_vm8, %v1196_v1  ;;  %v1791_v1 = vpop.f32.mrf.mxu2 }
 0x216   : > { %1284 = vst.msk [vmem:[%s3855_s30 + $0x196] sm:$0x1] %vm362_vm8, %v1224_v5  ;;  %v1811_v5 = vrot.slane %v1791_v1, 1 }
 0x217   : > { %1285 = vst.msk [vmem:[%s3855_s30 + $0x1a6] sm:$0x1] %vm362_vm8, %v1225_v42  ;;  %v1812_v42 = vrot.slane %v1791_v1, 2 }
 0x218   : > { %1286 = vst.msk [vmem:[%s3855_s30 + $0x1b6] sm:$0x1] %vm362_vm8, %v1226_v6  ;;  %v1813_v6 = vrot.slane %v1791_v1, 3 }
 0x219   : > { %1287 = vst.msk [vmem:[%s3855_s30 + $0x1c6] sm:$0x1] %vm362_vm8, %v1227_v54  ;;  %v1814_v54 = vrot.slane %v1791_v1, 4 }
 0x21a   : > { %1288 = vst.msk [vmem:[%s3855_s30 + $0x1d6] sm:$0x1] %vm362_vm8, %v1228_v50  ;;  %v1815_v50 = vrot.slane %v1791_v1, 5 }
 0x21b   : > { %1289 = vst.msk [vmem:[%s3855_s30 + $0x1e6] sm:$0x1] %vm362_vm8, %v1229_v24  ;;  %v1816_v24 = vrot.slane %v1791_v1, 6 }
 0x21c   : > { %1290 = vst.msk [vmem:[%s3855_s30 + $0x1f6] sm:$0x1] %vm362_vm8, %v1230_v35  ;;  %v1817_v35 = vrot.slane %v1791_v1, 7 }
 0x21d   : > { %1435 = vst.msk [vmem:[%s3855_s30 + $0x187] sm:$0x1] %vm362_vm8, %v1348_v25  ;;  %v1936_v25 = vpop.f32.mrf.mxu3 }
 0x21e   : > { %1436 = vst.msk [vmem:[%s3855_s30 + $0x197] sm:$0x1] %vm362_vm8, %v1376_v53  ;;  %v1956_v53 = vrot.slane %v1936_v25, 1 }
 0x21f   : > { %1437 = vst.msk [vmem:[%s3855_s30 + $0x1a7] sm:$0x1] %vm362_vm8, %v1377_v18  ;;  %v1957_v18 = vrot.slane %v1936_v25, 2 }
 0x220   : > { %1438 = vst.msk [vmem:[%s3855_s30 + $0x1b7] sm:$0x1] %vm362_vm8, %v1378_v3  ;;  %v1958_v3 = vrot.slane %v1936_v25, 3 }
 0x221   : > { %1439 = vst.msk [vmem:[%s3855_s30 + $0x1c7] sm:$0x1] %vm362_vm8, %v1379_v44  ;;  %v1959_v44 = vrot.slane %v1936_v25, 4 }
 0x222   : > { %1440 = vst.msk [vmem:[%s3855_s30 + $0x1d7] sm:$0x1] %vm362_vm8, %v1380_v0  ;;  %v1960_v0 = vrot.slane %v1936_v25, 5 }
 0x223   : > { %1441 = vst.msk [vmem:[%s3855_s30 + $0x1e7] sm:$0x1] %vm362_vm8, %v1381_v46  ;;  %v1961_v46 = vrot.slane %v1936_v25, 6 }
 0x224   : > { %1442 = vst.msk [vmem:[%s3855_s30 + $0x1f7] sm:$0x1] %vm362_vm8, %v1382_v37  ;;  %v1962_v37 = vrot.slane %v1936_v25, 7 }
 0x225   : > { %1563 = vst.msk [vmem:[%s3855_s30 + $0x8] sm:$0x1] %vm362_vm8, %v1491_v14  ;;  %v1497_v14 = vpop.f32.mrf.mxu0 }
 0x226   : > { %1564 = vst.msk [vmem:[%s3855_s30 + $0x18] sm:$0x1] %vm362_vm8, %v1507_v15  ;;  %v1521_v15 = vrot.slane %v1497_v14, 1 }
 0x227   : > { %1565 = vst.msk [vmem:[%s3855_s30 + $0x28] sm:$0x1] %vm362_vm8, %v1508_v49  ;;  %v1522_v49 = vrot.slane %v1497_v14, 2 }
 0x228   : > { %1566 = vst.msk [vmem:[%s3855_s30 + $0x38] sm:$0x1] %vm362_vm8, %v1509_v55  ;;  %v1523_v55 = vrot.slane %v1497_v14, 3 }
 0x229   : > { %1567 = vst.msk [vmem:[%s3855_s30 + $0x48] sm:$0x1] %vm362_vm8, %v1510_v61  ;;  %v1524_v61 = vrot.slane %v1497_v14, 4 }
 0x22a   : > { %1568 = vst.msk [vmem:[%s3855_s30 + $0x58] sm:$0x1] %vm362_vm8, %v1511_v30  ;;  %v1525_v30 = vrot.slane %v1497_v14, 5 }
 0x22b   : > { %1569 = vst.msk [vmem:[%s3855_s30 + $0x68] sm:$0x1] %vm362_vm8, %v1512_v48  ;;  %v1526_v48 = vrot.slane %v1497_v14, 6 }
 0x22c   : > { %1570 = vst.msk [vmem:[%s3855_s30 + $0x78] sm:$0x1] %vm362_vm8, %v1513_v34  ;;  %v1527_v34 = vrot.slane %v1497_v14, 7 }
 0x22d   : > { %1715 = vst.msk [vmem:[%s3855_s30 + $0x9] sm:$0x1] %vm362_vm8, %v1643_v59  ;;  %v1649_v59 = vpop.f32.mrf.mxu1 }
 0x22e   : > { %1716 = vst.msk [vmem:[%s3855_s30 + $0x19] sm:$0x1] %vm362_vm8, %v1659_v63  ;;  %v1673_v63 = vrot.slane %v1649_v59, 1 }
 0x22f   : > { %1717 = vst.msk [vmem:[%s3855_s30 + $0x29] sm:$0x1] %vm362_vm8, %v1660_v13  ;;  %v1674_v13 = vrot.slane %v1649_v59, 2 }
 0x230   : > { %1718 = vst.msk [vmem:[%s3855_s30 + $0x39] sm:$0x1] %vm362_vm8, %v1661_v47  ;;  %v1675_v47 = vrot.slane %v1649_v59, 3 }
 0x231   : > { %1719 = vst.msk [vmem:[%s3855_s30 + $0x49] sm:$0x1] %vm362_vm8, %v1662_v51  ;;  %v1676_v51 = vrot.slane %v1649_v59, 4 }
 0x232   : > { %1720 = vst.msk [vmem:[%s3855_s30 + $0x59] sm:$0x1] %vm362_vm8, %v1663_v4  ;;  %v1677_v4 = vrot.slane %v1649_v59, 5 }
 0x233   : > { %1721 = vst.msk [vmem:[%s3855_s30 + $0x69] sm:$0x1] %vm362_vm8, %v1664_v58  ;;  %v1678_v58 = vrot.slane %v1649_v59, 6 }
 0x234   : > { %1722 = vst.msk [vmem:[%s3855_s30 + $0x79] sm:$0x1] %vm362_vm8, %v1665_v40  ;;  %v1679_v40 = vrot.slane %v1649_v59, 7 }
 0x235   : > { %1860 = vst.msk [vmem:[%s3855_s30 + $0xa] sm:$0x1] %vm362_vm8, %v1788_v57  ;;  %v1794_v57 = vpop.f32.mrf.mxu2 }
 0x236   : > { %1861 = vst.msk [vmem:[%s3855_s30 + $0x1a] sm:$0x1] %vm362_vm8, %v1804_v36  ;;  %v1818_v36 = vrot.slane %v1794_v57, 1 }
 0x237   : > { %1862 = vst.msk [vmem:[%s3855_s30 + $0x2a] sm:$0x1] %vm362_vm8, %v1805_v11  ;;  %v1819_v11 = vrot.slane %v1794_v57, 2 }
 0x238   : > { %1863 = vst.msk [vmem:[%s3855_s30 + $0x3a] sm:$0x1] %vm362_vm8, %v1806_v8  ;;  %v1820_v8 = vrot.slane %v1794_v57, 3 }
 0x239   : > { %1864 = vst.msk [vmem:[%s3855_s30 + $0x4a] sm:$0x1] %vm362_vm8, %v1807_v28  ;;  %v1821_v28 = vrot.slane %v1794_v57, 4 }
 0x23a   : > { %1865 = vst.msk [vmem:[%s3855_s30 + $0x5a] sm:$0x1] %vm362_vm8, %v1808_v62  ;;  %v1822_v62 = vrot.slane %v1794_v57, 5 }
 0x23b   : > { %1866 = vst.msk [vmem:[%s3855_s30 + $0x6a] sm:$0x1] %vm362_vm8, %v1809_v38  ;;  %v1823_v38 = vrot.slane %v1794_v57, 6 }
 0x23c   : > { %1867 = vst.msk [vmem:[%s3855_s30 + $0x7a] sm:$0x1] %vm362_vm8, %v1810_v10  ;;  %v1824_v10 = vrot.slane %v1794_v57, 7 }
 0x23d   : > { %2005 = vst.msk [vmem:[%s3855_s30 + $0xb] sm:$0x1] %vm362_vm8, %v1933_v60  ;;  %v1939_v60 = vpop.f32.mrf.mxu3 }
 0x23e   : > { %2006 = vst.msk [vmem:[%s3855_s30 + $0x1b] sm:$0x1] %vm362_vm8, %v1949_v23  ;;  %v1963_v23 = vrot.slane %v1939_v60, 1 }
 0x23f   : > { %2007 = vst.msk [vmem:[%s3855_s30 + $0x2b] sm:$0x1] %vm362_vm8, %v1950_v16  ;;  %v1964_v16 = vrot.slane %v1939_v60, 2 }
 0x240   : > { %2008 = vst.msk [vmem:[%s3855_s30 + $0x3b] sm:$0x1] %vm362_vm8, %v1951_v21  ;;  %v1965_v21 = vrot.slane %v1939_v60, 3 }
 0x241   : > { %2009 = vst.msk [vmem:[%s3855_s30 + $0x4b] sm:$0x1] %vm362_vm8, %v1952_v39  ;;  %v1966_v39 = vrot.slane %v1939_v60, 4 }
 0x242   : > { %2010 = vst.msk [vmem:[%s3855_s30 + $0x5b] sm:$0x1] %vm362_vm8, %v1953_v43  ;;  %v1967_v43 = vrot.slane %v1939_v60, 5 }
 0x243   : > { %2011 = vst.msk [vmem:[%s3855_s30 + $0x6b] sm:$0x1] %vm362_vm8, %v1954_v17  ;;  %v1968_v17 = vrot.slane %v1939_v60, 6 }
 0x244   : > { %2012 = vst.msk [vmem:[%s3855_s30 + $0x7b] sm:$0x1] %vm362_vm8, %v1955_v26  ;;  %v1969_v26 = vrot.slane %v1939_v60, 7 }
 0x245   : > { %1571 = vst.msk [vmem:[%s3855_s30 + $0x88] sm:$0x1] %vm362_vm8, %v1494_v32  ;;  %v1500_v32 = vpop.f32.mrf.mxu0 }
 0x246   : > { %1572 = vst.msk [vmem:[%s3855_s30 + $0x98] sm:$0x1] %vm362_vm8, %v1514_v41  ;;  %v1528_v41 = vrot.slane %v1500_v32, 1 }
 0x247   : > { %1573 = vst.msk [vmem:[%s3855_s30 + $0xa8] sm:$0x1] %vm362_vm8, %v1515_v31  ;;  %v1529_v31 = vrot.slane %v1500_v32, 2 }
 0x248   : > { %1574 = vst.msk [vmem:[%s3855_s30 + $0xb8] sm:$0x1] %vm362_vm8, %v1516_v20  ;;  %v1530_v20 = vrot.slane %v1500_v32, 3 }
 0x249   : > { %1575 = vst.msk [vmem:[%s3855_s30 + $0xc8] sm:$0x1] %vm362_vm8, %v1517_v12  ;;  %v1531_v12 = vrot.slane %v1500_v32, 4 }
 0x24a   : > { %1576 = vst.msk [vmem:[%s3855_s30 + $0xd8] sm:$0x1] %vm362_vm8, %v1518_v52  ;;  %v1532_v52 = vrot.slane %v1500_v32, 5 }
 0x24b   : > { %1577 = vst.msk [vmem:[%s3855_s30 + $0xe8] sm:$0x1] %vm362_vm8, %v1519_v7  ;;  %v1533_v7 = vrot.slane %v1500_v32, 6 }
 0x24c   : > { %1578 = vst.msk [vmem:[%s3855_s30 + $0xf8] sm:$0x1] %vm362_vm8, %v1520_v19  ;;  %v1534_v19 = vrot.slane %v1500_v32, 7 }
 0x24d   : > { %1723 = vst.msk [vmem:[%s3855_s30 + $0x89] sm:$0x1] %vm362_vm8, %v1646_v56  ;;  %v1652_v56 = vpop.f32.mrf.mxu1 }
 0x24e   : > { %1724 = vst.msk [vmem:[%s3855_s30 + $0x99] sm:$0x1] %vm362_vm8, %v1666_v9  ;;  %v1680_v9 = vrot.slane %v1652_v56, 1 }
 0x24f   : > { %1725 = vst.msk [vmem:[%s3855_s30 + $0xa9] sm:$0x1] %vm362_vm8, %v1667_v22  ;;  %v1681_v22 = vrot.slane %v1652_v56, 2 }
 0x250   : > { %1726 = vst.msk [vmem:[%s3855_s30 + $0xb9] sm:$0x1] %vm362_vm8, %v1668_v2  ;;  %v1682_v2 = vrot.slane %v1652_v56, 3 }
 0x251   : > { %1727 = vst.msk [vmem:[%s3855_s30 + $0xc9] sm:$0x1] %vm362_vm8, %v1669_v29  ;;  %v1683_v29 = vrot.slane %v1652_v56, 4 }
 0x252   : > { %1728 = vst.msk [vmem:[%s3855_s30 + $0xd9] sm:$0x1] %vm362_vm8, %v1670_v33  ;;  %v1684_v33 = vrot.slane %v1652_v56, 5 }
 0x253   : > { %1729 = vst.msk [vmem:[%s3855_s30 + $0xe9] sm:$0x1] %vm362_vm8, %v1671_v45  ;;  %v1685_v45 = vrot.slane %v1652_v56, 6 }
 0x254   : > { %1730 = vst.msk [vmem:[%s3855_s30 + $0xf9] sm:$0x1] %vm362_vm8, %v1672_v27  ;;  %v1686_v27 = vrot.slane %v1652_v56, 7 }
 0x255   : > { %1868 = vst.msk [vmem:[%s3855_s30 + $0x8a] sm:$0x1] %vm362_vm8, %v1791_v1  ;;  %v1797_v1 = vpop.f32.mrf.mxu2 }
 0x256   : > { %1869 = vst.msk [vmem:[%s3855_s30 + $0x9a] sm:$0x1] %vm362_vm8, %v1811_v5  ;;  %v1825_v5 = vrot.slane %v1797_v1, 1 }
 0x257   : > { %1870 = vst.msk [vmem:[%s3855_s30 + $0xaa] sm:$0x1] %vm362_vm8, %v1812_v42  ;;  %v1826_v42 = vrot.slane %v1797_v1, 2 }
 0x258   : > { %1871 = vst.msk [vmem:[%s3855_s30 + $0xba] sm:$0x1] %vm362_vm8, %v1813_v6  ;;  %v1827_v6 = vrot.slane %v1797_v1, 3 }
 0x259   : > { %1872 = vst.msk [vmem:[%s3855_s30 + $0xca] sm:$0x1] %vm362_vm8, %v1814_v54  ;;  %v1828_v54 = vrot.slane %v1797_v1, 4 }
 0x25a   : > { %1873 = vst.msk [vmem:[%s3855_s30 + $0xda] sm:$0x1] %vm362_vm8, %v1815_v50  ;;  %v1829_v50 = vrot.slane %v1797_v1, 5 }
 0x25b   : > { %1874 = vst.msk [vmem:[%s3855_s30 + $0xea] sm:$0x1] %vm362_vm8, %v1816_v24  ;;  %v1830_v24 = vrot.slane %v1797_v1, 6 }
 0x25c   : > { %1875 = vst.msk [vmem:[%s3855_s30 + $0xfa] sm:$0x1] %vm362_vm8, %v1817_v35  ;;  %v1831_v35 = vrot.slane %v1797_v1, 7 }
 0x25d   : > { %2013 = vst.msk [vmem:[%s3855_s30 + $0x8b] sm:$0x1] %vm362_vm8, %v1936_v25  ;;  %v1942_v25 = vpop.f32.mrf.mxu3 }
 0x25e   : > { %2014 = vst.msk [vmem:[%s3855_s30 + $0x9b] sm:$0x1] %vm362_vm8, %v1956_v53  ;;  %v1970_v53 = vrot.slane %v1942_v25, 1 }
 0x25f   : > { %2015 = vst.msk [vmem:[%s3855_s30 + $0xab] sm:$0x1] %vm362_vm8, %v1957_v18  ;;  %v1971_v18 = vrot.slane %v1942_v25, 2 }
 0x260   : > { %2016 = vst.msk [vmem:[%s3855_s30 + $0xbb] sm:$0x1] %vm362_vm8, %v1958_v3  ;;  %v1972_v3 = vrot.slane %v1942_v25, 3 }
 0x261   : > { %2017 = vst.msk [vmem:[%s3855_s30 + $0xcb] sm:$0x1] %vm362_vm8, %v1959_v44  ;;  %v1973_v44 = vrot.slane %v1942_v25, 4 }
 0x262   : > { %2018 = vst.msk [vmem:[%s3855_s30 + $0xdb] sm:$0x1] %vm362_vm8, %v1960_v0  ;;  %v1974_v0 = vrot.slane %v1942_v25, 5 }
 0x263   : > { %2019 = vst.msk [vmem:[%s3855_s30 + $0xeb] sm:$0x1] %vm362_vm8, %v1961_v46  ;;  %v1975_v46 = vrot.slane %v1942_v25, 6 }
 0x264   : > { %2020 = vst.msk [vmem:[%s3855_s30 + $0xfb] sm:$0x1] %vm362_vm8, %v1962_v37  ;;  %v1976_v37 = vrot.slane %v1942_v25, 7 }
 0x265   : > { %1579 = vst.msk [vmem:[%s3855_s30 + $0x108] sm:$0x1] %vm362_vm8, %v1497_v14  ;;  %v2078_v14 = vpop.f32.mrf.mxu0 }
 0x266   : > { %1580 = vst.msk [vmem:[%s3855_s30 + $0x118] sm:$0x1] %vm362_vm8, %v1521_v15  ;;  %v2094_v15 = vrot.slane %v2078_v14, 1 }
 0x267   : > { %1581 = vst.msk [vmem:[%s3855_s30 + $0x128] sm:$0x1] %vm362_vm8, %v1522_v49  ;;  %v2095_v49 = vrot.slane %v2078_v14, 2 }
 0x268   : > { %1582 = vst.msk [vmem:[%s3855_s30 + $0x138] sm:$0x1] %vm362_vm8, %v1523_v55  ;;  %v2096_v55 = vrot.slane %v2078_v14, 3 }
 0x269   : > { %1583 = vst.msk [vmem:[%s3855_s30 + $0x148] sm:$0x1] %vm362_vm8, %v1524_v61  ;;  %v2097_v61 = vrot.slane %v2078_v14, 4 }
 0x26a   : > { %1584 = vst.msk [vmem:[%s3855_s30 + $0x158] sm:$0x1] %vm362_vm8, %v1525_v30  ;;  %v2098_v30 = vrot.slane %v2078_v14, 5 }
 0x26b   : > { %1585 = vst.msk [vmem:[%s3855_s30 + $0x168] sm:$0x1] %vm362_vm8, %v1526_v48  ;;  %v2099_v48 = vrot.slane %v2078_v14, 6 }
 0x26c   : > { %1586 = vst.msk [vmem:[%s3855_s30 + $0x178] sm:$0x1] %vm362_vm8, %v1527_v34  ;;  %v2100_v34 = vrot.slane %v2078_v14, 7 }
 0x26d   : > { %1731 = vst.msk [vmem:[%s3855_s30 + $0x109] sm:$0x1] %vm362_vm8, %v1649_v59  ;;  %v2223_v59 = vpop.f32.mrf.mxu1 }
 0x26e   : > { %1732 = vst.msk [vmem:[%s3855_s30 + $0x119] sm:$0x1] %vm362_vm8, %v1673_v63  ;;  %v2239_v63 = vrot.slane %v2223_v59, 1 }
 0x26f   : > { %1733 = vst.msk [vmem:[%s3855_s30 + $0x129] sm:$0x1] %vm362_vm8, %v1674_v13  ;;  %v2240_v13 = vrot.slane %v2223_v59, 2 }
 0x270   : > { %1734 = vst.msk [vmem:[%s3855_s30 + $0x139] sm:$0x1] %vm362_vm8, %v1675_v47  ;;  %v2241_v47 = vrot.slane %v2223_v59, 3 }
 0x271   : > { %1735 = vst.msk [vmem:[%s3855_s30 + $0x149] sm:$0x1] %vm362_vm8, %v1676_v51  ;;  %v2242_v51 = vrot.slane %v2223_v59, 4 }
 0x272   : > { %1736 = vst.msk [vmem:[%s3855_s30 + $0x159] sm:$0x1] %vm362_vm8, %v1677_v4  ;;  %v2243_v4 = vrot.slane %v2223_v59, 5 }
 0x273   : > { %1737 = vst.msk [vmem:[%s3855_s30 + $0x169] sm:$0x1] %vm362_vm8, %v1678_v58  ;;  %v2244_v58 = vrot.slane %v2223_v59, 6 }
 0x274   : > { %1738 = vst.msk [vmem:[%s3855_s30 + $0x179] sm:$0x1] %vm362_vm8, %v1679_v40  ;;  %v2245_v40 = vrot.slane %v2223_v59, 7 }
 0x275   : > { %1876 = vst.msk [vmem:[%s3855_s30 + $0x10a] sm:$0x1] %vm362_vm8, %v1794_v57  ;;  %v2379_v57 = vpop.f32.mrf.mxu2 }
 0x276   : > { %1877 = vst.msk [vmem:[%s3855_s30 + $0x11a] sm:$0x1] %vm362_vm8, %v1818_v36  ;;  %v2395_v36 = vrot.slane %v2379_v57, 1 }
 0x277   : > { %1878 = vst.msk [vmem:[%s3855_s30 + $0x12a] sm:$0x1] %vm362_vm8, %v1819_v11  ;;  %v2396_v11 = vrot.slane %v2379_v57, 2 }
 0x278   : > { %1879 = vst.msk [vmem:[%s3855_s30 + $0x13a] sm:$0x1] %vm362_vm8, %v1820_v8  ;;  %v2397_v8 = vrot.slane %v2379_v57, 3 }
 0x279   : > { %1880 = vst.msk [vmem:[%s3855_s30 + $0x14a] sm:$0x1] %vm362_vm8, %v1821_v28  ;;  %v2398_v28 = vrot.slane %v2379_v57, 4 }
 0x27a   : > { %1881 = vst.msk [vmem:[%s3855_s30 + $0x15a] sm:$0x1] %vm362_vm8, %v1822_v62  ;;  %v2399_v62 = vrot.slane %v2379_v57, 5 }
 0x27b   : > { %1882 = vst.msk [vmem:[%s3855_s30 + $0x16a] sm:$0x1] %vm362_vm8, %v1823_v38  ;;  %v2400_v38 = vrot.slane %v2379_v57, 6 }
 0x27c   : > { %1883 = vst.msk [vmem:[%s3855_s30 + $0x17a] sm:$0x1] %vm362_vm8, %v1824_v10  ;;  %v2401_v10 = vrot.slane %v2379_v57, 7 }
 0x27d   : > { %2021 = vst.msk [vmem:[%s3855_s30 + $0x10b] sm:$0x1] %vm362_vm8, %v1939_v60  ;;  %v2531_v60 = vpop.f32.mrf.mxu3 }
 0x27e   : > { %2022 = vst.msk [vmem:[%s3855_s30 + $0x11b] sm:$0x1] %vm362_vm8, %v1963_v23  ;;  %v2547_v23 = vrot.slane %v2531_v60, 1 }
 0x27f   : > { %2023 = vst.msk [vmem:[%s3855_s30 + $0x12b] sm:$0x1] %vm362_vm8, %v1964_v16  ;;  %v2548_v16 = vrot.slane %v2531_v60, 2 }
 0x280   : > { %2024 = vst.msk [vmem:[%s3855_s30 + $0x13b] sm:$0x1] %vm362_vm8, %v1965_v21  ;;  %v2549_v21 = vrot.slane %v2531_v60, 3 }
 0x281   : > { %2025 = vst.msk [vmem:[%s3855_s30 + $0x14b] sm:$0x1] %vm362_vm8, %v1966_v39  ;;  %v2550_v39 = vrot.slane %v2531_v60, 4 }
 0x282   : > { %2026 = vst.msk [vmem:[%s3855_s30 + $0x15b] sm:$0x1] %vm362_vm8, %v1967_v43  ;;  %v2551_v43 = vrot.slane %v2531_v60, 5 }
 0x283   : > { %2027 = vst.msk [vmem:[%s3855_s30 + $0x16b] sm:$0x1] %vm362_vm8, %v1968_v17  ;;  %v2552_v17 = vrot.slane %v2531_v60, 6 }
 0x284   : > { %2028 = vst.msk [vmem:[%s3855_s30 + $0x17b] sm:$0x1] %vm362_vm8, %v1969_v26  ;;  %v2553_v26 = vrot.slane %v2531_v60, 7 }
 0x285   : > { %1587 = vst.msk [vmem:[%s3855_s30 + $0x188] sm:$0x1] %vm362_vm8, %v1500_v32  ;;  %v2081_v32 = vpop.f32.mrf.mxu0 }
 0x286   : > { %1588 = vst.msk [vmem:[%s3855_s30 + $0x198] sm:$0x1] %vm362_vm8, %v1528_v41  ;;  %v2101_v41 = vrot.slane %v2081_v32, 1 }
 0x287   : > { %1589 = vst.msk [vmem:[%s3855_s30 + $0x1a8] sm:$0x1] %vm362_vm8, %v1529_v31  ;;  %v2102_v31 = vrot.slane %v2081_v32, 2 }
 0x288   : > { %1590 = vst.msk [vmem:[%s3855_s30 + $0x1b8] sm:$0x1] %vm362_vm8, %v1530_v20  ;;  %v2103_v20 = vrot.slane %v2081_v32, 3 }
 0x289   : > { %1591 = vst.msk [vmem:[%s3855_s30 + $0x1c8] sm:$0x1] %vm362_vm8, %v1531_v12  ;;  %v2104_v12 = vrot.slane %v2081_v32, 4 }
 0x28a   : > { %1592 = vst.msk [vmem:[%s3855_s30 + $0x1d8] sm:$0x1] %vm362_vm8, %v1532_v52  ;;  %v2105_v52 = vrot.slane %v2081_v32, 5 }
 0x28b   : > { %1593 = vst.msk [vmem:[%s3855_s30 + $0x1e8] sm:$0x1] %vm362_vm8, %v1533_v7  ;;  %v2106_v7 = vrot.slane %v2081_v32, 6 }
 0x28c   : > { %1594 = vst.msk [vmem:[%s3855_s30 + $0x1f8] sm:$0x1] %vm362_vm8, %v1534_v19  ;;  %v2107_v19 = vrot.slane %v2081_v32, 7 }
 0x28d   : > { %1739 = vst.msk [vmem:[%s3855_s30 + $0x189] sm:$0x1] %vm362_vm8, %v1652_v56  ;;  %v2226_v56 = vpop.f32.mrf.mxu1 }
 0x28e   : > { %1740 = vst.msk [vmem:[%s3855_s30 + $0x199] sm:$0x1] %vm362_vm8, %v1680_v9  ;;  %v2246_v9 = vrot.slane %v2226_v56, 1 }
 0x28f   : > { %1741 = vst.msk [vmem:[%s3855_s30 + $0x1a9] sm:$0x1] %vm362_vm8, %v1681_v22  ;;  %v2247_v22 = vrot.slane %v2226_v56, 2 }
 0x290   : > { %1742 = vst.msk [vmem:[%s3855_s30 + $0x1b9] sm:$0x1] %vm362_vm8, %v1682_v2  ;;  %v2248_v2 = vrot.slane %v2226_v56, 3 }
 0x291   : > { %1743 = vst.msk [vmem:[%s3855_s30 + $0x1c9] sm:$0x1] %vm362_vm8, %v1683_v29  ;;  %v2249_v29 = vrot.slane %v2226_v56, 4 }
 0x292   : > { %1744 = vst.msk [vmem:[%s3855_s30 + $0x1d9] sm:$0x1] %vm362_vm8, %v1684_v33  ;;  %v2250_v33 = vrot.slane %v2226_v56, 5 }
 0x293   : > { %1745 = vst.msk [vmem:[%s3855_s30 + $0x1e9] sm:$0x1] %vm362_vm8, %v1685_v45  ;;  %v2251_v45 = vrot.slane %v2226_v56, 6 }
 0x294   : > { %1746 = vst.msk [vmem:[%s3855_s30 + $0x1f9] sm:$0x1] %vm362_vm8, %v1686_v27  ;;  %v2252_v27 = vrot.slane %v2226_v56, 7 }
 0x295   : > { %1884 = vst.msk [vmem:[%s3855_s30 + $0x18a] sm:$0x1] %vm362_vm8, %v1797_v1  ;;  %v2382_v1 = vpop.f32.mrf.mxu2 }
 0x296   : > { %1885 = vst.msk [vmem:[%s3855_s30 + $0x19a] sm:$0x1] %vm362_vm8, %v1825_v5  ;;  %v2402_v5 = vrot.slane %v2382_v1, 1 }
 0x297   : > { %1886 = vst.msk [vmem:[%s3855_s30 + $0x1aa] sm:$0x1] %vm362_vm8, %v1826_v42  ;;  %v2403_v42 = vrot.slane %v2382_v1, 2 }
 0x298   : > { %1887 = vst.msk [vmem:[%s3855_s30 + $0x1ba] sm:$0x1] %vm362_vm8, %v1827_v6  ;;  %v2404_v6 = vrot.slane %v2382_v1, 3 }
 0x299   : > { %1888 = vst.msk [vmem:[%s3855_s30 + $0x1ca] sm:$0x1] %vm362_vm8, %v1828_v54  ;;  %v2405_v54 = vrot.slane %v2382_v1, 4 }
 0x29a   : > { %1889 = vst.msk [vmem:[%s3855_s30 + $0x1da] sm:$0x1] %vm362_vm8, %v1829_v50  ;;  %v2406_v50 = vrot.slane %v2382_v1, 5 }
 0x29b   : > { %1890 = vst.msk [vmem:[%s3855_s30 + $0x1ea] sm:$0x1] %vm362_vm8, %v1830_v24  ;;  %v2407_v24 = vrot.slane %v2382_v1, 6 }
 0x29c   : > { %1891 = vst.msk [vmem:[%s3855_s30 + $0x1fa] sm:$0x1] %vm362_vm8, %v1831_v35  ;;  %v2408_v35 = vrot.slane %v2382_v1, 7 }
 0x29d   : > { %2029 = vst.msk [vmem:[%s3855_s30 + $0x18b] sm:$0x1] %vm362_vm8, %v1942_v25  ;;  %v2534_v25 = vpop.f32.mrf.mxu3 }
 0x29e   : > { %2030 = vst.msk [vmem:[%s3855_s30 + $0x19b] sm:$0x1] %vm362_vm8, %v1970_v53  ;;  %v2554_v53 = vrot.slane %v2534_v25, 1 }
 0x29f   : > { %2031 = vst.msk [vmem:[%s3855_s30 + $0x1ab] sm:$0x1] %vm362_vm8, %v1971_v18  ;;  %v2555_v18 = vrot.slane %v2534_v25, 2 }
 0x2a0   : > { %2032 = vst.msk [vmem:[%s3855_s30 + $0x1bb] sm:$0x1] %vm362_vm8, %v1972_v3  ;;  %v2556_v3 = vrot.slane %v2534_v25, 3 }
 0x2a1   : > { %2033 = vst.msk [vmem:[%s3855_s30 + $0x1cb] sm:$0x1] %vm362_vm8, %v1973_v44  ;;  %v2557_v44 = vrot.slane %v2534_v25, 4 }
 0x2a2   : > { %2034 = vst.msk [vmem:[%s3855_s30 + $0x1db] sm:$0x1] %vm362_vm8, %v1974_v0  ;;  %v2558_v0 = vrot.slane %v2534_v25, 5 }
 0x2a3   : > { %2035 = vst.msk [vmem:[%s3855_s30 + $0x1eb] sm:$0x1] %vm362_vm8, %v1975_v46  ;;  %v2559_v46 = vrot.slane %v2534_v25, 6 }
 0x2a4   : > { %2036 = vst.msk [vmem:[%s3855_s30 + $0x1fb] sm:$0x1] %vm362_vm8, %v1976_v37  ;;  %v2560_v37 = vrot.slane %v2534_v25, 7 }
 0x2a5   : > { %2150 = vst.msk [vmem:[%s3855_s30 + $0xc] sm:$0x1] %vm362_vm8, %v2078_v14  ;;  %v2084_v14 = vpop.f32.mrf.mxu0 }
 0x2a6   : > { %2151 = vst.msk [vmem:[%s3855_s30 + $0x1c] sm:$0x1] %vm362_vm8, %v2094_v15  ;;  %v2108_v15 = vrot.slane %v2084_v14, 1 }
 0x2a7   : > { %2152 = vst.msk [vmem:[%s3855_s30 + $0x2c] sm:$0x1] %vm362_vm8, %v2095_v49  ;;  %v2109_v49 = vrot.slane %v2084_v14, 2 }
 0x2a8   : > { %2153 = vst.msk [vmem:[%s3855_s30 + $0x3c] sm:$0x1] %vm362_vm8, %v2096_v55  ;;  %v2110_v55 = vrot.slane %v2084_v14, 3 }
 0x2a9   : > { %2154 = vst.msk [vmem:[%s3855_s30 + $0x4c] sm:$0x1] %vm362_vm8, %v2097_v61  ;;  %v2111_v61 = vrot.slane %v2084_v14, 4 }
 0x2aa   : > { %2155 = vst.msk [vmem:[%s3855_s30 + $0x5c] sm:$0x1] %vm362_vm8, %v2098_v30  ;;  %v2112_v30 = vrot.slane %v2084_v14, 5 }
 0x2ab   : > { %2156 = vst.msk [vmem:[%s3855_s30 + $0x6c] sm:$0x1] %vm362_vm8, %v2099_v48  ;;  %v2113_v48 = vrot.slane %v2084_v14, 6 }
 0x2ac   : > { %2157 = vst.msk [vmem:[%s3855_s30 + $0x7c] sm:$0x1] %vm362_vm8, %v2100_v34  ;;  %v2114_v34 = vrot.slane %v2084_v14, 7 }
 0x2ad   : > { %2295 = vst.msk [vmem:[%s3855_s30 + $0xd] sm:$0x1] %vm362_vm8, %v2223_v59  ;;  %v2229_v59 = vpop.f32.mrf.mxu1 }
 0x2ae   : > { %2296 = vst.msk [vmem:[%s3855_s30 + $0x1d] sm:$0x1] %vm362_vm8, %v2239_v63  ;;  %v2253_v63 = vrot.slane %v2229_v59, 1 }
 0x2af   : > { %2297 = vst.msk [vmem:[%s3855_s30 + $0x2d] sm:$0x1] %vm362_vm8, %v2240_v13  ;;  %v2254_v13 = vrot.slane %v2229_v59, 2 }
 0x2b0   : > { %2298 = vst.msk [vmem:[%s3855_s30 + $0x3d] sm:$0x1] %vm362_vm8, %v2241_v47  ;;  %v2255_v47 = vrot.slane %v2229_v59, 3 }
 0x2b1   : > { %2299 = vst.msk [vmem:[%s3855_s30 + $0x4d] sm:$0x1] %vm362_vm8, %v2242_v51  ;;  %v2256_v51 = vrot.slane %v2229_v59, 4 }
 0x2b2   : > { %2300 = vst.msk [vmem:[%s3855_s30 + $0x5d] sm:$0x1] %vm362_vm8, %v2243_v4  ;;  %v2257_v4 = vrot.slane %v2229_v59, 5 }
 0x2b3   : > { %2301 = vst.msk [vmem:[%s3855_s30 + $0x6d] sm:$0x1] %vm362_vm8, %v2244_v58  ;;  %v2258_v58 = vrot.slane %v2229_v59, 6 }
 0x2b4   : > { %2302 = vst.msk [vmem:[%s3855_s30 + $0x7d] sm:$0x1] %vm362_vm8, %v2245_v40  ;;  %v2259_v40 = vrot.slane %v2229_v59, 7 }
 0x2b5   : > { %2451 = vst.msk [vmem:[%s3855_s30 + $0xe] sm:$0x1] %vm362_vm8, %v2379_v57  ;;  %v2385_v57 = vpop.f32.mrf.mxu2 }
 0x2b6   : > { %2452 = vst.msk [vmem:[%s3855_s30 + $0x1e] sm:$0x1] %vm362_vm8, %v2395_v36  ;;  %v2409_v36 = vrot.slane %v2385_v57, 1 }
 0x2b7   : > { %2453 = vst.msk [vmem:[%s3855_s30 + $0x2e] sm:$0x1] %vm362_vm8, %v2396_v11  ;;  %v2410_v11 = vrot.slane %v2385_v57, 2 }
 0x2b8   : > { %2454 = vst.msk [vmem:[%s3855_s30 + $0x3e] sm:$0x1] %vm362_vm8, %v2397_v8  ;;  %v2411_v8 = vrot.slane %v2385_v57, 3 }
 0x2b9   : > { %2455 = vst.msk [vmem:[%s3855_s30 + $0x4e] sm:$0x1] %vm362_vm8, %v2398_v28  ;;  %v2412_v28 = vrot.slane %v2385_v57, 4 }
 0x2ba   : > { %2456 = vst.msk [vmem:[%s3855_s30 + $0x5e] sm:$0x1] %vm362_vm8, %v2399_v62  ;;  %v2413_v62 = vrot.slane %v2385_v57, 5 }
 0x2bb   : > { %2457 = vst.msk [vmem:[%s3855_s30 + $0x6e] sm:$0x1] %vm362_vm8, %v2400_v38  ;;  %v2414_v38 = vrot.slane %v2385_v57, 6 }
 0x2bc   : > { %2458 = vst.msk [vmem:[%s3855_s30 + $0x7e] sm:$0x1] %vm362_vm8, %v2401_v10  ;;  %v2415_v10 = vrot.slane %v2385_v57, 7 }
 0x2bd   : > { %2603 = vst.msk [vmem:[%s3855_s30 + $0xf] sm:$0x1] %vm362_vm8, %v2531_v60  ;;  %v2537_v60 = vpop.f32.mrf.mxu3 }
 0x2be   : > { %2604 = vst.msk [vmem:[%s3855_s30 + $0x1f] sm:$0x1] %vm362_vm8, %v2547_v23  ;;  %v2561_v23 = vrot.slane %v2537_v60, 1 }
 0x2bf   : > { %2605 = vst.msk [vmem:[%s3855_s30 + $0x2f] sm:$0x1] %vm362_vm8, %v2548_v16  ;;  %v2562_v16 = vrot.slane %v2537_v60, 2 }
 0x2c0   : > { %2606 = vst.msk [vmem:[%s3855_s30 + $0x3f] sm:$0x1] %vm362_vm8, %v2549_v21  ;;  %v2563_v21 = vrot.slane %v2537_v60, 3 }
 0x2c1   : > { %2607 = vst.msk [vmem:[%s3855_s30 + $0x4f] sm:$0x1] %vm362_vm8, %v2550_v39  ;;  %v2564_v39 = vrot.slane %v2537_v60, 4 }
 0x2c2   : > { %2608 = vst.msk [vmem:[%s3855_s30 + $0x5f] sm:$0x1] %vm362_vm8, %v2551_v43  ;;  %v2565_v43 = vrot.slane %v2537_v60, 5 }
 0x2c3   : > { %2609 = vst.msk [vmem:[%s3855_s30 + $0x6f] sm:$0x1] %vm362_vm8, %v2552_v17  ;;  %v2566_v17 = vrot.slane %v2537_v60, 6 }
 0x2c4   : > { %2610 = vst.msk [vmem:[%s3855_s30 + $0x7f] sm:$0x1] %vm362_vm8, %v2553_v26  ;;  %v2567_v26 = vrot.slane %v2537_v60, 7 }
 0x2c5   : > { %2158 = vst.msk [vmem:[%s3855_s30 + $0x8c] sm:$0x1] %vm362_vm8, %v2081_v32  ;;  %v2087_v32 = vpop.f32.mrf.mxu0 }
 0x2c6   : > { %2159 = vst.msk [vmem:[%s3855_s30 + $0x9c] sm:$0x1] %vm362_vm8, %v2101_v41  ;;  %v2115_v41 = vrot.slane %v2087_v32, 1 }
 0x2c7   : > { %2160 = vst.msk [vmem:[%s3855_s30 + $0xac] sm:$0x1] %vm362_vm8, %v2102_v31  ;;  %v2116_v31 = vrot.slane %v2087_v32, 2 }
 0x2c8   : > { %2161 = vst.msk [vmem:[%s3855_s30 + $0xbc] sm:$0x1] %vm362_vm8, %v2103_v20  ;;  %v2117_v20 = vrot.slane %v2087_v32, 3 }
 0x2c9   : > { %2162 = vst.msk [vmem:[%s3855_s30 + $0xcc] sm:$0x1] %vm362_vm8, %v2104_v12  ;;  %v2118_v12 = vrot.slane %v2087_v32, 4 }
 0x2ca   : > { %2163 = vst.msk [vmem:[%s3855_s30 + $0xdc] sm:$0x1] %vm362_vm8, %v2105_v52  ;;  %v2119_v52 = vrot.slane %v2087_v32, 5 }
 0x2cb   : > { %2164 = vst.msk [vmem:[%s3855_s30 + $0xec] sm:$0x1] %vm362_vm8, %v2106_v7  ;;  %v2120_v7 = vrot.slane %v2087_v32, 6 }
 0x2cc   : > { %2165 = vst.msk [vmem:[%s3855_s30 + $0xfc] sm:$0x1] %vm362_vm8, %v2107_v19  ;;  %v2121_v19 = vrot.slane %v2087_v32, 7 }
 0x2cd   : > { %2303 = vst.msk [vmem:[%s3855_s30 + $0x8d] sm:$0x1] %vm362_vm8, %v2226_v56  ;;  %v2232_v56 = vpop.f32.mrf.mxu1 }
 0x2ce   : > { %2304 = vst.msk [vmem:[%s3855_s30 + $0x9d] sm:$0x1] %vm362_vm8, %v2246_v9  ;;  %v2260_v9 = vrot.slane %v2232_v56, 1 }
 0x2cf   : > { %2305 = vst.msk [vmem:[%s3855_s30 + $0xad] sm:$0x1] %vm362_vm8, %v2247_v22  ;;  %v2261_v22 = vrot.slane %v2232_v56, 2 }
 0x2d0   : > { %2306 = vst.msk [vmem:[%s3855_s30 + $0xbd] sm:$0x1] %vm362_vm8, %v2248_v2  ;;  %v2262_v2 = vrot.slane %v2232_v56, 3 }
 0x2d1   : > { %2307 = vst.msk [vmem:[%s3855_s30 + $0xcd] sm:$0x1] %vm362_vm8, %v2249_v29  ;;  %v2263_v29 = vrot.slane %v2232_v56, 4 }
 0x2d2   : > { %2308 = vst.msk [vmem:[%s3855_s30 + $0xdd] sm:$0x1] %vm362_vm8, %v2250_v33  ;;  %v2264_v33 = vrot.slane %v2232_v56, 5 }
 0x2d3   : > { %2309 = vst.msk [vmem:[%s3855_s30 + $0xed] sm:$0x1] %vm362_vm8, %v2251_v45  ;;  %v2265_v45 = vrot.slane %v2232_v56, 6 }
 0x2d4   : > { %2310 = vst.msk [vmem:[%s3855_s30 + $0xfd] sm:$0x1] %vm362_vm8, %v2252_v27  ;;  %v2266_v27 = vrot.slane %v2232_v56, 7 }
 0x2d5   : > { %2459 = vst.msk [vmem:[%s3855_s30 + $0x8e] sm:$0x1] %vm362_vm8, %v2382_v1  ;;  %v2388_v1 = vpop.f32.mrf.mxu2 }
 0x2d6   : > { %2460 = vst.msk [vmem:[%s3855_s30 + $0x9e] sm:$0x1] %vm362_vm8, %v2402_v5  ;;  %v2416_v5 = vrot.slane %v2388_v1, 1 }
 0x2d7   : > { %2461 = vst.msk [vmem:[%s3855_s30 + $0xae] sm:$0x1] %vm362_vm8, %v2403_v42  ;;  %v2417_v42 = vrot.slane %v2388_v1, 2 }
 0x2d8   : > { %2462 = vst.msk [vmem:[%s3855_s30 + $0xbe] sm:$0x1] %vm362_vm8, %v2404_v6  ;;  %v2418_v6 = vrot.slane %v2388_v1, 3 }
 0x2d9   : > { %2463 = vst.msk [vmem:[%s3855_s30 + $0xce] sm:$0x1] %vm362_vm8, %v2405_v54  ;;  %v2419_v54 = vrot.slane %v2388_v1, 4 }
 0x2da   : > { %2464 = vst.msk [vmem:[%s3855_s30 + $0xde] sm:$0x1] %vm362_vm8, %v2406_v50  ;;  %v2420_v50 = vrot.slane %v2388_v1, 5 }
 0x2db   : > { %2465 = vst.msk [vmem:[%s3855_s30 + $0xee] sm:$0x1] %vm362_vm8, %v2407_v24  ;;  %v2421_v24 = vrot.slane %v2388_v1, 6 }
 0x2dc   : > { %2466 = vst.msk [vmem:[%s3855_s30 + $0xfe] sm:$0x1] %vm362_vm8, %v2408_v35  ;;  %v2422_v35 = vrot.slane %v2388_v1, 7 }
 0x2dd   : > { %2611 = vst.msk [vmem:[%s3855_s30 + $0x8f] sm:$0x1] %vm362_vm8, %v2534_v25  ;;  %v2540_v25 = vpop.f32.mrf.mxu3 }
 0x2de   : > { %2612 = vst.msk [vmem:[%s3855_s30 + $0x9f] sm:$0x1] %vm362_vm8, %v2554_v53  ;;  %v2568_v53 = vrot.slane %v2540_v25, 1 }
 0x2df   : > { %2613 = vst.msk [vmem:[%s3855_s30 + $0xaf] sm:$0x1] %vm362_vm8, %v2555_v18  ;;  %v2569_v18 = vrot.slane %v2540_v25, 2 }
 0x2e0   : > { %2614 = vst.msk [vmem:[%s3855_s30 + $0xbf] sm:$0x1] %vm362_vm8, %v2556_v3  ;;  %v2570_v3 = vrot.slane %v2540_v25, 3 }
 0x2e1   : > { %2615 = vst.msk [vmem:[%s3855_s30 + $0xcf] sm:$0x1] %vm362_vm8, %v2557_v44  ;;  %v2571_v44 = vrot.slane %v2540_v25, 4 }
 0x2e2   : > { %2616 = vst.msk [vmem:[%s3855_s30 + $0xdf] sm:$0x1] %vm362_vm8, %v2558_v0  ;;  %v2572_v0 = vrot.slane %v2540_v25, 5 }
 0x2e3   : > { %2617 = vst.msk [vmem:[%s3855_s30 + $0xef] sm:$0x1] %vm362_vm8, %v2559_v46  ;;  %v2573_v46 = vrot.slane %v2540_v25, 6 }
 0x2e4   : > { %2618 = vst.msk [vmem:[%s3855_s30 + $0xff] sm:$0x1] %vm362_vm8, %v2560_v37 }
 0x2e5   : > { %2166 = vst.msk [vmem:[%s3855_s30 + $0x10c] sm:$0x1] %vm362_vm8, %v2084_v14  ;;  %v2574_v14 = vrot.slane %v2540_v25, 7 }
 0x2e6   : > { %2167 = vst.msk [vmem:[%s3855_s30 + $0x11c] sm:$0x1] %vm362_vm8, %v2108_v15 }
 0x2e7   : > { %2168 = vst.msk [vmem:[%s3855_s30 + $0x12c] sm:$0x1] %vm362_vm8, %v2109_v49 }
 0x2e8   : > { %2169 = vst.msk [vmem:[%s3855_s30 + $0x13c] sm:$0x1] %vm362_vm8, %v2110_v55 }
 0x2e9   : > { %2170 = vst.msk [vmem:[%s3855_s30 + $0x14c] sm:$0x1] %vm362_vm8, %v2111_v61 }
 0x2ea   : > { %2171 = vst.msk [vmem:[%s3855_s30 + $0x15c] sm:$0x1] %vm362_vm8, %v2112_v30 }
 0x2eb   : > { %2172 = vst.msk [vmem:[%s3855_s30 + $0x16c] sm:$0x1] %vm362_vm8, %v2113_v48 }
 0x2ec   : > { %2173 = vst.msk [vmem:[%s3855_s30 + $0x17c] sm:$0x1] %vm362_vm8, %v2114_v34 }
 0x2ed   : > { %2311 = vst.msk [vmem:[%s3855_s30 + $0x10d] sm:$0x1] %vm362_vm8, %v2229_v59 }
 0x2ee   : > { %2312 = vst.msk [vmem:[%s3855_s30 + $0x11d] sm:$0x1] %vm362_vm8, %v2253_v63 }
 0x2ef   : > { %2313 = vst.msk [vmem:[%s3855_s30 + $0x12d] sm:$0x1] %vm362_vm8, %v2254_v13 }
 0x2f0   : > { %2314 = vst.msk [vmem:[%s3855_s30 + $0x13d] sm:$0x1] %vm362_vm8, %v2255_v47 }
 0x2f1   : > { %2315 = vst.msk [vmem:[%s3855_s30 + $0x14d] sm:$0x1] %vm362_vm8, %v2256_v51 }
 0x2f2   : > { %2316 = vst.msk [vmem:[%s3855_s30 + $0x15d] sm:$0x1] %vm362_vm8, %v2257_v4 }
 0x2f3   : > { %2317 = vst.msk [vmem:[%s3855_s30 + $0x16d] sm:$0x1] %vm362_vm8, %v2258_v58 }
 0x2f4   : > { %2318 = vst.msk [vmem:[%s3855_s30 + $0x17d] sm:$0x1] %vm362_vm8, %v2259_v40 }
 0x2f5   : > { %2467 = vst.msk [vmem:[%s3855_s30 + $0x10e] sm:$0x1] %vm362_vm8, %v2385_v57 }
 0x2f6   : > { %2468 = vst.msk [vmem:[%s3855_s30 + $0x11e] sm:$0x1] %vm362_vm8, %v2409_v36 }
 0x2f7   : > { %2469 = vst.msk [vmem:[%s3855_s30 + $0x12e] sm:$0x1] %vm362_vm8, %v2410_v11 }
 0x2f8   : > { %2470 = vst.msk [vmem:[%s3855_s30 + $0x13e] sm:$0x1] %vm362_vm8, %v2411_v8 }
 0x2f9   : > { %2471 = vst.msk [vmem:[%s3855_s30 + $0x14e] sm:$0x1] %vm362_vm8, %v2412_v28 }
 0x2fa   : > { %2472 = vst.msk [vmem:[%s3855_s30 + $0x15e] sm:$0x1] %vm362_vm8, %v2413_v62 }
 0x2fb   : > { %2473 = vst.msk [vmem:[%s3855_s30 + $0x16e] sm:$0x1] %vm362_vm8, %v2414_v38 }
 0x2fc   : > { %2474 = vst.msk [vmem:[%s3855_s30 + $0x17e] sm:$0x1] %vm362_vm8, %v2415_v10 }
 0x2fd   : > { %2619 = vst.msk [vmem:[%s3855_s30 + $0x10f] sm:$0x1] %vm362_vm8, %v2537_v60 }
 0x2fe   : > { %2620 = vst.msk [vmem:[%s3855_s30 + $0x11f] sm:$0x1] %vm362_vm8, %v2561_v23 }
 0x2ff   : > { %2621 = vst.msk [vmem:[%s3855_s30 + $0x12f] sm:$0x1] %vm362_vm8, %v2562_v16 }
 0x300   : > { %2622 = vst.msk [vmem:[%s3855_s30 + $0x13f] sm:$0x1] %vm362_vm8, %v2563_v21 }
 0x301   : > { %2623 = vst.msk [vmem:[%s3855_s30 + $0x14f] sm:$0x1] %vm362_vm8, %v2564_v39 }
 0x302   : > { %2624 = vst.msk [vmem:[%s3855_s30 + $0x15f] sm:$0x1] %vm362_vm8, %v2565_v43 }
 0x303   : > { %2625 = vst.msk [vmem:[%s3855_s30 + $0x16f] sm:$0x1] %vm362_vm8, %v2566_v17 }
 0x304   : > { %2626 = vst.msk [vmem:[%s3855_s30 + $0x17f] sm:$0x1] %vm362_vm8, %v2567_v26 }
 0x305   : > { %2174 = vst.msk [vmem:[%s3855_s30 + $0x18c] sm:$0x1] %vm362_vm8, %v2087_v32 }
 0x306   : > { %2175 = vst.msk [vmem:[%s3855_s30 + $0x19c] sm:$0x1] %vm362_vm8, %v2115_v41 }
 0x307   : > { %2176 = vst.msk [vmem:[%s3855_s30 + $0x1ac] sm:$0x1] %vm362_vm8, %v2116_v31 }
 0x308   : > { %2177 = vst.msk [vmem:[%s3855_s30 + $0x1bc] sm:$0x1] %vm362_vm8, %v2117_v20 }
 0x309   : > { %2178 = vst.msk [vmem:[%s3855_s30 + $0x1cc] sm:$0x1] %vm362_vm8, %v2118_v12 }
 0x30a   : > { %2179 = vst.msk [vmem:[%s3855_s30 + $0x1dc] sm:$0x1] %vm362_vm8, %v2119_v52 }
 0x30b   : > { %2180 = vst.msk [vmem:[%s3855_s30 + $0x1ec] sm:$0x1] %vm362_vm8, %v2120_v7 }
 0x30c   : > { %2181 = vst.msk [vmem:[%s3855_s30 + $0x1fc] sm:$0x1] %vm362_vm8, %v2121_v19 }
 0x30d   : > { %2319 = vst.msk [vmem:[%s3855_s30 + $0x18d] sm:$0x1] %vm362_vm8, %v2232_v56 }
 0x30e   : > { %2320 = vst.msk [vmem:[%s3855_s30 + $0x19d] sm:$0x1] %vm362_vm8, %v2260_v9 }
 0x30f   : > { %2321 = vst.msk [vmem:[%s3855_s30 + $0x1ad] sm:$0x1] %vm362_vm8, %v2261_v22 }
 0x310   : > { %2322 = vst.msk [vmem:[%s3855_s30 + $0x1bd] sm:$0x1] %vm362_vm8, %v2262_v2 }
 0x311   : > { %2323 = vst.msk [vmem:[%s3855_s30 + $0x1cd] sm:$0x1] %vm362_vm8, %v2263_v29 }
 0x312   : > { %2324 = vst.msk [vmem:[%s3855_s30 + $0x1dd] sm:$0x1] %vm362_vm8, %v2264_v33 }
 0x313   : > { %2325 = vst.msk [vmem:[%s3855_s30 + $0x1ed] sm:$0x1] %vm362_vm8, %v2265_v45 }
 0x314   : > { %2326 = vst.msk [vmem:[%s3855_s30 + $0x1fd] sm:$0x1] %vm362_vm8, %v2266_v27 }
 0x315   : > { %2475 = vst.msk [vmem:[%s3855_s30 + $0x18e] sm:$0x1] %vm362_vm8, %v2388_v1 }
 0x316   : > { %2476 = vst.msk [vmem:[%s3855_s30 + $0x19e] sm:$0x1] %vm362_vm8, %v2416_v5 }
 0x317   : > { %2477 = vst.msk [vmem:[%s3855_s30 + $0x1ae] sm:$0x1] %vm362_vm8, %v2417_v42 }
 0x318   : > { %2478 = vst.msk [vmem:[%s3855_s30 + $0x1be] sm:$0x1] %vm362_vm8, %v2418_v6 }
 0x319   : > { %2479 = vst.msk [vmem:[%s3855_s30 + $0x1ce] sm:$0x1] %vm362_vm8, %v2419_v54 }
 0x31a   : > { %2480 = vst.msk [vmem:[%s3855_s30 + $0x1de] sm:$0x1] %vm362_vm8, %v2420_v50 }
 0x31b   : > { %2481 = vst.msk [vmem:[%s3855_s30 + $0x1ee] sm:$0x1] %vm362_vm8, %v2421_v24 }
 0x31c   : > { %2482 = vst.msk [vmem:[%s3855_s30 + $0x1fe] sm:$0x1] %vm362_vm8, %v2422_v35 }
 0x31d   : > { %2627 = vst.msk [vmem:[%s3855_s30 + $0x18f] sm:$0x1] %vm362_vm8, %v2540_v25 }
 0x31e   : > { %2628 = vst.msk [vmem:[%s3855_s30 + $0x19f] sm:$0x1] %vm362_vm8, %v2568_v53 }
 0x31f   : > { %2629 = vst.msk [vmem:[%s3855_s30 + $0x1af] sm:$0x1] %vm362_vm8, %v2569_v18 }
 0x320   : > { %2630 = vst.msk [vmem:[%s3855_s30 + $0x1bf] sm:$0x1] %vm362_vm8, %v2570_v3 }
 0x321   : > { %2631 = vst.msk [vmem:[%s3855_s30 + $0x1cf] sm:$0x1] %vm362_vm8, %v2571_v44 }
 0x322   : > { %2632 = vst.msk [vmem:[%s3855_s30 + $0x1df] sm:$0x1] %vm362_vm8, %v2572_v0 }
 0x323   : > { %2633 = vst.msk [vmem:[%s3855_s30 + $0x1ef] sm:$0x1] %vm362_vm8, %v2573_v46 }
 0x324   : > { %2634 = vst.msk [vmem:[%s3855_s30 + $0x1ff] sm:$0x1] %vm362_vm8, %v2574_v14 }
 0x325 PF: > { %s12_s11 = sadd.s32 1, %s2990_s11   ;;  %s4915_s9 = smov %s2986_s10 }
 0x326   : > { %p9_p5 = scmp.ge.s32.totalorder %s12_s11, 4   ;;  %s4916_s10 = smov %s4918_s12 }
 0x328   :  { %11 = sbr.rel (!%p9_p5) target bundleno = 2 (0x2), region = 59 }

</bundles_post_ra>
